<compile_context>
chip_gen: v5e
topology: v5e:2x2
jax: 0.10.0
libtpu: 0.0.40
codegen_flags: <defaults>
</compile_context>

<pallas_src>
import functools
import numpy as np
import jax
import jax.numpy as jnp
from jax.experimental import pallas as pl
from jax.experimental.pallas import tpu as pltpu

# ----------------------------- small config ---------------------------------
B = 2            # batch
IMG = 64         # input spatial (stands in for 448)
PAD = 32         # pad_side (stands in for 224)
PART = 32        # part crop size (stands in for 224)
FEAT_C = 64      # backbone feature channels (stands in for 2048)
N_CLASS = 10     # n_class (stands in for 200)
TOPN = 4
CAT_NUM = 2      # CAT_NUM <= TOPN
CPAD = 128       # lane-padded channel width carried between layers


def _round_up(x, m):
    return (x + m - 1) // m * m


# --------------------------- parameter packing -------------------------------
def pack_conv(key, kh, kw, cin, cout, cin_pad):
    """Random conv weight packed MXU-ready once at init: col-matrix (Kp, Np)
    bf16 ordered (ki, kj, cin_pad) to match the in-kernel tap concat."""
    kw_, kb_ = jax.random.split(key)
    w = jax.random.normal(kw_, (kh, kw, cin, cout), jnp.float32) / np.sqrt(kh * kw * cin)
    b = jax.random.normal(kb_, (cout,), jnp.float32) * 0.01
    np_ = _round_up(cout, 128)
    wp = jnp.pad(w, ((0, 0), (0, 0), (0, cin_pad - cin), (0, np_ - cout)))
    k = kh * kw * cin_pad
    kp = _round_up(k, 128)
    wp = jnp.pad(wp.reshape(k, np_), ((0, kp - k), (0, 0))).astype(jnp.bfloat16)
    bp = jnp.pad(b, (0, np_ - cout)).reshape(1, np_)
    return dict(w=wp, b=bp, kh=kh, kw=kw, cin=cin_pad, n=cout, np=np_)


def pack_linear(key, cin, cout, cin_pad, n_seg=1):
    """Linear weight whose input is n_seg segments of cin real rows, each
    carried at cin_pad padded width (zero rows inserted at padded channels)."""
    kw_, kb_ = jax.random.split(key)
    w = jax.random.normal(kw_, (n_seg, cin, cout), jnp.float32) / np.sqrt(n_seg * cin)
    b = jax.random.normal(kb_, (cout,), jnp.float32) * 0.01
    np_ = _round_up(cout, 128)
    wp = jnp.pad(w, ((0, 0), (0, cin_pad - cin), (0, np_ - cout)))
    wp = wp.reshape(n_seg * cin_pad, np_).astype(jnp.bfloat16)
    bp = jnp.pad(b, (0, np_ - cout)).reshape(1, np_)
    return dict(w=wp, b=bp, n=cout, np=np_)


def pack_tidy(key, cin):
    """tidy1/2/3 1x1 convs -> three f32 weight rows (VPU path) + host biases
    (bias is added outside the kernel on the tiny score vectors)."""
    kw_, kb_ = jax.random.split(key)
    w = jax.random.normal(kw_, (3, cin), jnp.float32) / np.sqrt(cin)
    b = jax.random.normal(kb_, (3,), jnp.float32) * 0.01
    return w, np.asarray(b)


def init_params(key):
    ks = jax.random.split(key, 9)
    p = {}
    # synthetic backbone (stand-in for resnet50)
    p['ba'] = pack_conv(ks[0], 3, 3, 3, 32, cin_pad=3)           # stride 4
    p['bb'] = pack_conv(ks[1], 3, 3, 32, FEAT_C, cin_pad=CPAD)   # stride 2
    p['fc'] = pack_linear(ks[2], FEAT_C, N_CLASS, cin_pad=CPAD)
    # ProposalNet
    p['d1'] = pack_conv(ks[3], 3, 3, FEAT_C, 128, cin_pad=CPAD)
    p['d2'] = pack_conv(ks[4], 3, 3, 128, 128, cin_pad=CPAD)
    p['d3'] = pack_conv(ks[5], 3, 3, 128, 128, cin_pad=CPAD)
    p['tidy_w'], p['tidy_b'] = pack_tidy(ks[6], 128)
    # heads
    p['concat'] = pack_linear(ks[7], FEAT_C, N_CLASS, cin_pad=CPAD, n_seg=CAT_NUM + 2)
    p['part'] = pack_linear(ks[8], FEAT_C, N_CLASS, cin_pad=CPAD)
    return p


# ------------------ in-kernel im2col helpers (VMEM only) ---------------------
def _pad_hw(x, ph, pw):
    """Spatial zero pad of an in-kernel (H, W, C) value via concatenate
    (jnp.pad/lax.pad is avoided inside the kernel)."""
    h, w, c = x.shape
    zc = jnp.zeros((h, pw, c), x.dtype)
    x = jnp.concatenate([zc, x, zc], axis=1)
    zr = jnp.zeros((ph, w + 2 * pw, c), x.dtype)
    return jnp.concatenate([zr, x, zr], axis=0)


def _s2d_col(x, kh, kw, stride, oh, ow, cin, kp):
    """im2col built in VMEM from a padded + space-to-depth'd activation value
    x (Hs, Ws, stride*stride*cin).  Static unit-stride slices only."""
    taps = []
    for ki in range(kh):
        qi, ri = divmod(ki, stride)
        for kj in range(kw):
            qj, rj = divmod(kj, stride)
            ph = ri * stride + rj
            taps.append(x[qi:qi + oh, qj:qj + ow, ph * cin:(ph + 1) * cin])
    k = kh * kw * cin
    if kp > k:
        taps.append(jnp.zeros((oh, ow, kp - k), x.dtype))
    col = jnp.concatenate(taps, axis=-1)
    return col.reshape(oh * ow, kp)


def _dec_col(xp, oh, ow, cin, kp):
    """im2col of a 3x3 stride-2 conv whose (spatially padded) input xp lives
    in VMEM.  Decimation done with static width-1 slices + concats (no strided
    ops, no space-to-depth needed for in-kernel intermediates)."""
    taps = []
    for ki in range(3):
        rows = jnp.concatenate(
            [xp[ki + 2 * a:ki + 2 * a + 1] for a in range(oh)], axis=0)
        for kj in range(3):
            taps.append(jnp.concatenate(
                [rows[:, kj + 2 * b:kj + 2 * b + 1, :] for b in range(ow)], axis=1))
    k = 9 * cin
    if kp > k:
        taps.append(jnp.zeros((oh, ow, kp - k), xp.dtype))
    col = jnp.concatenate(taps, axis=-1)
    return col.reshape(oh * ow, kp)


# ----------------------- XLA-side prep (1x relayout) --------------------------
def _prep_s2d(x, pad, stride):
    """Spatial pad + space-to-depth (bf16).  One pass over the activation --
    this replaces the old 9x-inflated HBM im2col patch matrix."""
    x = x.astype(jnp.bfloat16)
    b, h, w, c = x.shape
    hp = _round_up(h + 2 * pad, stride)
    wp = _round_up(w + 2 * pad, stride)
    x = jnp.pad(x, ((0, 0), (pad, hp - h - pad), (pad, wp - w - pad), (0, 0)))
    if stride == 1:
        return x
    hs, ws = hp // stride, wp // stride
    x = x.reshape(b, hs, stride, ws, stride, c)
    x = x.transpose(0, 1, 3, 2, 4, 5)
    return x.reshape(b, hs, ws, stride * stride * c)


# ------------------------------- conv kernels --------------------------------
def _conv_kernel(x_ref, w_ref, b_ref, o_ref, *, kh, kw, stride, oh, ow, cin):
    col = _s2d_col(x_ref[0], kh, kw, stride, oh, ow, cin, w_ref.shape[0])
    y = jnp.dot(col, w_ref[...], preferred_element_type=jnp.float32)
    y = jnp.maximum(y + b_ref[...], 0.0)
    o_ref[0] = y.astype(o_ref.dtype)


def _conv_pool_head_kernel(x_ref, w_ref, b_ref, hw_ref, hb_ref,
                           o_ref, f_ref, l_ref, *, kh, kw, stride, oh, ow, cin):
    col = _s2d_col(x_ref[0], kh, kw, stride, oh, ow, cin, w_ref.shape[0])
    y = jnp.dot(col, w_ref[...], preferred_element_type=jnp.float32)
    y = jnp.maximum(y + b_ref[...], 0.0)
    o_ref[0] = y.astype(o_ref.dtype)                  # conv feature map (bf16)
    feat = jnp.mean(y, axis=0)                        # AdaptiveAvgPool2d(1), f32
    f_ref[0, 0] = feat
    logits = jnp.dot(feat[None, :].astype(jnp.bfloat16), hw_ref[...],
                     preferred_element_type=jnp.float32) + hb_ref[...]
    l_ref[0] = logits


def _proposal_kernel(x_ref, w1_ref, b1_ref, w2_ref, b2_ref, w3_ref, b3_ref,
                     tw_ref, small_ref, large_ref, *, oh, ow, c):
    """Whole ProposalNet (down1/2/3 + tidy1/2/3) for one image; intermediates
    never leave VMEM.  tidy scores are VPU multiplies + lane sums (f32)."""
    x = x_ref[0]                                      # (oh, ow, 128) bf16
    tw = tw_ref[...]                                  # (3, 128) f32

    # down1: 3x3 stride 1
    xp = _pad_hw(x, 1, 1)
    col1 = _s2d_col(xp, 3, 3, 1, oh, ow, c, w1_ref.shape[0])
    d1 = jnp.maximum(jnp.dot(col1, w1_ref[...],
                             preferred_element_type=jnp.float32) + b1_ref[...], 0.0)
    t1 = jnp.sum(d1 * tw[0:1, :], axis=-1)            # (oh*ow,)

    # down2: 3x3 stride 2
    oh2, ow2 = oh // 2, ow // 2
    d1p = _pad_hw(d1.astype(jnp.bfloat16).reshape(oh, ow, c), 1, 1)
    col2 = _dec_col(d1p, oh2, ow2, c, w2_ref.shape[0])
    d2 = jnp.maximum(jnp.dot(col2, w2_ref[...],
                             preferred_element_type=jnp.float32) + b2_ref[...], 0.0)
    t2 = jnp.sum(d2 * tw[1:2, :], axis=-1)            # (oh2*ow2,)

    # down3: 3x3 stride 2
    oh3, ow3 = oh2 // 2, ow2 // 2
    d2p = _pad_hw(d2.astype(jnp.bfloat16).reshape(oh2, ow2, c), 1, 1)
    col3 = _dec_col(d2p, oh3, ow3, c, w3_ref.shape[0])
    d3 = jnp.maximum(jnp.dot(col3, w3_ref[...],
                             preferred_element_type=jnp.float32) + b3_ref[...], 0.0)
    t3 = jnp.sum(d3 * tw[2:3, :], axis=-1)            # (oh3*ow3,)

    small_ref[0, 0] = jnp.concatenate([t1, t2])
    large_ref[0, 0] = t3


# ------------------------------- conv wrappers --------------------------------
def conv_block(x, pk, stride, pad):
    """3x3 conv + bias + ReLU; output (B, OH*OW, Np) bf16, lane-padded."""
    xs = _prep_s2d(x, pad, stride)
    b, hs, ws, cs = xs.shape
    oh = (x.shape[1] + 2 * pad - pk['kh']) // stride + 1
    ow = (x.shape[2] + 2 * pad - pk['kw']) // stride + 1
    assert oh + (pk['kh'] - 1) // stride <= hs and ow + (pk['kw'] - 1) // stride <= ws
    kern = functools.partial(_conv_kernel, kh=pk['kh'], kw=pk['kw'],
                             stride=stride, oh=oh, ow=ow, cin=pk['cin'])
    out = pl.pallas_call(
        kern,
        out_shape=jax.ShapeDtypeStruct((b, oh * ow, pk['np']), jnp.bfloat16),
        grid_spec=pltpu.PrefetchScalarGridSpec(
            num_scalar_prefetch=0, grid=(b,),
            in_specs=[pl.BlockSpec((1, hs, ws, cs), lambda i: (i, 0, 0, 0)),
                      pl.BlockSpec(pk['w'].shape, lambda i: (0, 0)),
                      pl.BlockSpec(pk['b'].shape, lambda i: (0, 0))],
            out_specs=pl.BlockSpec((1, oh * ow, pk['np']), lambda i: (i, 0, 0))),
        compiler_params=pltpu.CompilerParams(dimension_semantics=("parallel",)),
    )(xs, pk['w'], pk['b'])
    return out, oh, ow


def conv_pool_head_block(x, pk, hk, stride, pad):
    """conv + ReLU + global avg pool + fused classification head (one call)."""
    xs = _prep_s2d(x, pad, stride)
    b, hs, ws, cs = xs.shape
    oh = (x.shape[1] + 2 * pad - pk['kh']) // stride + 1
    ow = (x.shape[2] + 2 * pad - pk['kw']) // stride + 1
    assert oh + (pk['kh'] - 1) // stride <= hs and ow + (pk['kw'] - 1) // stride <= ws
    kern = functools.partial(_conv_pool_head_kernel, kh=pk['kh'], kw=pk['kw'],
                             stride=stride, oh=oh, ow=ow, cin=pk['cin'])
    rpn, feat, logits = pl.pallas_call(
        kern,
        out_shape=(jax.ShapeDtypeStruct((b, oh * ow, pk['np']), jnp.bfloat16),
                   jax.ShapeDtypeStruct((b, 1, pk['np']), jnp.float32),
                   jax.ShapeDtypeStruct((b, 1, hk['np']), jnp.float32)),
        grid_spec=pltpu.PrefetchScalarGridSpec(
            num_scalar_prefetch=0, grid=(b,),
            in_specs=[pl.BlockSpec((1, hs, ws, cs), lambda i: (i, 0, 0, 0)),
                      pl.BlockSpec(pk['w'].shape, lambda i: (0, 0)),
                      pl.BlockSpec(pk['b'].shape, lambda i: (0, 0)),
                      pl.BlockSpec(hk['w'].shape, lambda i: (0, 0)),
                      pl.BlockSpec(hk['b'].shape, lambda i: (0, 0))],
            out_specs=[pl.BlockSpec((1, oh * ow, pk['np']), lambda i: (i, 0, 0)),
                       pl.BlockSpec((1, 1, pk['np']), lambda i: (i, 0, 0)),
                       pl.BlockSpec((1, 1, hk['np']), lambda i: (i, 0, 0))]),
        compiler_params=pltpu.CompilerParams(dimension_semantics=("parallel",)),
    )(xs, pk['w'], pk['b'], hk['w'], hk['b'])
    return rpn, feat.reshape(b, pk['np']), logits.reshape(b, hk['np']), oh, ow


def proposal_net(params, rpn_feature, oh, ow):
    """Single fused pallas_call for the entire ProposalNet."""
    b = rpn_feature.shape[0]
    c = rpn_feature.shape[-1]
    x = rpn_feature.reshape(b, oh, ow, c)
    n_small = oh * ow + (oh // 2) * (ow // 2)
    n_large = (oh // 4) * (ow // 4)
    kern = functools.partial(_proposal_kernel, oh=oh, ow=ow, c=c)
    d1, d2, d3, tw = params['d1'], params['d2'], params['d3'], params['tidy_w']
    small, large = pl.pallas_call(
        kern,
        out_shape=(jax.ShapeDtypeStruct((b, 1, n_small), jnp.float32),
                   jax.ShapeDtypeStruct((b, 1, n_large), jnp.float32)),
        grid_spec=pltpu.PrefetchScalarGridSpec(
            num_scalar_prefetch=0, grid=(b,),
            in_specs=[pl.BlockSpec((1, oh, ow, c), lambda i: (i, 0, 0, 0)),
                      pl.BlockSpec(d1['w'].shape, lambda i: (0, 0)),
                      pl.BlockSpec(d1['b'].shape, lambda i: (0, 0)),
                      pl.BlockSpec(d2['w'].shape, lambda i: (0, 0)),
                      pl.BlockSpec(d2['b'].shape, lambda i: (0, 0)),
                      pl.BlockSpec(d3['w'].shape, lambda i: (0, 0)),
                      pl.BlockSpec(d3['b'].shape, lambda i: (0, 0)),
                      pl.BlockSpec(tw.shape, lambda i: (0, 0))],
            out_specs=[pl.BlockSpec((1, 1, n_small), lambda i: (i, 0, 0)),
                       pl.BlockSpec((1, 1, n_large), lambda i: (i, 0, 0))]),
        compiler_params=pltpu.CompilerParams(dimension_semantics=("parallel",)),
    )(x, d1['w'], d1['b'], d2['w'], d2['b'], d3['w'], d3['b'], tw)
    tb = params['tidy_b']
    bias_small = jnp.concatenate(
        [jnp.full((oh * ow,), tb[0], jnp.float32),
         jnp.full(((oh // 2) * (ow // 2),), tb[1], jnp.float32)])
    small = small.reshape(b, n_small) + bias_small
    large = large.reshape(b, n_large) + tb[2]
    return small, large


# ------------------------- tiny dense head (concat) ---------------------------
def _linear_kernel(x_ref, w_ref, b_ref, o_ref):
    o_ref[...] = jnp.dot(x_ref[...], w_ref[...],
                         preferred_element_type=jnp.float32) + b_ref[...]


def pallas_linear(x, pk):
    m, k = x.shape
    mp = _round_up(max(m, 16), 16)        # bf16 sublane tile = 16 rows
    xp = jnp.pad(x.astype(jnp.bfloat16), ((0, mp - m), (0, pk['w'].shape[0] - k)))
    out = pl.pallas_call(
        _linear_kernel,
        out_shape=jax.ShapeDtypeStruct((mp, pk['np']), jnp.float32),
    )(xp, pk['w'], pk['b'])
    return out[:m]                        # keep 128-padded lanes (class slice at the end)


# ------------------------------ sub-networks ---------------------------------
def backbone(params, x, head):
    """Returns (head(feature) padded, conv feature map, pooled feature)."""
    h, oh1, ow1 = conv_block(x, params['ba'], stride=4, pad=1)
    h = h.reshape(x.shape[0], oh1, ow1, params['ba']['np'])
    rpn, feature, logits, oh2, ow2 = conv_pool_head_block(
        h, params['bb'], head, stride=2, pad=1)
    return logits, rpn, feature, oh2, ow2


# ------------------------------ device crop+resize ----------------------------
def crop_resize_bilinear(x_pad, boxes, out_size):
    """torch F.interpolate(mode='bilinear', align_corners=True) of dynamic
    crops, done on device with pure-JAX gathers (boxes are data dependent,
    so this stays outside Pallas)."""
    t = jnp.linspace(0.0, 1.0, out_size)

    def one(img, box):
        bf = box.astype(jnp.float32)
        y0, x0, y1, x1 = bf[0], bf[1], bf[2], bf[3]
        ys = y0 + t * (y1 - 1.0 - y0)
        xs = x0 + t * (x1 - 1.0 - x0)
        yf = jnp.floor(ys)
        xf = jnp.floor(xs)
        wy = (ys - yf)[:, None, None]
        wx = (xs - xf)[None, :, None]
        y0i = yf.astype(jnp.int32)
        x0i = xf.astype(jnp.int32)
        y1i = jnp.minimum(y0i + 1, box[2] - 1)
        x1i = jnp.minimum(x0i + 1, box[3] - 1)
        r0 = img[y0i]
        r1 = img[y1i]
        ia, ib = r0[:, x0i], r0[:, x1i]
        ic, idd = r1[:, x0i], r1[:, x1i]
        return (ia * (1 - wy) * (1 - wx) + ib * (1 - wy) * wx +
                ic * wy * (1 - wx) + idd * wy * wx)

    return jax.vmap(lambda img, bs: jax.vmap(lambda bx: one(img, bx))(bs))(x_pad, boxes)


# ------------------------------ host-side glue --------------------------------
def hard_nms(cdds, topn=10, iou_thresh=0.25):
    cdds = cdds[np.argsort(cdds[:, 0])]
    res = cdds
    cdd_results = []
    while res.any():
        cdd = res[-1]
        cdd_results.append(cdd)
        if len(cdd_results) == topn:
            break
        res = res[:-1]
        start_max = np.maximum(res[:, 1:3], cdd[1:3])
        end_min = np.minimum(res[:, 3:5], cdd[3:5])
        lengths = end_min - start_max
        inter = lengths[:, 0] * lengths[:, 1]
        inter[np.logical_or(lengths[:, 0] < 0, lengths[:, 1] < 0)] = 0
        iou = inter / ((res[:, 3] - res[:, 1]) * (res[:, 4] - res[:, 2]) +
                       (cdd[3] - cdd[1]) * (cdd[4] - cdd[2]) - inter)
        res = res[iou < iou_thresh]
    while len(cdd_results) < topn:   # guard: candidate exhaustion (reference would crash)
        cdd_results.append(cdd_results[-1])
    return np.array(cdd_results)


def make_anchors():
    """Deterministic stand-in for generate_default_anchor_maps (+PAD offset)."""
    small = []
    for gy in range(8):                      # matches tidy1 (8x8) locations
        for gx in range(8):
            cy, cx = PAD + 4 + 8 * gy, PAD + 4 + 8 * gx
            small.append((cy - 6, cx - 6, cy + 6, cx + 6))
    for gy in range(4):                      # matches tidy2 (4x4) locations
        for gx in range(4):
            cy, cx = PAD + 8 + 16 * gy, PAD + 8 + 16 * gx
            small.append((cy - 10, cx - 10, cy + 10, cx + 10))
    large = []
    for gy in range(2):                      # matches tidy3 (2x2) locations
        for gx in range(2):
            y0, x0 = PAD + 32 * gy, PAD + 32 * gx
            large.append((y0, x0, y0 + 32, x0 + 32))
    return np.array(small, np.int64), np.array(large, np.int64)


# ------------------------------ attention_net.forward -------------------------
def attention_net_forward(params, x, img_raw, anchors_small, anchors_large,
                          topN=TOPN, add=False):
    batch = x.shape[0]

    @jax.jit
    def stage1(xx):
        resnet_out_p, rpn, feature, oh, ow = backbone(params, xx, params['fc'])
        small, large = proposal_net(params, jax.lax.stop_gradient(rpn), oh, ow)
        return resnet_out_p, feature, small, large

    @jax.jit
    def stage2(xx, boxes, feature):
        x_pad = jnp.pad(xx, ((0, 0), (PAD, PAD), (PAD, PAD), (0, 0)))
        part_imgs = crop_resize_bilinear(x_pad, boxes, PART)
        part_imgs = part_imgs.reshape(batch * topN, PART, PART, 3)
        part_logits_p, _, part_features, _, _ = backbone(
            params, jax.lax.stop_gradient(part_imgs), params['part'])
        part_feature = part_features.reshape(batch, topN, -1)[:, :CAT_NUM, :]
        part_feature = part_feature.reshape(batch, -1)
        # add=False => x2 == x, so the torch third backbone pass recomputes
        # exactly `feature`; reuse it.  TODO(synk): add=True re-crop path.
        feature2 = feature
        concat_out = jnp.concatenate([part_feature, feature, feature2], axis=1)
        concat_logits_p = pallas_linear(concat_out, params['concat'])
        return concat_logits_p, part_logits_p

    resnet_out_p, feature, rpn_score_small, rpn_score_large = stage1(x)

    # ---- host: hard-NMS (data-dependent, like the torch .cpu() round trip) ----
    scores_small_np = np.asarray(jax.device_get(rpn_score_small), np.float64)
    scores_large_np = np.asarray(jax.device_get(rpn_score_large), np.float64)

    def nms_side(scores_np, anchors):
        all_cdds = [np.concatenate((s.reshape(-1, 1),
                                    anchors.copy().astype(np.float64),
                                    np.arange(len(s)).reshape(-1, 1)), axis=1)
                    for s in scores_np]
        top = np.array([hard_nms(c, topn=topN // 2, iou_thresh=0.1) for c in all_cdds])
        return top, top[:, :, -1].astype(int)

    top_n_cdds_small, top_n_index_small = nms_side(scores_small_np, anchors_small)
    top_n_cdds_large, top_n_index_large = nms_side(scores_large_np, anchors_large)

    top_n_prob_small = jnp.take_along_axis(
        rpn_score_small, jnp.asarray(top_n_index_small), axis=1)
    top_n_prob_large = jnp.take_along_axis(
        rpn_score_large, jnp.asarray(top_n_index_large), axis=1)

    # part boxes: [small_0, small_1, large_0, large_1] (matches torch slotting)
    boxes = np.concatenate([top_n_cdds_small[:, :, 1:5],
                            top_n_cdds_large[:, :, 1:5]], axis=1).astype(np.int32)

    concat_logits_p, part_logits_p = stage2(x, jnp.asarray(boxes), feature)

    top_n_index = jnp.concatenate([jnp.asarray(top_n_index_small),
                                   jnp.asarray(top_n_index_large)], axis=1)
    top_n_prob = jnp.concatenate([top_n_prob_small, top_n_prob_large], axis=1)

    # single class-lane slice at the very end (everything stays 128-padded above)
    raw_logits = resnet_out_p[:, :N_CLASS]
    concat_logits = concat_logits_p[:, :N_CLASS]
    part_logits = part_logits_p.reshape(batch, topN, -1)[:, :, :N_CLASS]
    return [raw_logits, concat_logits, part_logits, top_n_index, top_n_prob]


# ------------------------------------ main ------------------------------------
if __name__ == "__main__":
    key = jax.random.PRNGKey(0)
    k_param, k_x, k_raw = jax.random.split(key, 3)
    params = init_params(k_param)
    x = jax.random.normal(k_x, (B, IMG, IMG, 3), jnp.float32)        # NHWC
    img_raw = jax.random.normal(k_raw, (B, 96, 96, 3), jnp.float32)  # unused (add=False)
    anchors_small, anchors_large = make_anchors()

    outs = attention_net_forward(params, x, img_raw, anchors_small, anchors_large)
    for o in outs:
        jax.block_until_ready(o)

    raw_logits, concat_logits, part_logits, top_n_index, top_n_prob = outs
    assert raw_logits.shape == (B, N_CLASS)
    assert concat_logits.shape == (B, N_CLASS)
    assert part_logits.shape == (B, TOPN, N_CLASS)
    assert top_n_index.shape == (B, TOPN)
    assert top_n_prob.shape == (B, TOPN)
    print("KERNEL_OK")
</pallas_src>

<mosaic_0001>
module attributes {stable_mosaic.version = 11 : i64} {
  func.func @_conv_kernel(%arg0: i32, %arg1: memref<1x17x17x48xbf16, #tpu.memory_space<vmem>>, %arg2: memref<128x128xbf16, #tpu.memory_space<vmem>>, %arg3: memref<1x128xf32, #tpu.memory_space<vmem>>, %arg4: memref<1x256x128xbf16, #tpu.memory_space<vmem>>) attributes {dimension_semantics = [#tpu.dimension_semantics<parallel>], iteration_bounds = array<i64: 2>, scalar_prefetch = 0 : i64, scratch_operands = 0 : i64, tpu.core_type = #tpu.core_type<tc>, window_params = [{transform_indices = @transform_0, window_bounds = array<i64: 1, 17, 17, 48>}, {pipeline_mode = #tpu.pipeline_mode<synchronous>, transform_indices = @transform_1, window_bounds = array<i64: 128, 128>}, {pipeline_mode = #tpu.pipeline_mode<synchronous>, transform_indices = @transform_2, window_bounds = array<i64: 1, 128>}, {transform_indices = @transform_3, window_bounds = array<i64: 1, 256, 128>}]} {
    %c0 = arith.constant 0 : index
    %c0_0 = arith.constant 0 : index
    %c0_1 = arith.constant 0 : index
    %c0_2 = arith.constant 0 : index
    %0 = vector.load %arg1[%c0, %c0_0, %c0_1, %c0_2] : memref<1x17x17x48xbf16, #tpu.memory_space<vmem>>, vector<1x17x17x48xbf16>
    %1 = vector.shape_cast %0 : vector<1x17x17x48xbf16> to vector<17x17x48xbf16>
    %2 = vector.extract_strided_slice %1 {offsets = [0, 0, 0], sizes = [16, 16, 3], strides = [1, 1, 1]} : vector<17x17x48xbf16> to vector<16x16x3xbf16>
    %3 = vector.extract_strided_slice %1 {offsets = [0, 0, 3], sizes = [16, 16, 3], strides = [1, 1, 1]} : vector<17x17x48xbf16> to vector<16x16x3xbf16>
    %4 = vector.extract_strided_slice %1 {offsets = [0, 0, 6], sizes = [16, 16, 3], strides = [1, 1, 1]} : vector<17x17x48xbf16> to vector<16x16x3xbf16>
    %5 = vector.extract_strided_slice %1 {offsets = [0, 0, 12], sizes = [16, 16, 3], strides = [1, 1, 1]} : vector<17x17x48xbf16> to vector<16x16x3xbf16>
    %6 = vector.extract_strided_slice %1 {offsets = [0, 0, 15], sizes = [16, 16, 3], strides = [1, 1, 1]} : vector<17x17x48xbf16> to vector<16x16x3xbf16>
    %7 = vector.extract_strided_slice %1 {offsets = [0, 0, 18], sizes = [16, 16, 3], strides = [1, 1, 1]} : vector<17x17x48xbf16> to vector<16x16x3xbf16>
    %8 = vector.extract_strided_slice %1 {offsets = [0, 0, 24], sizes = [16, 16, 3], strides = [1, 1, 1]} : vector<17x17x48xbf16> to vector<16x16x3xbf16>
    %9 = vector.extract_strided_slice %1 {offsets = [0, 0, 27], sizes = [16, 16, 3], strides = [1, 1, 1]} : vector<17x17x48xbf16> to vector<16x16x3xbf16>
    %10 = vector.extract_strided_slice %1 {offsets = [0, 0, 30], sizes = [16, 16, 3], strides = [1, 1, 1]} : vector<17x17x48xbf16> to vector<16x16x3xbf16>
    %cst = arith.constant 0.000000e+00 : bf16
    %11 = vector.broadcast %cst : bf16 to vector<16x16x101xbf16>
    %12 = tpu.concatenate %2, %3, %4, %5, %6, %7, %8, %9, %10, %11 in 2 : vector<16x16x3xbf16>, vector<16x16x3xbf16>, vector<16x16x3xbf16>, vector<16x16x3xbf16>, vector<16x16x3xbf16>, vector<16x16x3xbf16>, vector<16x16x3xbf16>, vector<16x16x3xbf16>, vector<16x16x3xbf16>, vector<16x16x101xbf16> -> vector<16x16x128xbf16>
    %13 = vector.shape_cast %12 : vector<16x16x128xbf16> to vector<256x128xbf16>
    %c0_3 = arith.constant 0 : index
    %c0_4 = arith.constant 0 : index
    %14 = vector.load %arg2[%c0_3, %c0_4] : memref<128x128xbf16, #tpu.memory_space<vmem>>, vector<128x128xbf16>
    %cst_5 = arith.constant dense<0.000000e+00> : vector<256x128xf32>
    %15 = tpu.matmul %13, %14, %cst_5 {dimension_numbers = #tpu.dot_dimension_numbers<[1], [0], [0], [1], [0, 0, 1, 1], [], []>} : vector<256x128xbf16>, vector<128x128xbf16>, vector<256x128xf32> -> vector<256x128xf32>
    %c0_6 = arith.constant 0 : index
    %c0_7 = arith.constant 0 : index
    %16 = vector.load %arg3[%c0_6, %c0_7] : memref<1x128xf32, #tpu.memory_space<vmem>>, vector<1x128xf32>
    %17 = vector.broadcast %16 : vector<1x128xf32> to vector<256x128xf32>
    %18 = arith.addf %15, %17 : vector<256x128xf32>
    %cst_8 = arith.constant 0.000000e+00 : f32
    %19 = vector.broadcast %cst_8 : f32 to vector<256x128xf32>
    %20 = arith.maximumf %18, %19 : vector<256x128xf32>
    %21 = arith.truncf %20 : vector<256x128xf32> to vector<256x128xbf16>
    %c0_9 = arith.constant 0 : index
    %c0_10 = arith.constant 0 : index
    %c0_11 = arith.constant 0 : index
    %22 = vector.load %arg4[%c0_9, %c0_10, %c0_11] : memref<1x256x128xbf16, #tpu.memory_space<vmem>>, vector<1x256x128xbf16>
    %23 = vector.shape_cast %22 : vector<1x256x128xbf16> to vector<256x128xbf16>
    %24 = vector.shape_cast %21 : vector<256x128xbf16> to vector<1x256x128xbf16>
    tpu.vector_store %arg4[%c0_9, %c0_10, %c0_11], %24 {strides = array<i32>} : memref<1x256x128xbf16, #tpu.memory_space<vmem>>, vector<1x256x128xbf16>,
    return
  }
  func.func @transform_0(%arg0: i32) -> (i32, i32, i32, i32) {
    %c0_i32 = arith.constant 0 : i32
    %c0_i32_0 = arith.constant 0 : i32
    %c0_i32_1 = arith.constant 0 : i32
    %c0_i32_2 = arith.constant 0 : i32
    return %arg0, %c0_i32, %c0_i32_0, %c0_i32_1 : i32, i32, i32, i32
  }
  func.func @transform_1(%arg0: i32) -> (i32, i32) {
    %c0_i32 = arith.constant 0 : i32
    %c0_i32_0 = arith.constant 0 : i32
    %c0_i32_1 = arith.constant 0 : i32
    return %c0_i32, %c0_i32_0 : i32, i32
  }
  func.func @transform_2(%arg0: i32) -> (i32, i32) {
    %c0_i32 = arith.constant 0 : i32
    %c0_i32_0 = arith.constant 0 : i32
    %c0_i32_1 = arith.constant 0 : i32
    return %c0_i32, %c0_i32_0 : i32, i32
  }
  func.func @transform_3(%arg0: i32) -> (i32, i32, i32) {
    %c0_i32 = arith.constant 0 : i32
    %c0_i32_0 = arith.constant 0 : i32
    %c0_i32_1 = arith.constant 0 : i32
    return %arg0, %c0_i32, %c0_i32_0 : i32, i32, i32
  }
}

module attributes {stable_mosaic.version = 11 : i64} {
  func.func @_conv_pool_head_kernel(%arg0: i32, %arg1: memref<1x9x9x512xbf16, #tpu.memory_space<vmem>>, %arg2: memref<1152x128xbf16, #tpu.memory_space<vmem>>, %arg3: memref<1x128xf32, #tpu.memory_space<vmem>>, %arg4: memref<128x128xbf16, #tpu.memory_space<vmem>>, %arg5: memref<1x128xf32, #tpu.memory_space<vmem>>, %arg6: memref<1x64x128xbf16, #tpu.memory_space<vmem>>, %arg7: memref<1x1x128xf32, #tpu.memory_space<vmem>>, %arg8: memref<1x1x128xf32, #tpu.memory_space<vmem>>) attributes {dimension_semantics = [#tpu.dimension_semantics<parallel>], iteration_bounds = array<i64: 2>, scalar_prefetch = 0 : i64, scratch_operands = 0 : i64, tpu.core_type = #tpu.core_type<tc>, window_params = [{transform_indices = @transform_0, window_bounds = array<i64: 1, 9, 9, 512>}, {pipeline_mode = #tpu.pipeline_mode<synchronous>, transform_indices = @transform_1, window_bounds = array<i64: 1152, 128>}, {pipeline_mode = #tpu.pipeline_mode<synchronous>, transform_indices = @transform_2, window_bounds = array<i64: 1, 128>}, {pipeline_mode = #tpu.pipeline_mode<synchronous>, transform_indices = @transform_3, window_bounds = array<i64: 128, 128>}, {pipeline_mode = #tpu.pipeline_mode<synchronous>, transform_indices = @transform_4, window_bounds = array<i64: 1, 128>}, {transform_indices = @transform_5, window_bounds = array<i64: 1, 64, 128>}, {transform_indices = @transform_6, window_bounds = array<i64: 1, 1, 128>}, {transform_indices = @transform_7, window_bounds = array<i64: 1, 1, 128>}]} {
    %c0 = arith.constant 0 : index
    %c0_0 = arith.constant 0 : index
    %c0_1 = arith.constant 0 : index
    %c0_2 = arith.constant 0 : index
    %0 = vector.load %arg1[%c0, %c0_0, %c0_1, %c0_2] : memref<1x9x9x512xbf16, #tpu.memory_space<vmem>>, vector<1x9x9x512xbf16>
    %1 = vector.shape_cast %0 : vector<1x9x9x512xbf16> to vector<9x9x512xbf16>
    %2 = vector.extract_strided_slice %1 {offsets = [0, 0, 0], sizes = [8, 8, 128], strides = [1, 1, 1]} : vector<9x9x512xbf16> to vector<8x8x128xbf16>
    %3 = vector.extract_strided_slice %1 {offsets = [0, 0, 128], sizes = [8, 8, 128], strides = [1, 1, 1]} : vector<9x9x512xbf16> to vector<8x8x128xbf16>
    %4 = vector.extract_strided_slice %1 {offsets = [0, 1, 0], sizes = [8, 8, 128], strides = [1, 1, 1]} : vector<9x9x512xbf16> to vector<8x8x128xbf16>
    %5 = vector.extract_strided_slice %1 {offsets = [0, 0, 256], sizes = [8, 8, 128], strides = [1, 1, 1]} : vector<9x9x512xbf16> to vector<8x8x128xbf16>
    %6 = vector.extract_strided_slice %1 {offsets = [0, 0, 384], sizes = [8, 8, 128], strides = [1, 1, 1]} : vector<9x9x512xbf16> to vector<8x8x128xbf16>
    %7 = vector.extract_strided_slice %1 {offsets = [0, 1, 256], sizes = [8, 8, 128], strides = [1, 1, 1]} : vector<9x9x512xbf16> to vector<8x8x128xbf16>
    %8 = vector.extract_strided_slice %1 {offsets = [1, 0, 0], sizes = [8, 8, 128], strides = [1, 1, 1]} : vector<9x9x512xbf16> to vector<8x8x128xbf16>
    %9 = vector.extract_strided_slice %1 {offsets = [1, 0, 128], sizes = [8, 8, 128], strides = [1, 1, 1]} : vector<9x9x512xbf16> to vector<8x8x128xbf16>
    %10 = vector.extract_strided_slice %1 {offsets = [1, 1, 0], sizes = [8, 8, 128], strides = [1, 1, 1]} : vector<9x9x512xbf16> to vector<8x8x128xbf16>
    %11 = tpu.concatenate %2, %3, %4, %5, %6, %7, %8, %9, %10 in 2 : vector<8x8x128xbf16>, vector<8x8x128xbf16>, vector<8x8x128xbf16>, vector<8x8x128xbf16>, vector<8x8x128xbf16>, vector<8x8x128xbf16>, vector<8x8x128xbf16>, vector<8x8x128xbf16>, vector<8x8x128xbf16> -> vector<8x8x1152xbf16>
    %12 = vector.shape_cast %11 : vector<8x8x1152xbf16> to vector<64x1152xbf16>
    %c0_3 = arith.constant 0 : index
    %c0_4 = arith.constant 0 : index
    %13 = vector.load %arg2[%c0_3, %c0_4] : memref<1152x128xbf16, #tpu.memory_space<vmem>>, vector<1152x128xbf16>
    %cst = arith.constant dense<0.000000e+00> : vector<64x128xf32>
    %14 = tpu.matmul %12, %13, %cst {dimension_numbers = #tpu.dot_dimension_numbers<[1], [0], [0], [1], [0, 0, 1, 1], [], []>} : vector<64x1152xbf16>, vector<1152x128xbf16>, vector<64x128xf32> -> vector<64x128xf32>
    %c0_5 = arith.constant 0 : index
    %c0_6 = arith.constant 0 : index
    %15 = vector.load %arg3[%c0_5, %c0_6] : memref<1x128xf32, #tpu.memory_space<vmem>>, vector<1x128xf32>
    %16 = vector.broadcast %15 : vector<1x128xf32> to vector<64x128xf32>
    %17 = arith.addf %14, %16 : vector<64x128xf32>
    %cst_7 = arith.constant 0.000000e+00 : f32
    %18 = vector.broadcast %cst_7 : f32 to vector<64x128xf32>
    %19 = arith.maximumf %17, %18 : vector<64x128xf32>
    %20 = arith.truncf %19 : vector<64x128xf32> to vector<64x128xbf16>
    %c0_8 = arith.constant 0 : index
    %c0_9 = arith.constant 0 : index
    %c0_10 = arith.constant 0 : index
    %21 = vector.load %arg6[%c0_8, %c0_9, %c0_10] : memref<1x64x128xbf16, #tpu.memory_space<vmem>>, vector<1x64x128xbf16>
    %22 = vector.shape_cast %21 : vector<1x64x128xbf16> to vector<64x128xbf16>
    %23 = vector.shape_cast %20 : vector<64x128xbf16> to vector<1x64x128xbf16>
    tpu.vector_store %arg6[%c0_8, %c0_9, %c0_10], %23 {strides = array<i32>} : memref<1x64x128xbf16, #tpu.memory_space<vmem>>, vector<1x64x128xbf16>,
    %cst_11 = arith.constant dense<0.000000e+00> : vector<128xf32>
    %24 = vector.multi_reduction <add>, %19, %cst_11 [0] : vector<64x128xf32> to vector<128xf32>
    %cst_12 = arith.constant 6.400000e+01 : f32
    %25 = vector.broadcast %cst_12 : f32 to vector<128xf32>
    %26 = arith.divf %24, %25 : vector<128xf32>
    %c0_13 = arith.constant 0 : index
    %c0_14 = arith.constant 0 : index
    %c0_15 = arith.constant 0 : index
    %27 = vector.load %arg7[%c0_13, %c0_14, %c0_15] : memref<1x1x128xf32, #tpu.memory_space<vmem>>, vector<1x1x128xf32>
    %28 = vector.shape_cast %27 : vector<1x1x128xf32> to vector<128xf32>
    %29 = vector.shape_cast %26 : vector<128xf32> to vector<1x1x128xf32>
    tpu.vector_store %arg7[%c0_13, %c0_14, %c0_15], %29 {strides = array<i32>} : memref<1x1x128xf32, #tpu.memory_space<vmem>>, vector<1x1x128xf32>,
    %30 = vector.shape_cast %26 : vector<128xf32> to vector<1x128xf32>
    %31 = arith.truncf %30 : vector<1x128xf32> to vector<1x128xbf16>
    %c0_16 = arith.constant 0 : index
    %c0_17 = arith.constant 0 : index
    %32 = vector.load %arg4[%c0_16, %c0_17] : memref<128x128xbf16, #tpu.memory_space<vmem>>, vector<128x128xbf16>
    %cst_18 = arith.constant dense<0.000000e+00> : vector<1x128xf32>
    %33 = tpu.matmul %31, %32, %cst_18 {dimension_numbers = #tpu.dot_dimension_numbers<[1], [0], [0], [1], [0, 0, 1, 1], [], []>} : vector<1x128xbf16>, vector<128x128xbf16>, vector<1x128xf32> -> vector<1x128xf32>
    %c0_19 = arith.constant 0 : index
    %c0_20 = arith.constant 0 : index
    %34 = vector.load %arg5[%c0_19, %c0_20] : memref<1x128xf32, #tpu.memory_space<vmem>>, vector<1x128xf32>
    %35 = arith.addf %33, %34 : vector<1x128xf32>
    %c0_21 = arith.constant 0 : index
    %c0_22 = arith.constant 0 : index
    %c0_23 = arith.constant 0 : index
    %36 = vector.load %arg8[%c0_21, %c0_22, %c0_23] : memref<1x1x128xf32, #tpu.memory_space<vmem>>, vector<1x1x128xf32>
    %37 = vector.shape_cast %36 : vector<1x1x128xf32> to vector<1x128xf32>
    %38 = vector.shape_cast %35 : vector<1x128xf32> to vector<1x1x128xf32>
    tpu.vector_store %arg8[%c0_21, %c0_22, %c0_23], %38 {strides = array<i32>} : memref<1x1x128xf32, #tpu.memory_space<vmem>>, vector<1x1x128xf32>,
    return
  }
  func.func @transform_0(%arg0: i32) -> (i32, i32, i32, i32) {
    %c0_i32 = arith.constant 0 : i32
    %c0_i32_0 = arith.constant 0 : i32
    %c0_i32_1 = arith.constant 0 : i32
    %c0_i32_2 = arith.constant 0 : i32
    return %arg0, %c0_i32, %c0_i32_0, %c0_i32_1 : i32, i32, i32, i32
  }
  func.func @transform_1(%arg0: i32) -> (i32, i32) {
    %c0_i32 = arith.constant 0 : i32
    %c0_i32_0 = arith.constant 0 : i32
    %c0_i32_1 = arith.constant 0 : i32
    return %c0_i32, %c0_i32_0 : i32, i32
  }
  func.func @transform_2(%arg0: i32) -> (i32, i32) {
    %c0_i32 = arith.constant 0 : i32
    %c0_i32_0 = arith.constant 0 : i32
    %c0_i32_1 = arith.constant 0 : i32
    return %c0_i32, %c0_i32_0 : i32, i32
  }
  func.func @transform_3(%arg0: i32) -> (i32, i32) {
    %c0_i32 = arith.constant 0 : i32
    %c0_i32_0 = arith.constant 0 : i32
    %c0_i32_1 = arith.constant 0 : i32
    return %c0_i32, %c0_i32_0 : i32, i32
  }
  func.func @transform_4(%arg0: i32) -> (i32, i32) {
    %c0_i32 = arith.constant 0 : i32
    %c0_i32_0 = arith.constant 0 : i32
    %c0_i32_1 = arith.constant 0 : i32
    return %c0_i32, %c0_i32_0 : i32, i32
  }
  func.func @transform_5(%arg0: i32) -> (i32, i32, i32) {
    %c0_i32 = arith.constant 0 : i32
    %c0_i32_0 = arith.constant 0 : i32
    %c0_i32_1 = arith.constant 0 : i32
    return %arg0, %c0_i32, %c0_i32_0 : i32, i32, i32
  }
  func.func @transform_6(%arg0: i32) -> (i32, i32, i32) {
    %c0_i32 = arith.constant 0 : i32
    %c0_i32_0 = arith.constant 0 : i32
    %c0_i32_1 = arith.constant 0 : i32
    return %arg0, %c0_i32, %c0_i32_0 : i32, i32, i32
  }
  func.func @transform_7(%arg0: i32) -> (i32, i32, i32) {
    %c0_i32 = arith.constant 0 : i32
    %c0_i32_0 = arith.constant 0 : i32
    %c0_i32_1 = arith.constant 0 : i32
    return %arg0, %c0_i32, %c0_i32_0 : i32, i32, i32
  }
}

module attributes {stable_mosaic.version = 11 : i64} {
  func.func @_proposal_kernel(%arg0: i32, %arg1: memref<1x8x8x128xbf16, #tpu.memory_space<vmem>>, %arg2: memref<1152x128xbf16, #tpu.memory_space<vmem>>, %arg3: memref<1x128xf32, #tpu.memory_space<vmem>>, %arg4: memref<1152x128xbf16, #tpu.memory_space<vmem>>, %arg5: memref<1x128xf32, #tpu.memory_space<vmem>>, %arg6: memref<1152x128xbf16, #tpu.memory_space<vmem>>, %arg7: memref<1x128xf32, #tpu.memory_space<vmem>>, %arg8: memref<3x128xf32, #tpu.memory_space<vmem>>, %arg9: memref<1x1x80xf32, #tpu.memory_space<vmem>>, %arg10: memref<1x1x4xf32, #tpu.memory_space<vmem>>) attributes {dimension_semantics = [#tpu.dimension_semantics<parallel>], iteration_bounds = array<i64: 2>, scalar_prefetch = 0 : i64, scratch_operands = 0 : i64, tpu.core_type = #tpu.core_type<tc>, window_params = [{transform_indices = @transform_0, window_bounds = array<i64: 1, 8, 8, 128>}, {pipeline_mode = #tpu.pipeline_mode<synchronous>, transform_indices = @transform_1, window_bounds = array<i64: 1152, 128>}, {pipeline_mode = #tpu.pipeline_mode<synchronous>, transform_indices = @transform_2, window_bounds = array<i64: 1, 128>}, {pipeline_mode = #tpu.pipeline_mode<synchronous>, transform_indices = @transform_3, window_bounds = array<i64: 1152, 128>}, {pipeline_mode = #tpu.pipeline_mode<synchronous>, transform_indices = @transform_4, window_bounds = array<i64: 1, 128>}, {pipeline_mode = #tpu.pipeline_mode<synchronous>, transform_indices = @transform_5, window_bounds = array<i64: 1152, 128>}, {pipeline_mode = #tpu.pipeline_mode<synchronous>, transform_indices = @transform_6, window_bounds = array<i64: 1, 128>}, {pipeline_mode = #tpu.pipeline_mode<synchronous>, transform_indices = @transform_7, window_bounds = array<i64: 3, 128>}, {transform_indices = @transform_8, window_bounds = array<i64: 1, 1, 80>}, {transform_indices = @transform_9, window_bounds = array<i64: 1, 1, 4>}]} {
    %c0 = arith.constant 0 : index
    %c0_0 = arith.constant 0 : index
    %c0_1 = arith.constant 0 : index
    %c0_2 = arith.constant 0 : index
    %0 = vector.load %arg1[%c0, %c0_0, %c0_1, %c0_2] : memref<1x8x8x128xbf16, #tpu.memory_space<vmem>>, vector<1x8x8x128xbf16>
    %1 = vector.shape_cast %0 : vector<1x8x8x128xbf16> to vector<8x8x128xbf16>
    %c0_3 = arith.constant 0 : index
    %c0_4 = arith.constant 0 : index
    %2 = vector.load %arg8[%c0_3, %c0_4] : memref<3x128xf32, #tpu.memory_space<vmem>>, vector<3x128xf32>
    %cst = arith.constant 0.000000e+00 : bf16
    %3 = vector.broadcast %cst : bf16 to vector<8x1x128xbf16>
    %4 = tpu.concatenate %3, %1, %3 in 1 : vector<8x1x128xbf16>, vector<8x8x128xbf16>, vector<8x1x128xbf16> -> vector<8x10x128xbf16>
    %cst_5 = arith.constant 0.000000e+00 : bf16
    %5 = vector.broadcast %cst_5 : bf16 to vector<1x10x128xbf16>
    %6 = tpu.concatenate %5, %4, %5 in 0 : vector<1x10x128xbf16>, vector<8x10x128xbf16>, vector<1x10x128xbf16> -> vector<10x10x128xbf16>
    %7 = vector.extract_strided_slice %6 {offsets = [0, 0, 0], sizes = [8, 8, 128], strides = [1, 1, 1]} : vector<10x10x128xbf16> to vector<8x8x128xbf16>
    %8 = vector.extract_strided_slice %6 {offsets = [0, 1, 0], sizes = [8, 8, 128], strides = [1, 1, 1]} : vector<10x10x128xbf16> to vector<8x8x128xbf16>
    %9 = vector.extract_strided_slice %6 {offsets = [0, 2, 0], sizes = [8, 8, 128], strides = [1, 1, 1]} : vector<10x10x128xbf16> to vector<8x8x128xbf16>
    %10 = vector.extract_strided_slice %6 {offsets = [1, 0, 0], sizes = [8, 8, 128], strides = [1, 1, 1]} : vector<10x10x128xbf16> to vector<8x8x128xbf16>
    %11 = vector.extract_strided_slice %6 {offsets = [1, 1, 0], sizes = [8, 8, 128], strides = [1, 1, 1]} : vector<10x10x128xbf16> to vector<8x8x128xbf16>
    %12 = vector.extract_strided_slice %6 {offsets = [1, 2, 0], sizes = [8, 8, 128], strides = [1, 1, 1]} : vector<10x10x128xbf16> to vector<8x8x128xbf16>
    %13 = vector.extract_strided_slice %6 {offsets = [2, 0, 0], sizes = [8, 8, 128], strides = [1, 1, 1]} : vector<10x10x128xbf16> to vector<8x8x128xbf16>
    %14 = vector.extract_strided_slice %6 {offsets = [2, 1, 0], sizes = [8, 8, 128], strides = [1, 1, 1]} : vector<10x10x128xbf16> to vector<8x8x128xbf16>
    %15 = vector.extract_strided_slice %6 {offsets = [2, 2, 0], sizes = [8, 8, 128], strides = [1, 1, 1]} : vector<10x10x128xbf16> to vector<8x8x128xbf16>
    %16 = tpu.concatenate %7, %8, %9, %10, %11, %12, %13, %14, %15 in 2 : vector<8x8x128xbf16>, vector<8x8x128xbf16>, vector<8x8x128xbf16>, vector<8x8x128xbf16>, vector<8x8x128xbf16>, vector<8x8x128xbf16>, vector<8x8x128xbf16>, vector<8x8x128xbf16>, vector<8x8x128xbf16> -> vector<8x8x1152xbf16>
    %17 = vector.shape_cast %16 : vector<8x8x1152xbf16> to vector<64x1152xbf16>
    %c0_6 = arith.constant 0 : index
    %c0_7 = arith.constant 0 : index
    %18 = vector.load %arg2[%c0_6, %c0_7] : memref<1152x128xbf16, #tpu.memory_space<vmem>>, vector<1152x128xbf16>
    %cst_8 = arith.constant dense<0.000000e+00> : vector<64x128xf32>
    %19 = tpu.matmul %17, %18, %cst_8 {dimension_numbers = #tpu.dot_dimension_numbers<[1], [0], [0], [1], [0, 0, 1, 1], [], []>} : vector<64x1152xbf16>, vector<1152x128xbf16>, vector<64x128xf32> -> vector<64x128xf32>
    %c0_9 = arith.constant 0 : index
    %c0_10 = arith.constant 0 : index
    %20 = vector.load %arg3[%c0_9, %c0_10] : memref<1x128xf32, #tpu.memory_space<vmem>>, vector<1x128xf32>
    %21 = vector.broadcast %20 : vector<1x128xf32> to vector<64x128xf32>
    %22 = arith.addf %19, %21 : vector<64x128xf32>
    %cst_11 = arith.constant 0.000000e+00 : f32
    %23 = vector.broadcast %cst_11 : f32 to vector<64x128xf32>
    %24 = arith.maximumf %22, %23 : vector<64x128xf32>
    %25 = vector.extract_strided_slice %2 {offsets = [0, 0], sizes = [1, 128], strides = [1, 1]} : vector<3x128xf32> to vector<1x128xf32>
    %26 = vector.broadcast %25 : vector<1x128xf32> to vector<64x128xf32>
    %27 = arith.mulf %24, %26 : vector<64x128xf32>
    %cst_12 = arith.constant dense<0.000000e+00> : vector<64xf32>
    %28 = vector.multi_reduction <add>, %27, %cst_12 [1] : vector<64x128xf32> to vector<64xf32>
    %29 = arith.truncf %24 : vector<64x128xf32> to vector<64x128xbf16>
    %30 = vector.shape_cast %29 : vector<64x128xbf16> to vector<8x8x128xbf16>
    %cst_13 = arith.constant 0.000000e+00 : bf16
    %31 = vector.broadcast %cst_13 : bf16 to vector<8x1x128xbf16>
    %32 = tpu.concatenate %31, %30, %31 in 1 : vector<8x1x128xbf16>, vector<8x8x128xbf16>, vector<8x1x128xbf16> -> vector<8x10x128xbf16>
    %cst_14 = arith.constant 0.000000e+00 : bf16
    %33 = vector.broadcast %cst_14 : bf16 to vector<1x10x128xbf16>
    %34 = tpu.concatenate %33, %32, %33 in 0 : vector<1x10x128xbf16>, vector<8x10x128xbf16>, vector<1x10x128xbf16> -> vector<10x10x128xbf16>
    %35 = vector.extract_strided_slice %34 {offsets = [0, 0, 0], sizes = [1, 10, 128], strides = [1, 1, 1]} : vector<10x10x128xbf16> to vector<1x10x128xbf16>
    %36 = vector.extract_strided_slice %34 {offsets = [2, 0, 0], sizes = [1, 10, 128], strides = [1, 1, 1]} : vector<10x10x128xbf16> to vector<1x10x128xbf16>
    %37 = vector.extract_strided_slice %34 {offsets = [4, 0, 0], sizes = [1, 10, 128], strides = [1, 1, 1]} : vector<10x10x128xbf16> to vector<1x10x128xbf16>
    %38 = vector.extract_strided_slice %34 {offsets = [6, 0, 0], sizes = [1, 10, 128], strides = [1, 1, 1]} : vector<10x10x128xbf16> to vector<1x10x128xbf16>
    %39 = tpu.concatenate %35, %36, %37, %38 in 0 : vector<1x10x128xbf16>, vector<1x10x128xbf16>, vector<1x10x128xbf16>, vector<1x10x128xbf16> -> vector<4x10x128xbf16>
    %40 = vector.extract_strided_slice %39 {offsets = [0, 0, 0], sizes = [4, 1, 128], strides = [1, 1, 1]} : vector<4x10x128xbf16> to vector<4x1x128xbf16>
    %41 = vector.extract_strided_slice %39 {offsets = [0, 2, 0], sizes = [4, 1, 128], strides = [1, 1, 1]} : vector<4x10x128xbf16> to vector<4x1x128xbf16>
    %42 = vector.extract_strided_slice %39 {offsets = [0, 4, 0], sizes = [4, 1, 128], strides = [1, 1, 1]} : vector<4x10x128xbf16> to vector<4x1x128xbf16>
    %43 = vector.extract_strided_slice %39 {offsets = [0, 6, 0], sizes = [4, 1, 128], strides = [1, 1, 1]} : vector<4x10x128xbf16> to vector<4x1x128xbf16>
    %44 = tpu.concatenate %40, %41, %42, %43 in 1 : vector<4x1x128xbf16>, vector<4x1x128xbf16>, vector<4x1x128xbf16>, vector<4x1x128xbf16> -> vector<4x4x128xbf16>
    %45 = vector.extract_strided_slice %39 {offsets = [0, 1, 0], sizes = [4, 1, 128], strides = [1, 1, 1]} : vector<4x10x128xbf16> to vector<4x1x128xbf16>
    %46 = vector.extract_strided_slice %39 {offsets = [0, 3, 0], sizes = [4, 1, 128], strides = [1, 1, 1]} : vector<4x10x128xbf16> to vector<4x1x128xbf16>
    %47 = vector.extract_strided_slice %39 {offsets = [0, 5, 0], sizes = [4, 1, 128], strides = [1, 1, 1]} : vector<4x10x128xbf16> to vector<4x1x128xbf16>
    %48 = vector.extract_strided_slice %39 {offsets = [0, 7, 0], sizes = [4, 1, 128], strides = [1, 1, 1]} : vector<4x10x128xbf16> to vector<4x1x128xbf16>
    %49 = tpu.concatenate %45, %46, %47, %48 in 1 : vector<4x1x128xbf16>, vector<4x1x128xbf16>, vector<4x1x128xbf16>, vector<4x1x128xbf16> -> vector<4x4x128xbf16>
    %50 = vector.extract_strided_slice %39 {offsets = [0, 2, 0], sizes = [4, 1, 128], strides = [1, 1, 1]} : vector<4x10x128xbf16> to vector<4x1x128xbf16>
    %51 = vector.extract_strided_slice %39 {offsets = [0, 4, 0], sizes = [4, 1, 128], strides = [1, 1, 1]} : vector<4x10x128xbf16> to vector<4x1x128xbf16>
    %52 = vector.extract_strided_slice %39 {offsets = [0, 6, 0], sizes = [4, 1, 128], strides = [1, 1, 1]} : vector<4x10x128xbf16> to vector<4x1x128xbf16>
    %53 = vector.extract_strided_slice %39 {offsets = [0, 8, 0], sizes = [4, 1, 128], strides = [1, 1, 1]} : vector<4x10x128xbf16> to vector<4x1x128xbf16>
    %54 = tpu.concatenate %50, %51, %52, %53 in 1 : vector<4x1x128xbf16>, vector<4x1x128xbf16>, vector<4x1x128xbf16>, vector<4x1x128xbf16> -> vector<4x4x128xbf16>
    %55 = vector.extract_strided_slice %34 {offsets = [1, 0, 0], sizes = [1, 10, 128], strides = [1, 1, 1]} : vector<10x10x128xbf16> to vector<1x10x128xbf16>
    %56 = vector.extract_strided_slice %34 {offsets = [3, 0, 0], sizes = [1, 10, 128], strides = [1, 1, 1]} : vector<10x10x128xbf16> to vector<1x10x128xbf16>
    %57 = vector.extract_strided_slice %34 {offsets = [5, 0, 0], sizes = [1, 10, 128], strides = [1, 1, 1]} : vector<10x10x128xbf16> to vector<1x10x128xbf16>
    %58 = vector.extract_strided_slice %34 {offsets = [7, 0, 0], sizes = [1, 10, 128], strides = [1, 1, 1]} : vector<10x10x128xbf16> to vector<1x10x128xbf16>
    %59 = tpu.concatenate %55, %56, %57, %58 in 0 : vector<1x10x128xbf16>, vector<1x10x128xbf16>, vector<1x10x128xbf16>, vector<1x10x128xbf16> -> vector<4x10x128xbf16>
    %60 = vector.extract_strided_slice %59 {offsets = [0, 0, 0], sizes = [4, 1, 128], strides = [1, 1, 1]} : vector<4x10x128xbf16> to vector<4x1x128xbf16>
    %61 = vector.extract_strided_slice %59 {offsets = [0, 2, 0], sizes = [4, 1, 128], strides = [1, 1, 1]} : vector<4x10x128xbf16> to vector<4x1x128xbf16>
    %62 = vector.extract_strided_slice %59 {offsets = [0, 4, 0], sizes = [4, 1, 128], strides = [1, 1, 1]} : vector<4x10x128xbf16> to vector<4x1x128xbf16>
    %63 = vector.extract_strided_slice %59 {offsets = [0, 6, 0], sizes = [4, 1, 128], strides = [1, 1, 1]} : vector<4x10x128xbf16> to vector<4x1x128xbf16>
    %64 = tpu.concatenate %60, %61, %62, %63 in 1 : vector<4x1x128xbf16>, vector<4x1x128xbf16>, vector<4x1x128xbf16>, vector<4x1x128xbf16> -> vector<4x4x128xbf16>
    %65 = vector.extract_strided_slice %59 {offsets = [0, 1, 0], sizes = [4, 1, 128], strides = [1, 1, 1]} : vector<4x10x128xbf16> to vector<4x1x128xbf16>
    %66 = vector.extract_strided_slice %59 {offsets = [0, 3, 0], sizes = [4, 1, 128], strides = [1, 1, 1]} : vector<4x10x128xbf16> to vector<4x1x128xbf16>
    %67 = vector.extract_strided_slice %59 {offsets = [0, 5, 0], sizes = [4, 1, 128], strides = [1, 1, 1]} : vector<4x10x128xbf16> to vector<4x1x128xbf16>
    %68 = vector.extract_strided_slice %59 {offsets = [0, 7, 0], sizes = [4, 1, 128], strides = [1, 1, 1]} : vector<4x10x128xbf16> to vector<4x1x128xbf16>
    %69 = tpu.concatenate %65, %66, %67, %68 in 1 : vector<4x1x128xbf16>, vector<4x1x128xbf16>, vector<4x1x128xbf16>, vector<4x1x128xbf16> -> vector<4x4x128xbf16>
    %70 = vector.extract_strided_slice %59 {offsets = [0, 2, 0], sizes = [4, 1, 128], strides = [1, 1, 1]} : vector<4x10x128xbf16> to vector<4x1x128xbf16>
    %71 = vector.extract_strided_slice %59 {offsets = [0, 4, 0], sizes = [4, 1, 128], strides = [1, 1, 1]} : vector<4x10x128xbf16> to vector<4x1x128xbf16>
    %72 = vector.extract_strided_slice %59 {offsets = [0, 6, 0], sizes = [4, 1, 128], strides = [1, 1, 1]} : vector<4x10x128xbf16> to vector<4x1x128xbf16>
    %73 = vector.extract_strided_slice %59 {offsets = [0, 8, 0], sizes = [4, 1, 128], strides = [1, 1, 1]} : vector<4x10x128xbf16> to vector<4x1x128xbf16>
    %74 = tpu.concatenate %70, %71, %72, %73 in 1 : vector<4x1x128xbf16>, vector<4x1x128xbf16>, vector<4x1x128xbf16>, vector<4x1x128xbf16> -> vector<4x4x128xbf16>
    %75 = vector.extract_strided_slice %34 {offsets = [2, 0, 0], sizes = [1, 10, 128], strides = [1, 1, 1]} : vector<10x10x128xbf16> to vector<1x10x128xbf16>
    %76 = vector.extract_strided_slice %34 {offsets = [4, 0, 0], sizes = [1, 10, 128], strides = [1, 1, 1]} : vector<10x10x128xbf16> to vector<1x10x128xbf16>
    %77 = vector.extract_strided_slice %34 {offsets = [6, 0, 0], sizes = [1, 10, 128], strides = [1, 1, 1]} : vector<10x10x128xbf16> to vector<1x10x128xbf16>
    %78 = vector.extract_strided_slice %34 {offsets = [8, 0, 0], sizes = [1, 10, 128], strides = [1, 1, 1]} : vector<10x10x128xbf16> to vector<1x10x128xbf16>
    %79 = tpu.concatenate %75, %76, %77, %78 in 0 : vector<1x10x128xbf16>, vector<1x10x128xbf16>, vector<1x10x128xbf16>, vector<1x10x128xbf16> -> vector<4x10x128xbf16>
    %80 = vector.extract_strided_slice %79 {offsets = [0, 0, 0], sizes = [4, 1, 128], strides = [1, 1, 1]} : vector<4x10x128xbf16> to vector<4x1x128xbf16>
    %81 = vector.extract_strided_slice %79 {offsets = [0, 2, 0], sizes = [4, 1, 128], strides = [1, 1, 1]} : vector<4x10x128xbf16> to vector<4x1x128xbf16>
    %82 = vector.extract_strided_slice %79 {offsets = [0, 4, 0], sizes = [4, 1, 128], strides = [1, 1, 1]} : vector<4x10x128xbf16> to vector<4x1x128xbf16>
    %83 = vector.extract_strided_slice %79 {offsets = [0, 6, 0], sizes = [4, 1, 128], strides = [1, 1, 1]} : vector<4x10x128xbf16> to vector<4x1x128xbf16>
    %84 = tpu.concatenate %80, %81, %82, %83 in 1 : vector<4x1x128xbf16>, vector<4x1x128xbf16>, vector<4x1x128xbf16>, vector<4x1x128xbf16> -> vector<4x4x128xbf16>
    %85 = vector.extract_strided_slice %79 {offsets = [0, 1, 0], sizes = [4, 1, 128], strides = [1, 1, 1]} : vector<4x10x128xbf16> to vector<4x1x128xbf16>
    %86 = vector.extract_strided_slice %79 {offsets = [0, 3, 0], sizes = [4, 1, 128], strides = [1, 1, 1]} : vector<4x10x128xbf16> to vector<4x1x128xbf16>
    %87 = vector.extract_strided_slice %79 {offsets = [0, 5, 0], sizes = [4, 1, 128], strides = [1, 1, 1]} : vector<4x10x128xbf16> to vector<4x1x128xbf16>
    %88 = vector.extract_strided_slice %79 {offsets = [0, 7, 0], sizes = [4, 1, 128], strides = [1, 1, 1]} : vector<4x10x128xbf16> to vector<4x1x128xbf16>
    %89 = tpu.concatenate %85, %86, %87, %88 in 1 : vector<4x1x128xbf16>, vector<4x1x128xbf16>, vector<4x1x128xbf16>, vector<4x1x128xbf16> -> vector<4x4x128xbf16>
    %90 = vector.extract_strided_slice %79 {offsets = [0, 2, 0], sizes = [4, 1, 128], strides = [1, 1, 1]} : vector<4x10x128xbf16> to vector<4x1x128xbf16>
    %91 = vector.extract_strided_slice %79 {offsets = [0, 4, 0], sizes = [4, 1, 128], strides = [1, 1, 1]} : vector<4x10x128xbf16> to vector<4x1x128xbf16>
    %92 = vector.extract_strided_slice %79 {offsets = [0, 6, 0], sizes = [4, 1, 128], strides = [1, 1, 1]} : vector<4x10x128xbf16> to vector<4x1x128xbf16>
    %93 = vector.extract_strided_slice %79 {offsets = [0, 8, 0], sizes = [4, 1, 128], strides = [1, 1, 1]} : vector<4x10x128xbf16> to vector<4x1x128xbf16>
    %94 = tpu.concatenate %90, %91, %92, %93 in 1 : vector<4x1x128xbf16>, vector<4x1x128xbf16>, vector<4x1x128xbf16>, vector<4x1x128xbf16> -> vector<4x4x128xbf16>
    %95 = tpu.concatenate %44, %49, %54, %64, %69, %74, %84, %89, %94 in 2 : vector<4x4x128xbf16>, vector<4x4x128xbf16>, vector<4x4x128xbf16>, vector<4x4x128xbf16>, vector<4x4x128xbf16>, vector<4x4x128xbf16>, vector<4x4x128xbf16>, vector<4x4x128xbf16>, vector<4x4x128xbf16> -> vector<4x4x1152xbf16>
    %96 = vector.shape_cast %95 : vector<4x4x1152xbf16> to vector<16x1152xbf16>
    %c0_15 = arith.constant 0 : index
    %c0_16 = arith.constant 0 : index
    %97 = vector.load %arg4[%c0_15, %c0_16] : memref<1152x128xbf16, #tpu.memory_space<vmem>>, vector<1152x128xbf16>
    %cst_17 = arith.constant dense<0.000000e+00> : vector<16x128xf32>
    %98 = tpu.matmul %96, %97, %cst_17 {dimension_numbers = #tpu.dot_dimension_numbers<[1], [0], [0], [1], [0, 0, 1, 1], [], []>} : vector<16x1152xbf16>, vector<1152x128xbf16>, vector<16x128xf32> -> vector<16x128xf32>
    %c0_18 = arith.constant 0 : index
    %c0_19 = arith.constant 0 : index
    %99 = vector.load %arg5[%c0_18, %c0_19] : memref<1x128xf32, #tpu.memory_space<vmem>>, vector<1x128xf32>
    %100 = vector.broadcast %99 : vector<1x128xf32> to vector<16x128xf32>
    %101 = arith.addf %98, %100 : vector<16x128xf32>
    %cst_20 = arith.constant 0.000000e+00 : f32
    %102 = vector.broadcast %cst_20 : f32 to vector<16x128xf32>
    %103 = arith.maximumf %101, %102 : vector<16x128xf32>
    %104 = vector.extract_strided_slice %2 {offsets = [1, 0], sizes = [1, 128], strides = [1, 1]} : vector<3x128xf32> to vector<1x128xf32>
    %105 = vector.broadcast %104 : vector<1x128xf32> to vector<16x128xf32>
    %106 = arith.mulf %103, %105 : vector<16x128xf32>
    %cst_21 = arith.constant dense<0.000000e+00> : vector<16xf32>
    %107 = vector.multi_reduction <add>, %106, %cst_21 [1] : vector<16x128xf32> to vector<16xf32>
    %108 = arith.truncf %103 : vector<16x128xf32> to vector<16x128xbf16>
    %109 = vector.shape_cast %108 : vector<16x128xbf16> to vector<4x4x128xbf16>
    %cst_22 = arith.constant 0.000000e+00 : bf16
    %110 = vector.broadcast %cst_22 : bf16 to vector<4x1x128xbf16>
    %111 = tpu.concatenate %110, %109, %110 in 1 : vector<4x1x128xbf16>, vector<4x4x128xbf16>, vector<4x1x128xbf16> -> vector<4x6x128xbf16>
    %cst_23 = arith.constant 0.000000e+00 : bf16
    %112 = vector.broadcast %cst_23 : bf16 to vector<1x6x128xbf16>
    %113 = tpu.concatenate %112, %111, %112 in 0 : vector<1x6x128xbf16>, vector<4x6x128xbf16>, vector<1x6x128xbf16> -> vector<6x6x128xbf16>
    %114 = vector.extract_strided_slice %113 {offsets = [0, 0, 0], sizes = [1, 6, 128], strides = [1, 1, 1]} : vector<6x6x128xbf16> to vector<1x6x128xbf16>
    %115 = vector.extract_strided_slice %113 {offsets = [2, 0, 0], sizes = [1, 6, 128], strides = [1, 1, 1]} : vector<6x6x128xbf16> to vector<1x6x128xbf16>
    %116 = tpu.concatenate %114, %115 in 0 : vector<1x6x128xbf16>, vector<1x6x128xbf16> -> vector<2x6x128xbf16>
    %117 = vector.extract_strided_slice %116 {offsets = [0, 0, 0], sizes = [2, 1, 128], strides = [1, 1, 1]} : vector<2x6x128xbf16> to vector<2x1x128xbf16>
    %118 = vector.extract_strided_slice %116 {offsets = [0, 2, 0], sizes = [2, 1, 128], strides = [1, 1, 1]} : vector<2x6x128xbf16> to vector<2x1x128xbf16>
    %119 = tpu.concatenate %117, %118 in 1 : vector<2x1x128xbf16>, vector<2x1x128xbf16> -> vector<2x2x128xbf16>
    %120 = vector.extract_strided_slice %116 {offsets = [0, 1, 0], sizes = [2, 1, 128], strides = [1, 1, 1]} : vector<2x6x128xbf16> to vector<2x1x128xbf16>
    %121 = vector.extract_strided_slice %116 {offsets = [0, 3, 0], sizes = [2, 1, 128], strides = [1, 1, 1]} : vector<2x6x128xbf16> to vector<2x1x128xbf16>
    %122 = tpu.concatenate %120, %121 in 1 : vector<2x1x128xbf16>, vector<2x1x128xbf16> -> vector<2x2x128xbf16>
    %123 = vector.extract_strided_slice %116 {offsets = [0, 2, 0], sizes = [2, 1, 128], strides = [1, 1, 1]} : vector<2x6x128xbf16> to vector<2x1x128xbf16>
    %124 = vector.extract_strided_slice %116 {offsets = [0, 4, 0], sizes = [2, 1, 128], strides = [1, 1, 1]} : vector<2x6x128xbf16> to vector<2x1x128xbf16>
    %125 = tpu.concatenate %123, %124 in 1 : vector<2x1x128xbf16>, vector<2x1x128xbf16> -> vector<2x2x128xbf16>
    %126 = vector.extract_strided_slice %113 {offsets = [1, 0, 0], sizes = [1, 6, 128], strides = [1, 1, 1]} : vector<6x6x128xbf16> to vector<1x6x128xbf16>
    %127 = vector.extract_strided_slice %113 {offsets = [3, 0, 0], sizes = [1, 6, 128], strides = [1, 1, 1]} : vector<6x6x128xbf16> to vector<1x6x128xbf16>
    %128 = tpu.concatenate %126, %127 in 0 : vector<1x6x128xbf16>, vector<1x6x128xbf16> -> vector<2x6x128xbf16>
    %129 = vector.extract_strided_slice %128 {offsets = [0, 0, 0], sizes = [2, 1, 128], strides = [1, 1, 1]} : vector<2x6x128xbf16> to vector<2x1x128xbf16>
    %130 = vector.extract_strided_slice %128 {offsets = [0, 2, 0], sizes = [2, 1, 128], strides = [1, 1, 1]} : vector<2x6x128xbf16> to vector<2x1x128xbf16>
    %131 = tpu.concatenate %129, %130 in 1 : vector<2x1x128xbf16>, vector<2x1x128xbf16> -> vector<2x2x128xbf16>
    %132 = vector.extract_strided_slice %128 {offsets = [0, 1, 0], sizes = [2, 1, 128], strides = [1, 1, 1]} : vector<2x6x128xbf16> to vector<2x1x128xbf16>
    %133 = vector.extract_strided_slice %128 {offsets = [0, 3, 0], sizes = [2, 1, 128], strides = [1, 1, 1]} : vector<2x6x128xbf16> to vector<2x1x128xbf16>
    %134 = tpu.concatenate %132, %133 in 1 : vector<2x1x128xbf16>, vector<2x1x128xbf16> -> vector<2x2x128xbf16>
    %135 = vector.extract_strided_slice %128 {offsets = [0, 2, 0], sizes = [2, 1, 128], strides = [1, 1, 1]} : vector<2x6x128xbf16> to vector<2x1x128xbf16>
    %136 = vector.extract_strided_slice %128 {offsets = [0, 4, 0], sizes = [2, 1, 128], strides = [1, 1, 1]} : vector<2x6x128xbf16> to vector<2x1x128xbf16>
    %137 = tpu.concatenate %135, %136 in 1 : vector<2x1x128xbf16>, vector<2x1x128xbf16> -> vector<2x2x128xbf16>
    %138 = vector.extract_strided_slice %113 {offsets = [2, 0, 0], sizes = [1, 6, 128], strides = [1, 1, 1]} : vector<6x6x128xbf16> to vector<1x6x128xbf16>
    %139 = vector.extract_strided_slice %113 {offsets = [4, 0, 0], sizes = [1, 6, 128], strides = [1, 1, 1]} : vector<6x6x128xbf16> to vector<1x6x128xbf16>
    %140 = tpu.concatenate %138, %139 in 0 : vector<1x6x128xbf16>, vector<1x6x128xbf16> -> vector<2x6x128xbf16>
    %141 = vector.extract_strided_slice %140 {offsets = [0, 0, 0], sizes = [2, 1, 128], strides = [1, 1, 1]} : vector<2x6x128xbf16> to vector<2x1x128xbf16>
    %142 = vector.extract_strided_slice %140 {offsets = [0, 2, 0], sizes = [2, 1, 128], strides = [1, 1, 1]} : vector<2x6x128xbf16> to vector<2x1x128xbf16>
    %143 = tpu.concatenate %141, %142 in 1 : vector<2x1x128xbf16>, vector<2x1x128xbf16> -> vector<2x2x128xbf16>
    %144 = vector.extract_strided_slice %140 {offsets = [0, 1, 0], sizes = [2, 1, 128], strides = [1, 1, 1]} : vector<2x6x128xbf16> to vector<2x1x128xbf16>
    %145 = vector.extract_strided_slice %140 {offsets = [0, 3, 0], sizes = [2, 1, 128], strides = [1, 1, 1]} : vector<2x6x128xbf16> to vector<2x1x128xbf16>
    %146 = tpu.concatenate %144, %145 in 1 : vector<2x1x128xbf16>, vector<2x1x128xbf16> -> vector<2x2x128xbf16>
    %147 = vector.extract_strided_slice %140 {offsets = [0, 2, 0], sizes = [2, 1, 128], strides = [1, 1, 1]} : vector<2x6x128xbf16> to vector<2x1x128xbf16>
    %148 = vector.extract_strided_slice %140 {offsets = [0, 4, 0], sizes = [2, 1, 128], strides = [1, 1, 1]} : vector<2x6x128xbf16> to vector<2x1x128xbf16>
    %149 = tpu.concatenate %147, %148 in 1 : vector<2x1x128xbf16>, vector<2x1x128xbf16> -> vector<2x2x128xbf16>
    %150 = tpu.concatenate %119, %122, %125, %131, %134, %137, %143, %146, %149 in 2 : vector<2x2x128xbf16>, vector<2x2x128xbf16>, vector<2x2x128xbf16>, vector<2x2x128xbf16>, vector<2x2x128xbf16>, vector<2x2x128xbf16>, vector<2x2x128xbf16>, vector<2x2x128xbf16>, vector<2x2x128xbf16> -> vector<2x2x1152xbf16>
    %151 = vector.shape_cast %150 : vector<2x2x1152xbf16> to vector<4x1152xbf16>
    %c0_24 = arith.constant 0 : index
    %c0_25 = arith.constant 0 : index
    %152 = vector.load %arg6[%c0_24, %c0_25] : memref<1152x128xbf16, #tpu.memory_space<vmem>>, vector<1152x128xbf16>
    %cst_26 = arith.constant dense<0.000000e+00> : vector<4x128xf32>
    %153 = tpu.matmul %151, %152, %cst_26 {dimension_numbers = #tpu.dot_dimension_numbers<[1], [0], [0], [1], [0, 0, 1, 1], [], []>} : vector<4x1152xbf16>, vector<1152x128xbf16>, vector<4x128xf32> -> vector<4x128xf32>
    %c0_27 = arith.constant 0 : index
    %c0_28 = arith.constant 0 : index
    %154 = vector.load %arg7[%c0_27, %c0_28] : memref<1x128xf32, #tpu.memory_space<vmem>>, vector<1x128xf32>
    %155 = vector.broadcast %154 : vector<1x128xf32> to vector<4x128xf32>
    %156 = arith.addf %153, %155 : vector<4x128xf32>
    %cst_29 = arith.constant 0.000000e+00 : f32
    %157 = vector.broadcast %cst_29 : f32 to vector<4x128xf32>
    %158 = arith.maximumf %156, %157 : vector<4x128xf32>
    %159 = vector.extract_strided_slice %2 {offsets = [2, 0], sizes = [1, 128], strides = [1, 1]} : vector<3x128xf32> to vector<1x128xf32>
    %160 = vector.broadcast %159 : vector<1x128xf32> to vector<4x128xf32>
    %161 = arith.mulf %158, %160 : vector<4x128xf32>
    %cst_30 = arith.constant dense<0.000000e+00> : vector<4xf32>
    %162 = vector.multi_reduction <add>, %161, %cst_30 [1] : vector<4x128xf32> to vector<4xf32>
    %163 = tpu.concatenate %28, %107 in 0 : vector<64xf32>, vector<16xf32> -> vector<80xf32>
    %c0_31 = arith.constant 0 : index
    %c0_32 = arith.constant 0 : index
    %c0_33 = arith.constant 0 : index
    %164 = vector.load %arg9[%c0_31, %c0_32, %c0_33] : memref<1x1x80xf32, #tpu.memory_space<vmem>>, vector<1x1x80xf32>
    %165 = vector.shape_cast %164 : vector<1x1x80xf32> to vector<80xf32>
    %166 = vector.shape_cast %163 : vector<80xf32> to vector<1x1x80xf32>
    tpu.vector_store %arg9[%c0_31, %c0_32, %c0_33], %166 {strides = array<i32>} : memref<1x1x80xf32, #tpu.memory_space<vmem>>, vector<1x1x80xf32>,
    %c0_34 = arith.constant 0 : index
    %c0_35 = arith.constant 0 : index
    %c0_36 = arith.constant 0 : index
    %167 = vector.load %arg10[%c0_34, %c0_35, %c0_36] : memref<1x1x4xf32, #tpu.memory_space<vmem>>, vector<1x1x4xf32>
    %168 = vector.shape_cast %167 : vector<1x1x4xf32> to vector<4xf32>
    %169 = vector.shape_cast %162 : vector<4xf32> to vector<1x1x4xf32>
    tpu.vector_store %arg10[%c0_34, %c0_35, %c0_36], %169 {strides = array<i32>} : memref<1x1x4xf32, #tpu.memory_space<vmem>>, vector<1x1x4xf32>,
    return
  }
  func.func @transform_0(%arg0: i32) -> (i32, i32, i32, i32) {
    %c0_i32 = arith.constant 0 : i32
    %c0_i32_0 = arith.constant 0 : i32
    %c0_i32_1 = arith.constant 0 : i32
    %c0_i32_2 = arith.constant 0 : i32
    return %arg0, %c0_i32, %c0_i32_0, %c0_i32_1 : i32, i32, i32, i32
  }
  func.func @transform_1(%arg0: i32) -> (i32, i32) {
    %c0_i32 = arith.constant 0 : i32
    %c0_i32_0 = arith.constant 0 : i32
    %c0_i32_1 = arith.constant 0 : i32
    return %c0_i32, %c0_i32_0 : i32, i32
  }
  func.func @transform_2(%arg0: i32) -> (i32, i32) {
    %c0_i32 = arith.constant 0 : i32
    %c0_i32_0 = arith.constant 0 : i32
    %c0_i32_1 = arith.constant 0 : i32
    return %c0_i32, %c0_i32_0 : i32, i32
  }
  func.func @transform_3(%arg0: i32) -> (i32, i32) {
    %c0_i32 = arith.constant 0 : i32
    %c0_i32_0 = arith.constant 0 : i32
    %c0_i32_1 = arith.constant 0 : i32
    return %c0_i32, %c0_i32_0 : i32, i32
  }
  func.func @transform_4(%arg0: i32) -> (i32, i32) {
    %c0_i32 = arith.constant 0 : i32
    %c0_i32_0 = arith.constant 0 : i32
    %c0_i32_1 = arith.constant 0 : i32
    return %c0_i32, %c0_i32_0 : i32, i32
  }
  func.func @transform_5(%arg0: i32) -> (i32, i32) {
    %c0_i32 = arith.constant 0 : i32
    %c0_i32_0 = arith.constant 0 : i32
    %c0_i32_1 = arith.constant 0 : i32
    return %c0_i32, %c0_i32_0 : i32, i32
  }
  func.func @transform_6(%arg0: i32) -> (i32, i32) {
    %c0_i32 = arith.constant 0 : i32
    %c0_i32_0 = arith.constant 0 : i32
    %c0_i32_1 = arith.constant 0 : i32
    return %c0_i32, %c0_i32_0 : i32, i32
  }
  func.func @transform_7(%arg0: i32) -> (i32, i32) {
    %c0_i32 = arith.constant 0 : i32
    %c0_i32_0 = arith.constant 0 : i32
    %c0_i32_1 = arith.constant 0 : i32
    return %c0_i32, %c0_i32_0 : i32, i32
  }
  func.func @transform_8(%arg0: i32) -> (i32, i32, i32) {
    %c0_i32 = arith.constant 0 : i32
    %c0_i32_0 = arith.constant 0 : i32
    %c0_i32_1 = arith.constant 0 : i32
    return %arg0, %c0_i32, %c0_i32_0 : i32, i32, i32
  }
  func.func @transform_9(%arg0: i32) -> (i32, i32, i32) {
    %c0_i32 = arith.constant 0 : i32
    %c0_i32_0 = arith.constant 0 : i32
    %c0_i32_1 = arith.constant 0 : i32
    return %arg0, %c0_i32, %c0_i32_0 : i32, i32, i32
  }
}

</mosaic_0001>

<bundles_post_ra>
// kernel: stage1.3
= control target key start
LH: loop header
LB: loop body
LE: loop exit
PB: predicated region body
PF: predicated region fallthrough
CT: control target
= control target key end

     0   :  { %s1165_s12 = smov 0   ;;  %s1507_s0 = inlined_call_operand.vmem [shape: bf16[2,17,17,48], index: 0, kind: input, shape index: {}]   ;;  %s1508_s1 = inlined_call_operand.vmem [shape: bf16[128,128], index: 1, kind: input, shape index: {}]   ;;  %s1509_s2 = inlined_call_operand.vmem [shape: f32[1,128], index: 2, kind: input, shape index: {}]   ;;  %s1510_s3 = inlined_call_operand.vmem [shape: bf16[2,256,128], index: 3, kind: output, shape index: {}]  }
   0x1 LB: > { %s857_s13 = sadd.s32 4294967295, %s1141_s12   ;;  %p861_p0 = scmp.ge.s32.totalorder %s1141_s12, 1  ;;  %s1141_s12 = sphi %s1165_s12, %s13_s12  }
   0x2   : > { %p137_p1 = scmp.lt.s32.totalorder %s1141_s12, 3 }
   0x4   : > { %p138_p2 = pnand %p861_p0, %p137_p1 }
   0x5   : > { %p161_p3 = scmp.lt.s32.totalorder (!%p138_p2), %s857_s13, 1  ;;  %s1143_s18 = smov (!%p138_p2), 122  }
   0x6   : > { %141 = sbr.rel (%p138_p2) target bundleno = 356 (0x164), region = 32  ;;  %s1144_s19 = smov (!%p138_p2), 125  }
   0xb   : > { %s1512_s13 = smov (!%p161_p3, %s857_s13), 1  ;;  %v1003_v11 = vld [vmem:[%s1508_s1 + $0x38] sm:$0xff]  ;;  %v1002_v12 = vld [vmem:[%s1508_s1 + $0x30] sm:$0xff]  ;;  %v1001_v14 = vld [vmem:[%s1508_s1 + $0x28] sm:$0xff]  ;;  %vm381_vm0 = vcmask 72704   ;;  %vm414_vm1 = vcmask 97280  }
   0xc   : > { %s1123_s14 = smul.u32 204, %s1512_s13  ;;  %1100 = vmatpush.bf16.msra.mxu2 %v1003_v11  ;;  %1101 = vmatpush.bf16.msra.mxu3 %v1003_v11  ;;  %v1000_v15 = vld [vmem:[%s1508_s1 + $0x20] sm:$0xff]  ;;  %v999_v18 = vld [vmem:[%s1508_s1 + $0x18] sm:$0xff]  ;;  %v998_v19 = vld [vmem:[%s1508_s1 + $0x10] sm:$0xff]  ;;  %vm431_vm2 = vcmask 121856   ;;  %vm448_vm3 = vcmask 146432  }
   0xd   : > { %617 = vmatpush.bf16.msra.mxu0 %v1003_v11  ;;  %1099 = vmatpush.bf16.msra.mxu1 %v1003_v11  ;;  %v997_v21 = vld [vmem:[%s1508_s1 + $0x8] sm:$0xff]  ;;  %v996_v23 = vld [vmem:[%s1508_s1] sm:$0xff]  ;;  %vm481_vm4 = vcmask 171008   ;;  %vm498_vm5 = vcmask 195584   ;;  %vm515_vm6 = vcmask 220160   ;;  %s979_s11 = sshll.u32 %s1512_s13, 7 }
   0xe   : > { %s1179_s17 = scalar_lea.vmem %s1507_s0, %s1123_s14  ;;  %s1456_s16 = scalar_lea.vmem %s1510_s3, %s979_s11 }
   0xf   : > { %v1182_v0 = vld [vmem:[%s1179_s17 + $0x60] sm:$0xff]  ;;  %v1194_v2 = vld [vmem:[%s1179_s17 + $0x90] sm:$0xff]  ;;  %v1236_v8 = vld [vmem:[%s1179_s17 + $0x78] sm:$0xff] }
  0x10   : > { %v1185_v1 = vld [vmem:[%s1179_s17] sm:$0xff]  ;;  %332 = vrot.lane.b32.xlu1 %v1182_v0, %s1143_s18  ;;  %300 = vrot.lane.b32.xlu0 %v1182_v0, %s1144_s19  ;;  %v1197_v3 = vld [vmem:[%s1179_s17 + $0x30] sm:$0xff] }
  0x11   : > { %284 = vrot.lane.b32.xlu2 %v1185_v1, %s1144_s19  ;;  %v1206_v4 = vld [vmem:[%s1179_s17 + $0x6c] sm:$0xff]  ;;  %v1215_v5 = vld [vmem:[%s1179_s17 + $0x9c] sm:$0xff]  ;;  %1103 = vmatpush.bf16.msra.mxu2 %v1002_v12  ;;  %v1278_v16 = vld [vmem:[%s1179_s17 + $0xb4] sm:$0xff] }
  0x12   : > { %v1224_v6 = vld [vmem:[%s1179_s17 + $0x3c] sm:$0xff]  ;;  %v1227_v7 = vld [vmem:[%s1179_s17 + $0xc] sm:$0xff]  ;;  %1104 = vmatpush.bf16.msra.mxu3 %v1002_v12  ;;  %618 = vmatpush.bf16.msra.mxu0 %v1002_v12  ;;  %v1281_v17 = vld [vmem:[%s1179_s17 + $0x84] sm:$0xff] }
  0x13   : > { %v1239_v9 = vld [vmem:[%s1179_s17 + $0xa8] sm:$0xff]  ;;  %v1248_v10 = vld [vmem:[%s1179_s17 + $0x18] sm:$0xff]  ;;  %1102 = vmatpush.bf16.msra.mxu1 %v1002_v12 }
  0x14   : > { %v1263_v13 = vld [vmem:[%s1179_s17 + $0x48] sm:$0xff]  ;;  %v1302_v22 = vld [vmem:[%s1179_s17 + $0x54] sm:$0xff] }
  0x15   : > { %1106 = vmatpush.bf16.msra.mxu2 %v1001_v14  ;;  %v1296_v20 = vld [vmem:[%s1179_s17 + $0x24] sm:$0xff] }
  0x16   : > { %1107 = vmatpush.bf16.msra.mxu3 %v1001_v14  ;;  %619 = vmatpush.bf16.msra.mxu0 %v1001_v14 }
  0x17   : > { %1105 = vmatpush.bf16.msra.mxu1 %v1001_v14 }
  0x18   : > { %340 = vrot.lane.b32.xlu1 %v1194_v2, %s1143_s18  ;;  %308 = vrot.lane.b32.xlu0 %v1194_v2, %s1144_s19 }
  0x19   : > { %292 = vrot.lane.b32.xlu2 %v1197_v3, %s1144_s19  ;;  %1109 = vmatpush.bf16.msra.mxu2 %v1000_v15 }
  0x1a   : > { %1110 = vmatpush.bf16.msra.mxu3 %v1000_v15  ;;  %620 = vmatpush.bf16.msra.mxu0 %v1000_v15 }
  0x1b   : > { %1108 = vmatpush.bf16.msra.mxu1 %v1000_v15 }
  0x1d   : > { %1112 = vmatpush.bf16.msra.mxu2 %v999_v18 }
  0x1e   : > { %1113 = vmatpush.bf16.msra.mxu3 %v999_v18  ;;  %621 = vmatpush.bf16.msra.mxu0 %v999_v18 }
  0x1f   : > { %1111 = vmatpush.bf16.msra.mxu1 %v999_v18 }
  0x20   : > { %324 = vrot.lane.b32.xlu1 %v1197_v3, %s1143_s18  ;;  %316 = vrot.lane.b32.xlu0 %v1185_v1, %s1143_s18 }
  0x21   : > { %302 = vrot.lane.b32.xlu2 %v1206_v4, %s1144_s19  ;;  %1115 = vmatpush.bf16.msra.mxu2 %v998_v19 }
  0x22   : > { %1116 = vmatpush.bf16.msra.mxu3 %v998_v19  ;;  %622 = vmatpush.bf16.msra.mxu0 %v998_v19 }
  0x23   : > { %1114 = vmatpush.bf16.msra.mxu1 %v998_v19 }
  0x25   : > { %1118 = vmatpush.bf16.msra.mxu2 %v997_v21 }
  0x26   : > { %1119 = vmatpush.bf16.msra.mxu3 %v997_v21  ;;  %623 = vmatpush.bf16.msra.mxu0 %v997_v21 }
  0x27   : > { %1117 = vmatpush.bf16.msra.mxu1 %v997_v21 }
  0x28   : > { %334 = vrot.lane.b32.xlu1 %v1206_v4, %s1143_s18  ;;  %310 = vrot.lane.b32.xlu0 %v1215_v5, %s1144_s19 }
  0x29   : > { %342 = vrot.lane.b32.xlu2 %v1215_v5, %s1143_s18  ;;  %1121 = vmatpush.bf16.msra.mxu2 %v996_v23 }
  0x2a   : > { %1122 = vmatpush.bf16.msra.mxu3 %v996_v23  ;;  %624 = vmatpush.bf16.msra.mxu0 %v996_v23 }
  0x2b   : > { %1120 = vmatpush.bf16.msra.mxu1 %v996_v23 }
  0x30   : > { %294 = vrot.lane.b32.xlu1 %v1224_v6, %s1144_s19  ;;  %286 = vrot.lane.b32.xlu0 %v1227_v7, %s1144_s19 }
  0x31   : > { %318 = vrot.lane.b32.xlu2 %v1227_v7, %s1143_s18 }
  0x38   : > { %304 = vrot.lane.b32.xlu1 %v1236_v8, %s1144_s19  ;;  %326 = vrot.lane.b32.xlu0 %v1224_v6, %s1143_s18 }
  0x39   : > { %312 = vrot.lane.b32.xlu2 %v1239_v9, %s1144_s19 }
  0x40   : > { %344 = vrot.lane.b32.xlu1 %v1239_v9, %s1143_s18  ;;  %336 = vrot.lane.b32.xlu0 %v1236_v8, %s1143_s18 }
  0x41   : > { %288 = vrot.lane.b32.xlu2 %v1248_v10, %s1144_s19 }
  0x48   : > { %320 = vrot.lane.b32.xlu1 %v1248_v10, %s1143_s18  ;;  %296 = vrot.lane.b32.xlu0 %v1263_v13, %s1144_s19 }
  0x49   : > { %328 = vrot.lane.b32.xlu2 %v1263_v13, %s1143_s18 }
  0x50   : > { %314 = vrot.lane.b32.xlu1 %v1278_v16, %s1144_s19  ;;  %306 = vrot.lane.b32.xlu0 %v1281_v17, %s1144_s19 }
  0x51   : > { %338 = vrot.lane.b32.xlu2 %v1281_v17, %s1143_s18 }
  0x58   : > { %290 = vrot.lane.b32.xlu1 %v1296_v20, %s1144_s19  ;;  %346 = vrot.lane.b32.xlu0 %v1278_v16, %s1143_s18 }
  0x59   : > { %298 = vrot.lane.b32.xlu2 %v1302_v22, %s1144_s19 }
  0x60   : > { %330 = vrot.lane.b32.xlu1 %v1302_v22, %s1143_s18  ;;  %322 = vrot.lane.b32.xlu0 %v1296_v20, %s1143_s18 }
  0x6b   : > { %v285_v24 = vpop.permute.xlu2 %284 }
  0x6c   : > { %v383_v38 = vsel %vm381_vm0, %v1185_v1, %v285_v24 }
  0x6d   : > { %v415_v44 = vsel %vm414_vm1, %v383_v38, %v285_v24 }
  0x6e   : > { %v432_v48 = vsel %vm431_vm2, %v415_v44, %v285_v24 }
  0x73   : > { %v293_v25 = vpop.permute.xlu2 %292 }
  0x74   : > { %v391_v40 = vsel %vm381_vm0, %v1197_v3, %v293_v25 }
  0x75   : > { %v419_v45 = vsel %vm414_vm1, %v391_v40, %v293_v25 }
  0x76   : > { %v436_v49 = vsel %vm431_vm2, %v419_v45, %v293_v25 }
  0x7b   : > { %v303_v29 = vpop.permute.xlu2 %302 }
  0x7c   : > { %v401_v56 = vsel %vm381_vm0, %v1206_v4, %v303_v29 }
  0x7d   : > { %v424_v59 = vsel %vm414_vm1, %v401_v56, %v303_v29 }
  0x7e   : > { %v441_v61 = vsel %vm431_vm2, %v424_v59, %v303_v29 }
  0x82   : > { %v333_v26 = vpop.permute.xlu1 %332  ;;  %v301_v27 = vpop.permute.xlu0 %300 }
  0x83   : > { %v399_v28 = vsel %vm381_vm0, %v1182_v0, %v301_v27  ;;  %v343_v42 = vpop.permute.xlu2 %342 }
  0x84   : > { %v423_v30 = vsel %vm414_vm1, %v399_v28, %v301_v27 }
  0x85   : > { %v440_v31 = vsel %vm431_vm2, %v423_v30, %v301_v27 }
  0x86   : > { %v466_v32 = vsel %vm448_vm3, %v440_v31, %v333_v26 }
  0x87   : > { %v490_v33 = vsel %vm481_vm4, %v466_v32, %v333_v26 }
  0x88   : > { %v507_v34 = vsel %vm498_vm5, %v490_v33, %v333_v26 }
  0x89   : > { %969 = vmatmul.msk.bf16.vlgmr.msra.gmra.mxu2 %vm515_vm6, %v507_v34 }
  0x8a   : > { %v341_v35 = vpop.permute.xlu1 %340  ;;  %v309_v36 = vpop.permute.xlu0 %308 }
  0x8b   : > { %v407_v37 = vsel %vm381_vm0, %v1194_v2, %v309_v36  ;;  %v319_v60 = vpop.permute.xlu2 %318 }
  0x8c   : > { %v427_v39 = vsel %vm414_vm1, %v407_v37, %v309_v36 }
  0x8d   : > { %v444_v41 = vsel %vm431_vm2, %v427_v39, %v309_v36 }
  0x8e   : > { %v474_v43 = vsel %vm448_vm3, %v444_v41, %v341_v35 }
  0x8f   : > { %v494_v46 = vsel %vm481_vm4, %v474_v43, %v341_v35 }
  0x90   : > { %v511_v47 = vsel %vm498_vm5, %v494_v46, %v341_v35 }
  0x91   : > { %973 = vmatmul.msk.bf16.vlgmr.msra.gmra.mxu3 %vm515_vm6, %v511_v47 }
  0x92   : > { %v325_v50 = vpop.permute.xlu1 %324  ;;  %v317_v51 = vpop.permute.xlu0 %316 }
  0x93   : > { %v458_v52 = vsel %vm448_vm3, %v436_v49, %v325_v50  ;;  %v450_v53 = vsel %vm448_vm3, %v432_v48, %v317_v51  ;;  %v313_v18 = vpop.permute.xlu2 %312 }
  0x94   : > { %v486_v54 = vsel %vm481_vm4, %v458_v52, %v325_v50  ;;  %v482_v55 = vsel %vm481_vm4, %v450_v53, %v317_v51  ;;  %v411_v35 = vsel %vm381_vm0, %v1239_v9, %v313_v18 }
  0x95   : > { %v499_v57 = vsel %vm498_vm5, %v482_v55, %v317_v51  ;;  %v503_v58 = vsel %vm498_vm5, %v486_v54, %v325_v50  ;;  %v429_v38 = vsel %vm414_vm1, %v411_v35, %v313_v18 }
  0x96   : > { %961 = vmatmul.msk.bf16.vlgmr.msra.gmra.mxu0 %vm515_vm6, %v499_v57  ;;  %965 = vmatmul.msk.bf16.vlgmr.msra.gmra.mxu1 %vm515_vm6, %v503_v58  ;;  %v446_v40 = vsel %vm431_vm2, %v429_v38, %v313_v18 }
  0x9a   : > { %v335_v62 = vpop.permute.xlu1 %334  ;;  %v311_v63 = vpop.permute.xlu0 %310 }
  0x9b   : > { %v468_v0 = vsel %vm448_vm3, %v441_v61, %v335_v62  ;;  %v409_v1 = vsel %vm381_vm0, %v1215_v5, %v311_v63  ;;  %v289_v32 = vpop.permute.xlu2 %288 }
  0x9c   : > { %v491_v2 = vsel %vm481_vm4, %v468_v0, %v335_v62  ;;  %v428_v3 = vsel %vm414_vm1, %v409_v1, %v311_v63  ;;  %v387_v45 = vsel %vm381_vm0, %v1248_v10, %v289_v32 }
  0x9d   : > { %v445_v4 = vsel %vm431_vm2, %v428_v3, %v311_v63  ;;  %v508_v11 = vsel %vm498_vm5, %v491_v2, %v335_v62  ;;  %v417_v49 = vsel %vm414_vm1, %v387_v45, %v289_v32 }
  0x9e   : > { %v476_v12 = vsel %vm448_vm3, %v445_v4, %v343_v42  ;;  %970 = vmatmul.msk.bf16.gmra.mxu2 %vm515_vm6, %v508_v11  ;;  %v434_v50 = vsel %vm431_vm2, %v417_v49, %v289_v32 }
  0x9f   : > { %v495_v14 = vsel %vm481_vm4, %v476_v12, %v343_v42 }
  0xa0   : > { %v512_v15 = vsel %vm498_vm5, %v495_v14, %v343_v42 }
  0xa1   : > { %974 = vmatmul.msk.bf16.gmra.mxu3 %vm515_vm6, %v512_v15 }
  0xa2   : > { %v295_v5 = vpop.permute.xlu1 %294  ;;  %v287_v19 = vpop.permute.xlu0 %286 }
  0xa3   : > { %v385_v21 = vsel %vm381_vm0, %v1227_v7, %v287_v19  ;;  %v393_v23 = vsel %vm381_vm0, %v1224_v6, %v295_v5  ;;  %v329_v48 = vpop.permute.xlu2 %328 }
  0xa4   : > { %v416_v24 = vsel %vm414_vm1, %v385_v21, %v287_v19  ;;  %v420_v27 = vsel %vm414_vm1, %v393_v23, %v295_v5 }
  0xa5   : > { %v433_v25 = vsel %vm431_vm2, %v416_v24, %v287_v19  ;;  %v437_v30 = vsel %vm431_vm2, %v420_v27, %v295_v5 }
  0xa6   : > { %v452_v26 = vsel %vm448_vm3, %v433_v25, %v319_v60 }
  0xa7   : > { %v483_v28 = vsel %vm481_vm4, %v452_v26, %v319_v60 }
  0xa8   : > { %v500_v29 = vsel %vm498_vm5, %v483_v28, %v319_v60 }
  0xa9   : > { %962 = vmatmul.msk.bf16.gmra.mxu0 %vm515_vm6, %v500_v29 }
  0xaa   : > { %v305_v7 = vpop.permute.xlu1 %304  ;;  %v327_v31 = vpop.permute.xlu0 %326 }
  0xab   : > { %v460_v6 = vsel %vm448_vm3, %v437_v30, %v327_v31  ;;  %v403_v33 = vsel %vm381_vm0, %v1236_v8, %v305_v7  ;;  %v339_v60 = vpop.permute.xlu2 %338 }
  0xac   : > { %v487_v34 = vsel %vm481_vm4, %v460_v6, %v327_v31  ;;  %v425_v37 = vsel %vm414_vm1, %v403_v33, %v305_v7  ;;  %v1448_v33 = vld [vmem:[%s1509_s2] ss:$0 sm:$0xff] }
  0xad   : > { %v504_v36 = vsel %vm498_vm5, %v487_v34, %v327_v31  ;;  %v442_v39 = vsel %vm431_vm2, %v425_v37, %v305_v7 }
  0xae   : > { %966 = vmatmul.msk.bf16.gmra.mxu1 %vm515_vm6, %v504_v36 }
  0xb2   : > { %v345_v41 = vpop.permute.xlu1 %344  ;;  %v337_v42 = vpop.permute.xlu0 %336 }
  0xb3   : > { %v478_v8 = vsel %vm448_vm3, %v446_v40, %v345_v41  ;;  %v470_v43 = vsel %vm448_vm3, %v442_v39, %v337_v42  ;;  %v299_v14 = vpop.permute.xlu2 %298 }
  0xb4   : > { %v496_v9 = vsel %vm481_vm4, %v478_v8, %v345_v41  ;;  %v492_v44 = vsel %vm481_vm4, %v470_v43, %v337_v42  ;;  %v397_v21 = vsel %vm381_vm0, %v1302_v22, %v299_v14 }
  0xb5   : > { %v509_v46 = vsel %vm498_vm5, %v492_v44, %v337_v42  ;;  %v513_v47 = vsel %vm498_vm5, %v496_v9, %v345_v41  ;;  %v422_v25 = vsel %vm414_vm1, %v397_v21, %v299_v14 }
  0xb6   : > { %971 = vmatmul.msk.bf16.gmra.mxu2 %vm515_vm6, %v509_v46  ;;  %975 = vmatmul.msk.bf16.gmra.mxu3 %vm515_vm6, %v513_v47  ;;  %v439_v27 = vsel %vm431_vm2, %v422_v25, %v299_v14 }
  0xba   : > { %v321_v51 = vpop.permute.xlu1 %320  ;;  %v297_v52 = vpop.permute.xlu0 %296 }
  0xbb   : > { %v454_v53 = vsel %vm448_vm3, %v434_v50, %v321_v51  ;;  %v395_v10 = vsel %vm381_vm0, %v1263_v13, %v297_v52 }
  0xbc   : > { %v484_v54 = vsel %vm481_vm4, %v454_v53, %v321_v51  ;;  %v421_v55 = vsel %vm414_vm1, %v395_v10, %v297_v52 }
  0xbd   : > { %v438_v56 = vsel %vm431_vm2, %v421_v55, %v297_v52  ;;  %v501_v57 = vsel %vm498_vm5, %v484_v54, %v321_v51 }
  0xbe   : > { %v462_v58 = vsel %vm448_vm3, %v438_v56, %v329_v48  ;;  %963 = vmatmul.msk.bf16.gmra.mxu0 %vm515_vm6, %v501_v57 }
  0xbf   : > { %v488_v59 = vsel %vm481_vm4, %v462_v58, %v329_v48 }
  0xc0   : > { %v505_v61 = vsel %vm498_vm5, %v488_v59, %v329_v48 }
  0xc1   : > { %967 = vmatmul.msk.bf16.gmra.mxu1 %vm515_vm6, %v505_v61 }
  0xc2   : > { %v315_v13 = vpop.permute.xlu1 %314  ;;  %v307_v62 = vpop.permute.xlu0 %306 }
  0xc3   : > { %v405_v63 = vsel %vm381_vm0, %v1281_v17, %v307_v62  ;;  %v413_v0 = vsel %vm381_vm0, %v1278_v16, %v315_v13 }
  0xc4   : > { %v426_v1 = vsel %vm414_vm1, %v405_v63, %v307_v62  ;;  %v430_v4 = vsel %vm414_vm1, %v413_v0, %v315_v13 }
  0xc5   : > { %v443_v2 = vsel %vm431_vm2, %v426_v1, %v307_v62  ;;  %v447_v17 = vsel %vm431_vm2, %v430_v4, %v315_v13 }
  0xc6   : > { %v472_v3 = vsel %vm448_vm3, %v443_v2, %v339_v60 }
  0xc7   : > { %v493_v11 = vsel %vm481_vm4, %v472_v3, %v339_v60 }
  0xc8   : > { %v510_v12 = vsel %vm498_vm5, %v493_v11, %v339_v60 }
  0xc9   : > { %972 = vmatmul.msk.bf16.gmra.mxu2 %vm515_vm6, %v510_v12 }
  0xca   : > { %v291_v15 = vpop.permute.xlu1 %290  ;;  %v347_v18 = vpop.permute.xlu0 %346 }
  0xcb   : > { %v480_v16 = vsel %vm448_vm3, %v447_v17, %v347_v18  ;;  %v389_v5 = vsel %vm381_vm0, %v1296_v20, %v291_v15 }
  0xcc   : > { %v497_v19 = vsel %vm481_vm4, %v480_v16, %v347_v18  ;;  %v418_v24 = vsel %vm414_vm1, %v389_v5, %v291_v15 }
  0xcd   : > { %v514_v23 = vsel %vm498_vm5, %v497_v19, %v347_v18  ;;  %v435_v26 = vsel %vm431_vm2, %v418_v24, %v291_v15 }
  0xce   : > { %976 = vmatmul.msk.bf16.gmra.mxu3 %vm515_vm6, %v514_v23 }
  0xd2   : > { %v331_v28 = vpop.permute.xlu1 %330  ;;  %v323_v29 = vpop.permute.xlu0 %322 }
  0xd3   : > { %v464_v20 = vsel %vm448_vm3, %v439_v27, %v331_v28  ;;  %v456_v30 = vsel %vm448_vm3, %v435_v26, %v323_v29 }
  0xd4   : > { %v489_v22 = vsel %vm481_vm4, %v464_v20, %v331_v28  ;;  %v485_v7 = vsel %vm481_vm4, %v456_v30, %v323_v29 }
  0xd5   : > { %v502_v31 = vsel %vm498_vm5, %v485_v7, %v323_v29  ;;  %v506_v6 = vsel %vm498_vm5, %v489_v22, %v331_v28 }
  0xd6   : > { %964 = vmatmul.msk.bf16.gmra.mxu0 %vm515_vm6, %v502_v31  ;;  %968 = vmatmul.msk.bf16.gmra.mxu1 %vm515_vm6, %v506_v6 }
 0x10c   : > { %v666_v32 = vpop.f32.mrf.mxu2 }
 0x10d   : > { %v667_v34 = vadd.f32 %v1448_v33, %v666_v32 }
 0x10f   : > { %v722_v40 = vmax.f32 %v667_v34, 0.0 }
 0x113   : > { %v626_v35 = vpop.f32.mrf.mxu0  ;;  %v646_v36 = vpop.f32.mrf.mxu1 }
 0x114   : > { %v668_v37 = vpop.f32.mrf.mxu2  ;;  %v686_v38 = vpop.f32.mrf.mxu3  ;;  %v627_v8 = vadd.f32 %v1448_v33, %v626_v35  ;;  %v647_v43 = vadd.f32 %v1448_v33, %v646_v36 }
 0x115   : > { %v669_v39 = vadd.f32 %v1448_v33, %v668_v37  ;;  %v687_v9 = vadd.f32 %v1448_v33, %v686_v38 }
 0x116   : > { %v706_v50 = vmax.f32 %v627_v8, 0.0  ;;  %v714_v51 = vmax.f32 %v647_v43, 0.0 }
 0x117   : > { %v723_v41 = vmax.f32 %v669_v39, 0.0  ;;  %v730_v10 = vmax.f32 %v687_v9, 0.0 }
 0x119   : > { %v1047_v42 = vpack.c.bf16 %v723_v41, %v722_v40 }
 0x11b   : > { %1091 = vst [vmem:[%s1456_s16 + $0x40] sm:$0xff] %v1047_v42   ;;  %v628_v44 = vpop.f32.mrf.mxu0  ;;  %v648_v45 = vpop.f32.mrf.mxu1 }
 0x11c   : > { %v629_v46 = vadd.f32 %v1448_v33, %v628_v44  ;;  %v649_v47 = vadd.f32 %v1448_v33, %v648_v45  ;;  %v688_v48 = vpop.f32.mrf.mxu3 }
 0x11d   : > { %v689_v49 = vadd.f32 %v1448_v33, %v688_v48 }
 0x11e   : > { %v707_v52 = vmax.f32 %v629_v46, 0.0  ;;  %v715_v53 = vmax.f32 %v649_v47, 0.0 }
 0x11f   : > { %v731_v54 = vmax.f32 %v689_v49, 0.0 }
 0x120   : > { %v1007_v55 = vpack.c.bf16 %v707_v52, %v706_v50  ;;  %v1027_v56 = vpack.c.bf16 %v715_v53, %v714_v51 }
 0x121   : > { %v1067_v57 = vpack.c.bf16 %v731_v54, %v730_v10  ;;  %v671_v58 = vpop.f32.mrf.mxu2 }
 0x122   : > { %1008 = vst [vmem:[%s1456_s16] sm:$0xff] %v1007_v55   ;;  %v672_v61 = vadd.f32 %v1448_v33, %v671_v58 }
 0x123   : > { %1087 = vst [vmem:[%s1456_s16 + $0x20] sm:$0xff] %v1027_v56  }
 0x124   : > { %1095 = vst [vmem:[%s1456_s16 + $0x60] sm:$0xff] %v1067_v57   ;;  %v691_v59 = vpop.f32.mrf.mxu3  ;;  %v724_v1 = vmax.f32 %v672_v61, 0.0 }
 0x125   : > { %v692_v63 = vadd.f32 %v1448_v33, %v691_v59 }
 0x126   : > { %v631_v60 = vpop.f32.mrf.mxu0 }
 0x127   : > { %v632_v4 = vadd.f32 %v1448_v33, %v631_v60  ;;  %v732_v17 = vmax.f32 %v692_v63, 0.0 }
 0x129   : > { %v673_v13 = vpop.f32.mrf.mxu2  ;;  %v708_v16 = vmax.f32 %v632_v4, 0.0 }
 0x12a   : > { %v674_v62 = vadd.f32 %v1448_v33, %v673_v13 }
 0x12b   : > { %v651_v0 = vpop.f32.mrf.mxu1 }
 0x12c   : > { %v725_v2 = vmax.f32 %v674_v62, 0.0  ;;  %v693_v3 = vpop.f32.mrf.mxu3  ;;  %v652_v21 = vadd.f32 %v1448_v33, %v651_v0 }
 0x12d   : > { %v694_v11 = vadd.f32 %v1448_v33, %v693_v3 }
 0x12e   : > { %v1052_v12 = vpack.c.bf16 %v725_v2, %v724_v1  ;;  %v633_v14 = vpop.f32.mrf.mxu0  ;;  %v716_v26 = vmax.f32 %v652_v21, 0.0 }
 0x12f   : > { %v733_v15 = vmax.f32 %v694_v11, 0.0  ;;  %v634_v18 = vadd.f32 %v1448_v33, %v633_v14 }
 0x130   : > { %1092 = vst [vmem:[%s1456_s16 + $0x48] sm:$0xff] %v1052_v12  }
 0x131   : > { %v1072_v5 = vpack.c.bf16 %v733_v15, %v732_v17  ;;  %v709_v19 = vmax.f32 %v634_v18, 0.0 }
 0x133   : > { %1096 = vst [vmem:[%s1456_s16 + $0x68] sm:$0xff] %v1072_v5   ;;  %v1012_v23 = vpack.c.bf16 %v709_v19, %v708_v16  ;;  %v653_v24 = vpop.f32.mrf.mxu1 }
 0x134   : > { %v654_v25 = vadd.f32 %v1448_v33, %v653_v24 }
 0x135   : > { %1084 = vst [vmem:[%s1456_s16 + $0x8] sm:$0xff] %v1012_v23  }
 0x136   : > { %v717_v27 = vmax.f32 %v654_v25, 0.0 }
 0x138   : > { %v1032_v28 = vpack.c.bf16 %v717_v27, %v716_v26 }
 0x139   : > { %v676_v29 = vpop.f32.mrf.mxu2  ;;  %v696_v20 = vpop.f32.mrf.mxu3 }
 0x13a   : > { %1088 = vst [vmem:[%s1456_s16 + $0x28] sm:$0xff] %v1032_v28   ;;  %v677_v7 = vadd.f32 %v1448_v33, %v676_v29  ;;  %v697_v31 = vadd.f32 %v1448_v33, %v696_v20 }
 0x13b   : > { %v636_v30 = vpop.f32.mrf.mxu0 }
 0x13c   : > { %v637_v34 = vadd.f32 %v1448_v33, %v636_v30  ;;  %v726_v37 = vmax.f32 %v677_v7, 0.0  ;;  %v734_v39 = vmax.f32 %v697_v31, 0.0 }
 0x13e   : > { %v656_v22 = vpop.f32.mrf.mxu1  ;;  %v710_v43 = vmax.f32 %v637_v34, 0.0 }
 0x13f   : > { %v657_v8 = vadd.f32 %v1448_v33, %v656_v22 }
 0x141   : > { %v678_v6 = vpop.f32.mrf.mxu2  ;;  %v698_v32 = vpop.f32.mrf.mxu3  ;;  %v718_v49 = vmax.f32 %v657_v8, 0.0 }
 0x142   : > { %v679_v35 = vadd.f32 %v1448_v33, %v678_v6  ;;  %v699_v36 = vadd.f32 %v1448_v33, %v698_v32 }
 0x143   : > { %v638_v38 = vpop.f32.mrf.mxu0 }
 0x144   : > { %v727_v40 = vmax.f32 %v679_v35, 0.0  ;;  %v735_v41 = vmax.f32 %v699_v36, 0.0  ;;  %v639_v42 = vadd.f32 %v1448_v33, %v638_v38 }
 0x146   : > { %v1057_v9 = vpack.c.bf16 %v727_v40, %v726_v37  ;;  %v1077_v44 = vpack.c.bf16 %v735_v41, %v734_v39  ;;  %v711_v45 = vmax.f32 %v639_v42, 0.0  ;;  %v658_v46 = vpop.f32.mrf.mxu1 }
 0x147   : > { %v659_v47 = vadd.f32 %v1448_v33, %v658_v46 }
 0x148   : > { %1093 = vst [vmem:[%s1456_s16 + $0x50] sm:$0xff] %v1057_v9   ;;  %v1017_v48 = vpack.c.bf16 %v711_v45, %v710_v43 }
 0x149   : > { %1097 = vst [vmem:[%s1456_s16 + $0x70] sm:$0xff] %v1077_v44   ;;  %v719_v50 = vmax.f32 %v659_v47, 0.0 }
 0x14a   : > { %1085 = vst [vmem:[%s1456_s16 + $0x10] sm:$0xff] %v1017_v48  }
 0x14b   : > { %v1037_v51 = vpack.c.bf16 %v719_v50, %v718_v49 }
 0x14c   : > { %v681_v52 = vpop.f32.mrf.mxu2 }
 0x14d   : > { %1089 = vst [vmem:[%s1456_s16 + $0x30] sm:$0xff] %v1037_v51   ;;  %v682_v10 = vadd.f32 %v1448_v33, %v681_v52 }
 0x14f   : > { %v728_v58 = vmax.f32 %v682_v10, 0.0 }
 0x151   : > { %v701_v53 = vpop.f32.mrf.mxu3 }
 0x152   : > { %v702_v60 = vadd.f32 %v1448_v33, %v701_v53 }
 0x153   : > { %v641_v54 = vpop.f32.mrf.mxu0  ;;  %v661_v55 = vpop.f32.mrf.mxu1 }
 0x154   : > { %v683_v56 = vpop.f32.mrf.mxu2  ;;  %v642_v61 = vadd.f32 %v1448_v33, %v641_v54  ;;  %v662_v63 = vadd.f32 %v1448_v33, %v661_v55  ;;  %v736_v3 = vmax.f32 %v702_v60, 0.0 }
 0x155   : > { %v684_v57 = vadd.f32 %v1448_v33, %v683_v56 }
 0x156   : > { %v712_v14 = vmax.f32 %v642_v61, 0.0  ;;  %v720_v17 = vmax.f32 %v662_v63, 0.0 }
 0x157   : > { %v729_v59 = vmax.f32 %v684_v57, 0.0 }
 0x159   : > { %v1062_v13 = vpack.c.bf16 %v729_v59, %v728_v58  ;;  %v703_v62 = vpop.f32.mrf.mxu3 }
 0x15a   : > { %v704_v0 = vadd.f32 %v1448_v33, %v703_v62 }
 0x15b   : > { %1094 = vst [vmem:[%s1456_s16 + $0x58] sm:$0xff] %v1062_v13   ;;  %v643_v1 = vpop.f32.mrf.mxu0  ;;  %v663_v2 = vpop.f32.mrf.mxu1 }
 0x15c   : > { %v737_v4 = vmax.f32 %v704_v0, 0.0  ;;  %v644_v11 = vadd.f32 %v1448_v33, %v643_v1  ;;  %v664_v12 = vadd.f32 %v1448_v33, %v663_v2 }
 0x15e   : > { %v1082_v15 = vpack.c.bf16 %v737_v4, %v736_v3  ;;  %v713_v18 = vmax.f32 %v644_v11, 0.0  ;;  %v721_v16 = vmax.f32 %v664_v12, 0.0 }
 0x160   : > { %1098 = vst [vmem:[%s1456_s16 + $0x78] sm:$0xff] %v1082_v15   ;;  %v1022_v5 = vpack.c.bf16 %v713_v18, %v712_v14  ;;  %v1042_v19 = vpack.c.bf16 %v721_v16, %v720_v17 }
 0x162   : > { %1086 = vst [vmem:[%s1456_s16 + $0x18] sm:$0xff] %v1022_v5  }
 0x163   : > { %1090 = vst [vmem:[%s1456_s16 + $0x38] sm:$0xff] %v1042_v19  }
 0x164 PF: > { %s13_s12 = sadd.s32 1, %s1141_s12  }
 0x165   : > { %p10_p4 = scmp.ge.s32.totalorder %s13_s12, 4  }
 0x167   :  { %12 = sbr.rel (!%p10_p4) target bundleno = 1 (0x1), region = 62 }

// kernel: stage1.4
= control target key start
LH: loop header
LB: loop body
LE: loop exit
PB: predicated region body
PF: predicated region fallthrough
CT: control target
= control target key end

     0   :  { %s3077_s0 = inlined_call_operand.vmem [shape: bf16[2,9,9,512], index: 0, kind: input, shape index: {}]   ;;  %s3078_s1 = inlined_call_operand.vmem [shape: bf16[1152,128], index: 1, kind: input, shape index: {}]   ;;  %s3079_s2 = inlined_call_operand.vmem [shape: f32[1,128], index: 2, kind: input, shape index: {}]   ;;  %s3080_s3 = inlined_call_operand.vmem [shape: bf16[128,128], index: 3, kind: input, shape index: {}]   ;;  %s3081_s4 = inlined_call_operand.vmem [shape: f32[1,128], index: 4, kind: input, shape index: {}]   ;;  %s3082_s5 = inlined_call_operand.vmem [shape: bf16[2,64,128], index: 5, kind: output, shape index: {0}]   ;;  %s3083_s6 = inlined_call_operand.hbm [shape: f32[2,1,128], index: 6, kind: output, shape index: {1}]   ;;  %s3084_s7 = inlined_call_operand.hbm [shape: f32[2,1,128], index: 7, kind: output, shape index: {2}]  }
   0x1   :  { %3086 = sst [smem:[#allocation8_spill]] %s3077_s0 }
   0x2   :  { %13 = vsyncpa [#allocation3], 0 }
   0x3   :  { %15 = vsyncpa [#allocation3 + $0x1], 0 }
   0x4   :  { %16 = vsyncpa [#allocation5], 0 }
   0x5   :  { %18 = vsyncpa [#allocation5 + $0x1], 0  ;;  %s2402_s24 = smov 0   ;;  %s2404_s25 = smov 0  }
   0x6   :  { %s2406_s26 = smov 0   ;;  %s2408_s27 = smov 0  }
   0x7 LB: > { %s2423_s28 = sadd.s32 4294967295, %s2359_s27   ;;  %s1755_s29 = sadd.s32 4294967294, %s2359_s27   ;;  %s2359_s27 = sphi %s2408_s27, %s3094_s27   ;;  %s2355_s26 = sphi %s2406_s26, %s3093_s26   ;;  %s2351_s25 = sphi %s2404_s25, %s3092_s25   ;;  %s2347_s24 = sphi %s2402_s24, %s3091_s24  }
   0x8   : > { %s2427_s30 = sadd.s32 1, %s2359_s27   ;;  %s167_s8 = sadd.s32 1, %s2355_s26 }
   0x9   : > { %s164_s9 = ssub.s32 %s2359_s27, %s2427_s30  ;;  %p177_p0 = scmp.ne.s32.totalorder %s2355_s26, %s2351_s25 }
   0xa   : > { %p165_p1 = scmp.eq.s32.totalorder %s164_s9, 0  ;;  %p178_p2 = scmp.eq.s32.totalorder %s2423_s28, 1 }
   0xb   : > { %p183_p3 = scmp.ne.s32.totalorder %s2351_s25, %s2347_s24  ;;  %p184_p4 = scmp.eq.s32.totalorder %s1755_s29, 1 }
   0xc   : > { %s2438_s10 = scalar_select %p165_p1, %s2355_s26, %s167_s8  }
   0xd   : > { %p2440_p5 = por %p178_p2, %p177_p0  ;;  %p2444_p6 = por %p184_p4, %p183_p3 }
   0xe   : > { %p1758_p7 = scmp.ge.s32.totalorder %s2359_s27, 1  ;;  %p248_p8 = scmp.lt.s32.totalorder %s2359_s27, 3 }
  0x10   : > { %p249_p9 = pnand %p1758_p7, %p248_p8 }
  0x11   : > { %p288_p10 = scmp.lt.s32.totalorder (!%p249_p9), %s2423_s28, 1  ;;  %s3089_s0 = sld [smem:[#allocation8_spill]] (!%p249_p9) }
  0x12   : > { %252 = sbr.rel (%p249_p9) target bundleno = 499 (0x1f3), region = 40  ;;  %s2285_s18 = scalar_lea.hbm (!%p249_p9), %s3083_s6, 2 }
  0x17   : > { %v2112_v0 = vld [vmem:[%s3078_s1 + $0x38] sm:$0xff]  ;;  %v2111_v2 = vld [vmem:[%s3078_s1 + $0x30] sm:$0xff]  ;;  %v2110_v5 = vld [vmem:[%s3078_s1 + $0x28] sm:$0xff]  ;;  %s2482_s19 = scalar_select %p288_p10, %s2423_s28, 1 }
  0x18   : > { %v2120_v1 = vld [vmem:[%s3078_s1 + $0x78] sm:$0xff]  ;;  %2208 = vmatpush.bf16.msra.mxu2 %v2112_v0  ;;  %v2119_v3 = vld [vmem:[%s3078_s1 + $0x70] sm:$0xff]  ;;  %1222 = vmatpush.bf16.msra.mxu0 %v2112_v0  ;;  %v2118_v6 = vld [vmem:[%s3078_s1 + $0x68] sm:$0xff] }
  0x19   : > { %1251 = vmatpush.bf16.msra.mxu1 %v2120_v1  ;;  %v2136_v4 = vld [vmem:[%s3078_s1 + $0xf8] sm:$0xff]  ;;  %v2135_v7 = vld [vmem:[%s3078_s1 + $0xf0] sm:$0xff]  ;;  %v2109_v8 = vld [vmem:[%s3078_s1 + $0x20] sm:$0xff]  ;;  %s2216_s9 = smul.u32 288, %s2482_s19  ;;  %s2100_s21 = sshll.u32 %s2482_s19, 5 }
  0x1a   : > { %1309 = vmatpush.bf16.msra.mxu3 %v2136_v4  ;;  %v2117_v9 = vld [vmem:[%s3078_s1 + $0x60] sm:$0xff]  ;;  %v2134_v10 = vld [vmem:[%s3078_s1 + $0xe8] sm:$0xff]  ;;  %v2108_v11 = vld [vmem:[%s3078_s1 + $0x18] sm:$0xff]  ;;  %s2980_s8 = scalar_lea.vmem %s3082_s5, %s2100_s21  ;;  %s3023_s21 = sand.u32 1, %s2351_s25  }
  0x1b   : > { %v2116_v12 = vld [vmem:[%s3078_s1 + $0x58] sm:$0xff]  ;;  %v2133_v13 = vld [vmem:[%s3078_s1 + $0xe0] sm:$0xff]  ;;  %v2107_v14 = vld [vmem:[%s3078_s1 + $0x10] sm:$0xff]  ;;  %s2506_s22 = scalar_lea.vmem %s3089_s0, %s2216_s9  ;;  %s281_s23 = scalar_lea.vmem [#allocation2], %s3023_s21 }
  0x1c   : > { %2209 = vmatpush.bf16.msra.mxu2 %v2111_v2  ;;  %1223 = vmatpush.bf16.msra.mxu0 %v2111_v2  ;;  %v2115_v15 = vld [vmem:[%s3078_s1 + $0x50] sm:$0xff]  ;;  %v2132_v16 = vld [vmem:[%s3078_s1 + $0xd8] sm:$0xff]  ;;  %v2106_v17 = vld [vmem:[%s3078_s1 + $0x8] sm:$0xff]  ;;  %s1630_s19 = scalar_lea.hbm %s3083_s6, %s2423_s28  ;;  %s1632_s13 = sshll.u32 %s281_s23, 4  ;;  %s1633_s13 = int_to_ptr.vmem [resolvable:$true] %s1632_s13 }
  0x1d   : > { %1252 = vmatpush.bf16.msra.mxu1 %v2119_v3  ;;  %v2114_v18 = vld [vmem:[%s3078_s1 + $0x48] sm:$0xff]  ;;  %v2518_v19 = vld [vmem:[%s2506_s22 + $0x80] sm:$0xff]  ;;  %v2131_v23 = vld [vmem:[%s3078_s1 + $0xd0] sm:$0xff]  ;;  %s1634_s14 = sshll.u32 %s1630_s19, 4  ;;  %s1615_s15 = scalar_lea.sflag [#allocation3], %s3023_s21  ;;  %s1635_s14 = int_to_ptr.hbm [resolvable:$true] %s1634_s14 }
  0x1e   : > { %1310 = vmatpush.bf16.msra.mxu3 %v2135_v7  ;;  %v2521_v20 = vld [vmem:[%s2506_s22 + $0xa0] sm:$0xff]  ;;  %v2533_v24 = vunpack.c.l.b16 %v2518_v19  ;;  %v2128_v32 = vld [vmem:[%s3078_s1 + $0xb8] sm:$0xff]  ;;  %v2130_v34 = vld [vmem:[%s3078_s1 + $0xc8] sm:$0xff] }
  0x1f   : > { %v2524_v21 = vld [vmem:[%s2506_s22] sm:$0xff]  ;;  %v2536_v25 = vunpack.c.l.b16 %v2521_v20  ;;  %v2144_v33 = vld [vmem:[%s3078_s1 + $0x138] sm:$0xff]  ;;  %v2560_v35 = vld [vmem:[%s2506_s22 + $0x8] sm:$0xf] }
  0x20   : > { %2210 = vmatpush.bf16.msra.mxu2 %v2110_v5  ;;  %1224 = vmatpush.bf16.msra.mxu0 %v2110_v5  ;;  %v2527_v22 = vld [vmem:[%s2506_s22 + $0x20] sm:$0xff]  ;;  %v340_v26 = vunpack.c.h.b16 %v2524_v21  ;;  %v356_v31 = vunpack.c.l.b16 %v2524_v21  ;;  %v2563_v36 = vld [vmem:[%s2506_s22 + $0x28] sm:$0xf]  ;;  %v2127_v40 = vld [vmem:[%s3078_s1 + $0xb0] sm:$0xff]  ;;  %v460_v41 = vunpack.c.l.b16 %v2560_v35 }
  0x21   : > { %1253 = vmatpush.bf16.msra.mxu1 %v2118_v6  ;;  %v341_v27 = vunpack.c.h.b16 %v2527_v22  ;;  %v2105_v28 = vld [vmem:[%s3078_s1] sm:$0xff]  ;;  %v2547_v30 = vunpack.c.l.b16 %v2527_v22  ;;  %v736_v37 = vpack.c.b16 %v2536_v25, %v2533_v24  ;;  %v462_v42 = vunpack.c.l.b16 %v2563_v36  ;;  %v2143_v43 = vld [vmem:[%s3078_s1 + $0x130] sm:$0xff]  ;;  %v2152_v45 = vld [vmem:[%s3078_s1 + $0x178] sm:$0xff] }
  0x22   : > { %1311 = vmatpush.bf16.msra.mxu3 %v2134_v10  ;;  %v2113_v29 = vld [vmem:[%s3078_s1 + $0x40] sm:$0xff]  ;;  %v304_v46 = vld [vmem:[%s2506_s22 + $0x30] sm:$0x1]  ;;  %v2168_v48 = vld [vmem:[%s3078_s1 + $0x1f8] sm:$0xff] }
  0x23   : > { %v719_v38 = vpack.c.b16 %v341_v27, %v340_v26  ;;  %v718_v39 = vpack.c.b16 %v2547_v30, %v356_v31  ;;  %v2129_v44 = vld [vmem:[%s3078_s1 + $0xc0] sm:$0xff]  ;;  %v300_v47 = vld [vmem:[%s2506_s22 + $0x10] sm:$0x1]  ;;  %v2126_v50 = vld [vmem:[%s3078_s1 + $0xa8] sm:$0xff]  ;;  %v721_v51 = vpack.c.b16 %v462_v42, %v460_v41  ;;  %v359_v52 = vunpack.c.l.b16 %v304_v46 }
  0x24   : > { %2211 = vmatpush.bf16.msra.mxu2 %v2109_v8  ;;  %1225 = vmatpush.bf16.msra.mxu0 %v2109_v8  ;;  %v2151_v49 = vld [vmem:[%s3078_s1 + $0x170] sm:$0xff]  ;;  %v357_v53 = vunpack.c.l.b16 %v300_v47  ;;  %v2142_v54 = vld [vmem:[%s3078_s1 + $0x128] sm:$0xff]  ;;  %v2603_v55 = vld [vmem:[%s2506_s22 + $0xc0] sm:$0xff] }
  0x25   : > { %1254 = vmatpush.bf16.msra.mxu1 %v2117_v9  ;;  %v2606_v56 = vld [vmem:[%s2506_s22 + $0xe0] sm:$0xff]  ;;  %v2167_v57 = vld [vmem:[%s3078_s1 + $0x1f0] sm:$0xff]  ;;  %v2150_v60 = vld [vmem:[%s3078_s1 + $0x168] sm:$0xff]  ;;  %v373_v62 = vpack.c.b16 %v359_v52, %v2547_v30  ;;  %v2628_v1 = vunpack.c.l.b16 %v2603_v55  ;;  %v344_v52 = vunpack.c.h.b16 %v2518_v19 }
  0x26   : > { %1312 = vmatpush.bf16.msra.mxu3 %v2133_v13  ;;  %v2612_v58 = vld [vmem:[%s2506_s22 + $0x40] sm:$0xff]  ;;  %v372_v63 = vpack.c.b16 %v357_v53, %v356_v31  ;;  %v2631_v2 = vunpack.c.l.b16 %v2606_v56  ;;  %v2124_v8 = vld [vmem:[%s3078_s1 + $0x98] sm:$0xff]  ;;  %v2651_v10 = vld [vmem:[%s2506_s22 + $0x48] sm:$0xf]  ;;  %v345_v53 = vunpack.c.h.b16 %v2521_v20 }
  0x27   : > { %v2615_v59 = vld [vmem:[%s2506_s22 + $0x60] sm:$0xff]  ;;  %v342_v3 = vunpack.c.h.b16 %v2612_v58  ;;  %v2636_v5 = vunpack.c.l.b16 %v2612_v58  ;;  %v2140_v9 = vld [vmem:[%s3078_s1 + $0x118] sm:$0xff]  ;;  %v388_v31 = vshrl.u32 %v373_v62, 16 }
  0x28   : > { %2212 = vmatpush.bf16.msra.mxu2 %v2108_v11  ;;  %1226 = vmatpush.bf16.msra.mxu0 %v2108_v11  ;;  %v2125_v61 = vld [vmem:[%s3078_s1 + $0xa0] sm:$0xff]  ;;  %v343_v4 = vunpack.c.h.b16 %v2615_v59  ;;  %v2639_v6 = vunpack.c.l.b16 %v2615_v59  ;;  %v2654_v11 = vld [vmem:[%s2506_s22 + $0x68] sm:$0xf]  ;;  %v745_v13 = vpack.c.b16 %v2631_v2, %v2628_v1  ;;  %v2148_v26 = vld [vmem:[%s3078_s1 + $0x158] sm:$0xff] }
  0x29   : > { %1255 = vmatpush.bf16.msra.mxu1 %v2116_v12  ;;  %v2141_v0 = vld [vmem:[%s3078_s1 + $0x120] sm:$0xff]  ;;  %v383_v12 = vshll.u32 %v372_v63, 16  ;;  %v466_v21 = vunpack.c.l.b16 %v2654_v11  ;;  %v2156_v35 = vld [vmem:[%s3078_s1 + $0x198] sm:$0xff]  ;;  %v2103_v11 = vld [vmem:[%s2506_s22 + $0x8c] sm:$0xf]  ;;  %v724_v59 = vpack.c.b16 %v2636_v5, %v2547_v30 }
  0x2a   : > { %1313 = vmatpush.bf16.msra.mxu3 %v2132_v16  ;;  %v2149_v7 = vld [vmem:[%s3078_s1 + $0x160] sm:$0xff]  ;;  %v727_v16 = vpack.c.b16 %v2639_v6, %v2636_v5 }
  0x2c   : > { %2213 = vmatpush.bf16.msra.mxu2 %v2107_v14  ;;  %1227 = vmatpush.bf16.msra.mxu0 %v2107_v14  ;;  %v728_v14 = vpack.c.b16 %v343_v4, %v342_v3 }
  0x2d   : > { %1256 = vmatpush.bf16.msra.mxu1 %v2115_v15  ;;  %v390_v15 = vshll.u32 %v373_v62, 16 }
  0x2e   : > { %1314 = vmatpush.bf16.msra.mxu3 %v2131_v23  ;;  %v2139_v23 = vld [vmem:[%s3078_s1 + $0x110] sm:$0xff] }
  0x30   : > { %2214 = vmatpush.bf16.msra.mxu2 %v2106_v17  ;;  %1228 = vmatpush.bf16.msra.mxu0 %v2106_v17  ;;  %v2123_v17 = vld [vmem:[%s3078_s1 + $0x90] sm:$0xff] }
  0x31   : > { %1257 = vmatpush.bf16.msra.mxu1 %v2114_v18  ;;  %v464_v18 = vunpack.c.l.b16 %v2651_v10  ;;  %v2169_v10 = vld [vmem:[%s3078_s1 + $0x200] sm:$0xff] }
  0x32   : > { %1315 = vmatpush.bf16.msra.mxu3 %v2130_v34  ;;  %v312_v34 = vld [vmem:[%s2506_s22 + $0x70] sm:$0x1] }
  0x33   : > { %v363_v47 = vunpack.c.l.b16 %v312_v34 }
  0x34   : > { %2215 = vmatpush.bf16.msra.mxu2 %v2105_v28  ;;  %1229 = vmatpush.bf16.msra.mxu0 %v2105_v28  ;;  %v381_v28 = vshrl.u32 %v372_v63, 16 }
  0x35   : > { %1258 = vmatpush.bf16.msra.mxu1 %v2113_v29  ;;  %v385_v29 = vrot.slane %v383_v12, 1  ;;  %v375_v63 = vpack.c.b16 %v363_v47, %v2639_v6  ;;  %v2727_v12 = vld [vmem:[%s2506_s22 + $0x88] sm:$0xf] }
  0x36   : > { %1316 = vmatpush.bf16.msra.mxu3 %v2129_v44 }
  0x37   : > { %1240 = vmatmul.bf16.vlgmr.msra.gmra.mxu2 %v736_v37  ;;  %1230 = vmatmul.bf16.vlgmr.msra.gmra.mxu0 %v718_v39  ;;  %v2166_v37 = vld [vmem:[%s3078_s1 + $0x1e8] sm:$0xff]  ;;  %v386_v44 = vor.u32 %v385_v29, %v381_v28  ;;  %v468_v28 = vunpack.c.l.b16 %v2727_v12 }
  0x38   : > { %1280 = vmatpush.bf16.msrb.mxu2 %v2128_v32  ;;  %1338 = vmatpush.bf16.msrb.mxu0 %v2144_v33  ;;  %v392_v32 = vrot.slane %v390_v15, 1  ;;  %v308_v33 = vld [vmem:[%s2506_s22 + $0x50] sm:$0x1]  ;;  %v2122_v39 = vld [vmem:[%s3078_s1 + $0x88] sm:$0xff] }
  0x39   : > { %1259 = vmatmul.bf16.vlgmr.msra.gmra.mxu1 %v719_v38  ;;  %1317 = vmatmul.bf16.vlgmr.msra.gmra.mxu3 %v721_v51  ;;  %v2147_v38 = vld [vmem:[%s3078_s1 + $0x150] sm:$0xff]  ;;  %v361_v46 = vunpack.c.l.b16 %v308_v33  ;;  %v2137_v51 = vld [vmem:[%s3078_s1 + $0x100] sm:$0xff]  ;;  %v305_v33 = vld [vmem:[%s2506_s22 + $0x38] sm:$0x1] }
  0x3a   : > { %1367 = vmatpush.bf16.msrb.mxu1 %v2152_v45  ;;  %1425 = vmatpush.bf16.msrb.mxu3 %v2168_v48  ;;  %v2693_v45 = vor.u32 %v392_v32, %v388_v31  ;;  %v2165_v48 = vld [vmem:[%s3078_s1 + $0x1e0] sm:$0xff]  ;;  %v301_v31 = vld [vmem:[%s2506_s22 + $0x18] sm:$0x1]  ;;  %v2158_v32 = vld [vmem:[%s3078_s1 + $0x1a8] sm:$0xff] }
  0x3b   : > { %v374_v62 = vpack.c.b16 %v361_v46, %v2636_v5  ;;  %v461_v46 = vunpack.c.l.b16 %v301_v31  ;;  %v2155_v31 = vld [vmem:[%s3078_s1 + $0x190] sm:$0xff] }
  0x3c   : > { %1281 = vmatpush.bf16.msrb.mxu2 %v2127_v40  ;;  %1339 = vmatpush.bf16.msrb.mxu0 %v2143_v43  ;;  %v730_v40 = vpack.c.b16 %v466_v21, %v464_v18  ;;  %v2138_v43 = vld [vmem:[%s3078_s1 + $0x108] sm:$0xff] }
  0x3d   : > { %v395_v34 = vshrl.u32 %v374_v62, 16 }
  0x3e   : > { %1368 = vmatpush.bf16.msrb.mxu1 %v2151_v49  ;;  %1426 = vmatpush.bf16.msrb.mxu3 %v2167_v57  ;;  %v2146_v49 = vld [vmem:[%s3078_s1 + $0x148] sm:$0xff]  ;;  %v553_v57 = vunpack.c.l.b16 %v386_v44  ;;  %v2164_v44 = vld [vmem:[%s3078_s1 + $0x1d8] sm:$0xff] }
  0x40   : > { %1282 = vmatpush.bf16.msrb.mxu2 %v2126_v50  ;;  %1340 = vmatpush.bf16.msrb.mxu0 %v2142_v54  ;;  %v2121_v50 = vld [vmem:[%s3078_s1 + $0x80] sm:$0xff]  ;;  %v2160_v54 = vld [vmem:[%s3078_s1 + $0x1b8] sm:$0xff] }
  0x42   : > { %1369 = vmatpush.bf16.msrb.mxu1 %v2150_v60  ;;  %1427 = vmatpush.bf16.msrb.mxu3 %v2166_v37  ;;  %v555_v60 = vunpack.c.l.b16 %v2693_v45 }
  0x44   : > { %1283 = vmatpush.bf16.msrb.mxu2 %v2125_v61  ;;  %1341 = vmatpush.bf16.msrb.mxu0 %v2141_v0  ;;  %v2176_v61 = vld [vmem:[%s3078_s1 + $0x238] sm:$0xff]  ;;  %v2145_v0 = vld [vmem:[%s3078_s1 + $0x140] sm:$0xff]  ;;  %v720_v15 = vpack.c.b16 %v555_v60, %v553_v57 }
  0x46   : > { %1370 = vmatpush.bf16.msrb.mxu1 %v2149_v7  ;;  %1428 = vmatpush.bf16.msrb.mxu3 %v2165_v48  ;;  %v2101_v7 = vld [vmem:[%s2506_s22 + $0xc] sm:$0xf] }
  0x47   : > { %1245 = vmatmul.bf16.gmra.mxu2 %v745_v13  ;;  %1235 = vmatmul.bf16.gmra.mxu0 %v727_v16  ;;  %v2730_v13 = vld [vmem:[%s2506_s22 + $0xa8] sm:$0xf]  ;;  %v397_v16 = vshll.u32 %v374_v62, 16 }
  0x48   : > { %1284 = vmatpush.bf16.msrb.mxu2 %v2124_v8  ;;  %1342 = vmatpush.bf16.msrb.mxu0 %v2140_v9  ;;  %v1762_v8 = vld [vmem:[%s2506_s22 + $0x28] sm:$0xf0]  ;;  %v2159_v9 = vld [vmem:[%s3078_s1 + $0x1b0] sm:$0xff]  ;;  %v470_v29 = vunpack.c.l.b16 %v2730_v13 }
  0x49   : > { %1264 = vmatmul.bf16.gmra.mxu1 %v728_v14  ;;  %1322 = vmatmul.bf16.gmra.mxu3 %v730_v40  ;;  %v737_v14 = vpack.c.b16 %v345_v53, %v344_v52  ;;  %v399_v37 = vrot.slane %v397_v16, 1  ;;  %v316_v40 = vld [vmem:[%s2506_s22 + $0x90] sm:$0x1]  ;;  %v2174_v48 = vld [vmem:[%s3078_s1 + $0x228] sm:$0xff] }
  0x4a   : > { %1371 = vmatpush.bf16.msrb.mxu1 %v2148_v26  ;;  %v2175_v26 = vld [vmem:[%s3078_s1 + $0x230] sm:$0xff]  ;;  %v739_v47 = vpack.c.b16 %v470_v29, %v468_v28  ;;  %1429 = vmatpush.bf16.msrb.mxu3 %v2164_v44  ;;  %v2102_v16 = vld [vmem:[%s2506_s22 + $0x4c] sm:$0xf] }
  0x4c   : > { %1285 = vmatpush.bf16.msrb.mxu2 %v2123_v17  ;;  %1343 = vmatpush.bf16.msrb.mxu0 %v2139_v23  ;;  %v404_v17 = vshll.u32 %v375_v63, 16  ;;  %v1765_v23 = vor.u32 %v2101_v7, %v1762_v8  ;;  %v346_v8 = vunpack.c.h.b16 %v2603_v55  ;;  %v3090_v55 = vunpack.c.h.b16 %v2606_v56 }
  0x4e   : > { %1372 = vmatpush.bf16.msrb.mxu1 %v2147_v38  ;;  %v402_v38 = vshrl.u32 %v375_v63, 16  ;;  %v476_v63 = vpack.c.b16 %v461_v46, %v460_v41  ;;  %v743_v30 = vpack.c.b16 %v346_v8, %v345_v53 }
  0x50   : > { %1286 = vmatpush.bf16.msrb.mxu2 %v2122_v39  ;;  %1344 = vmatpush.bf16.msrb.mxu0 %v2138_v43  ;;  %v406_v39 = vrot.slane %v404_v17, 1  ;;  %v320_v43 = vld [vmem:[%s2506_s22 + $0xb0] sm:$0x1]  ;;  %v1766_v17 = vld [vmem:[%s2506_s22 + $0x68] sm:$0xf0] }
  0x51   : > { %v367_v62 = vunpack.c.l.b16 %v320_v43  ;;  %v1769_v43 = vor.u32 %v2102_v16, %v1766_v17  ;;  %v2162_v16 = vld [vmem:[%s3078_s1 + $0x1c8] sm:$0xff] }
  0x52   : > { %1373 = vmatpush.bf16.msrb.mxu1 %v2146_v49  ;;  %v463_v49 = vunpack.c.l.b16 %v305_v33  ;;  %v2768_v57 = vor.u32 %v406_v39, %v402_v38  ;;  %v2798_v33 = vld [vmem:[%s2506_s22 + $0xe8] sm:$0xf] }
  0x53   : > { %v377_v36 = vpack.c.b16 %v367_v62, %v2536_v25 }
  0x54   : > { %1287 = vmatpush.bf16.msrb.mxu2 %v2121_v50  ;;  %1345 = vmatpush.bf16.msrb.mxu0 %v2137_v51  ;;  %v2157_v50 = vld [vmem:[%s3078_s1 + $0x1a0] sm:$0xff]  ;;  %v2163_v51 = vld [vmem:[%s3078_s1 + $0x1d0] sm:$0xff]  ;;  %v477_v7 = vpack.c.b16 %v463_v49, %v462_v42  ;;  %v487_v42 = vshll.u32 %v476_v63, 16 }
  0x55   : > { %1430 = vmatpush.bf16.msrb.mxu3 %v2163_v51  ;;  %v418_v39 = vshll.u32 %v377_v36, 16  ;;  %v313_v51 = vld [vmem:[%s2506_s22 + $0x78] sm:$0x1] }
  0x56   : > { %1374 = vmatpush.bf16.msrb.mxu1 %v2145_v0  ;;  %v2173_v0 = vld [vmem:[%s3078_s1 + $0x220] sm:$0xff]  ;;  %v489_v44 = vrot.slane %v487_v42, 1  ;;  %v492_v46 = vshrl.u32 %v477_v7, 16  ;;  %v328_v42 = vld [vmem:[%s2506_s22 + $0xf0] sm:$0x1] }
  0x57   : > { %1288 = vmatmul.bf16.vlgmr.msrb.gmra.mxu2 %v720_v15  ;;  %1346 = vmatmul.bf16.vlgmr.msrb.gmra.mxu0 %v1765_v23  ;;  %v2172_v23 = vld [vmem:[%s3078_s1 + $0x218] sm:$0xff] }
  0x58   : > { %1396 = vmatpush.bf16.msra.mxu2 %v2160_v54  ;;  %1454 = vmatpush.bf16.msra.mxu0 %v2176_v61  ;;  %v2766_v54 = vor.u32 %v399_v37, %v395_v34  ;;  %v365_v61 = vunpack.c.l.b16 %v316_v40  ;;  %v485_v40 = vshrl.u32 %v476_v63, 16  ;;  %v420_v63 = vrot.slane %v418_v39, 1 }
  0x59   : > { %1269 = vmatmul.bf16.gmra.mxu1 %v737_v14  ;;  %1327 = vmatmul.bf16.gmra.mxu3 %v739_v47  ;;  %v559_v14 = vunpack.c.l.b16 %v2768_v57  ;;  %v2914_v57 = vld [vmem:[%s3079_s2] ss:$0 sm:$0xff] }
  0x5a   : > { %v557_v41 = vunpack.c.l.b16 %v2766_v54  ;;  %v376_v15 = vpack.c.b16 %v365_v61, %v2533_v24  ;;  %1431 = vmatpush.bf16.msrb.mxu3 %v2162_v16 }
  0x5c   : > { %1397 = vmatpush.bf16.msra.mxu2 %v2159_v9  ;;  %1455 = vmatpush.bf16.msra.mxu0 %v2175_v26  ;;  %v3085_v9 = vunpack.c.h.b16 %v2606_v56  ;;  %v494_v26 = vshll.u32 %v477_v7, 16  ;;  %v729_v37 = vpack.c.b16 %v559_v14, %v557_v41  ;;  %v411_v38 = vshll.u32 %v376_v15, 16  ;;  %v2154_v7 = vld [vmem:[%s3078_s1 + $0x188] sm:$0xff] }
  0x5d   : > { %v409_v61 = vshrl.u32 %v376_v15, 16  ;;  %v2171_v15 = vld [vmem:[%s3078_s1 + $0x210] sm:$0xff] }
  0x5e   : > { %v746_v34 = vpack.c.b16 %v3085_v9, %v346_v8  ;;  %v496_v49 = vrot.slane %v494_v26, 1  ;;  %v413_v62 = vrot.slane %v411_v38, 1  ;;  %v490_v26 = vor.u32 %v489_v44, %v485_v40  ;;  %v2170_v40 = vld [vmem:[%s3078_s1 + $0x208] sm:$0xff]  ;;  %v331_v8 = vld [vmem:[%s2506_s22 + $0x110] sm:$0x1] }
  0x5f   : > { %v371_v9 = vunpack.c.l.b16 %v328_v42 }
  0x60   : > { %1398 = vmatpush.bf16.msra.mxu2 %v2158_v32  ;;  %1456 = vmatpush.bf16.msra.mxu0 %v2174_v48  ;;  %v2795_v32 = vld [vmem:[%s2506_s22 + $0xc8] sm:$0xf]  ;;  %v474_v48 = vunpack.c.l.b16 %v2798_v33  ;;  %v2833_v38 = vor.u32 %v413_v62, %v409_v61 }
  0x61   : > { %v472_v47 = vunpack.c.l.b16 %v2795_v32 }
  0x64   : > { %1399 = vmatpush.bf16.msra.mxu2 %v2157_v50  ;;  %1457 = vmatpush.bf16.msra.mxu0 %v2173_v0  ;;  %v309_v50 = vld [vmem:[%s2506_s22 + $0x58] sm:$0x1]  ;;  %v416_v0 = vshrl.u32 %v377_v36, 16  ;;  %v748_v36 = vpack.c.b16 %v474_v48, %v472_v47 }
  0x65   : > { %v465_v17 = vunpack.c.l.b16 %v309_v50 }
  0x66   : > { %v2835_v39 = vor.u32 %v420_v63, %v416_v0  ;;  %v379_v0 = vpack.c.b16 %v371_v9, %v2631_v2 }
  0x67   : > { %1293 = vmatmul.bf16.gmra.mxu2 %v729_v37  ;;  %1351 = vmatmul.bf16.gmra.mxu0 %v1769_v43  ;;  %v2153_v37 = vld [vmem:[%s3078_s1 + $0x180] sm:$0xff]  ;;  %v478_v44 = vpack.c.b16 %v465_v17, %v464_v18  ;;  %v1770_v18 = vld [vmem:[%s2506_s22 + $0xa8] sm:$0xf0] }
  0x68   : > { %1400 = vmatpush.bf16.msra.mxu2 %v2156_v35  ;;  %1458 = vmatpush.bf16.msra.mxu0 %v2172_v23  ;;  %v324_v35 = vld [vmem:[%s2506_s22 + $0xd0] sm:$0x1]  ;;  %v467_v23 = vunpack.c.l.b16 %v313_v51  ;;  %v561_v51 = vunpack.c.l.b16 %v2833_v38  ;;  %v563_v61 = vunpack.c.l.b16 %v2835_v39  ;;  %v432_v16 = vshll.u32 %v379_v0, 16 }
  0x69   : > { %1274 = vmatmul.bf16.gmra.mxu1 %v746_v34  ;;  %v2161_v34 = vld [vmem:[%s3078_s1 + $0x1c0] sm:$0xff]  ;;  %v369_v43 = vunpack.c.l.b16 %v324_v35  ;;  %1332 = vmatmul.bf16.gmra.mxu3 %v748_v36  ;;  %v1773_v9 = vor.u32 %v2103_v11, %v1770_v18  ;;  %v499_v36 = vshrl.u32 %v478_v44, 16 }
  0x6a   : > { %1432 = vmatpush.bf16.msrb.mxu3 %v2161_v34  ;;  %v738_v35 = vpack.c.b16 %v563_v61, %v561_v51 }
  0x6b   : > { %v378_v62 = vpack.c.b16 %v369_v43, %v2628_v1  ;;  %v430_v43 = vshrl.u32 %v379_v0, 16 }
  0x6c   : > { %1401 = vmatpush.bf16.msra.mxu2 %v2155_v31  ;;  %v497_v31 = vor.u32 %v496_v49, %v492_v46  ;;  %1459 = vmatpush.bf16.msra.mxu0 %v2171_v15  ;;  %v479_v46 = vpack.c.b16 %v467_v23, %v466_v21  ;;  %v554_v49 = vunpack.c.l.b16 %v490_v26  ;;  %v501_v21 = vshll.u32 %v478_v44, 16  ;;  %v317_v15 = vld [vmem:[%s2506_s22 + $0x98] sm:$0x1] }
  0x6d   : > { %v425_v42 = vshll.u32 %v378_v62, 16  ;;  %v423_v34 = vshrl.u32 %v378_v62, 16 }
  0x6e   : > { %v556_v50 = vunpack.c.l.b16 %v497_v31  ;;  %v508_v63 = vshll.u32 %v479_v46, 16  ;;  %v503_v17 = vrot.slane %v501_v21, 1  ;;  %v506_v23 = vshrl.u32 %v479_v46, 16  ;;  %v321_v31 = vld [vmem:[%s2506_s22 + $0xb8] sm:$0x1] }
  0x6f   : > { %v471_v44 = vunpack.c.l.b16 %v321_v31  ;;  %v2104_v21 = vld [vmem:[%s2506_s22 + $0xcc] sm:$0xf] }
  0x70   : > { %1402 = vmatpush.bf16.msra.mxu2 %v2154_v7  ;;  %1460 = vmatpush.bf16.msra.mxu0 %v2170_v40  ;;  %v723_v7 = vpack.c.b16 %v556_v50, %v554_v49  ;;  %v510_v26 = vrot.slane %v508_v63, 1  ;;  %v434_v40 = vrot.slane %v432_v16, 1  ;;  %v725_v49 = vpack.c.b16 %v342_v3, %v341_v27  ;;  %v1774_v63 = vld [vmem:[%s2506_s22 + $0xe8] sm:$0xf0] }
  0x71   : > { %v469_v50 = vunpack.c.l.b16 %v317_v15  ;;  %v504_v11 = vor.u32 %v503_v17, %v499_v36  ;;  %v481_v0 = vpack.c.b16 %v471_v44, %v470_v29  ;;  %v1777_v13 = vor.u32 %v2104_v21, %v1774_v63  ;;  %v325_v15 = vld [vmem:[%s2506_s22 + $0xd8] sm:$0x1] }
  0x72   : > { %v2865_v46 = vor.u32 %v434_v40, %v430_v43  ;;  %v511_v18 = vor.u32 %v510_v26, %v506_v23  ;;  %v329_v36 = vld [vmem:[%s2506_s22 + $0xf8] sm:$0x1]  ;;  %v734_v17 = vpack.c.b16 %v344_v52, %v343_v4  ;;  %v473_v23 = vunpack.c.l.b16 %v325_v15 }
  0x73   : > { %v480_v62 = vpack.c.b16 %v469_v50, %v468_v28  ;;  %v558_v27 = vunpack.c.l.b16 %v504_v11  ;;  %v520_v16 = vshrl.u32 %v481_v0, 16  ;;  %v475_v26 = vunpack.c.l.b16 %v329_v36 }
  0x74   : > { %1403 = vmatpush.bf16.msra.mxu2 %v2153_v37  ;;  %1461 = vmatpush.bf16.msra.mxu0 %v2169_v10  ;;  %v427_v37 = vrot.slane %v425_v42, 1  ;;  %v567_v58 = vunpack.c.l.b16 %v2865_v46  ;;  %v560_v3 = vunpack.c.l.b16 %v511_v18  ;;  %v726_v4 = vpack.c.b16 %v557_v41, %v555_v60  ;;  %v330_v18 = vld [vmem:[%s2506_s22 + $0x100] sm:$0xff]  ;;  %s2279_s22 = sshra.s32 %s1635_s14, 4  ;;  %s2280_s22 = int_to_ptr.hbm [resolvable:$true] %s2279_s22 }
  0x75   : > { %v515_v28 = vshll.u32 %v480_v62, 16  ;;  %v513_v29 = vshrl.u32 %v480_v62, 16  ;;  %v483_v43 = vpack.c.b16 %v475_v26, %v474_v48  ;;  %v733_v41 = vpack.c.b16 %v2533_v24, %v2639_v6  ;;  %s2281_s9 = scalar_lea.hbm %s2280_s22, 1  ;;  %p2286_p0 = scmp.lt.s32.totalorder %s2280_s22, %s3083_s6 }
  0x76   : > { %v2863_v10 = vor.u32 %v427_v37, %v423_v34  ;;  %v732_v12 = vpack.c.b16 %v560_v3, %v558_v27  ;;  %v482_v37 = vpack.c.b16 %v473_v23, %v472_v47  ;;  %v735_v11 = vpack.c.b16 %v561_v51, %v559_v14  ;;  %p2282_p11 = scmp.ne.s32.totalorder %s2280_s22, %s2281_s9  ;;  %p2287_p1 = scmp.lt.s32.totalorder %s2285_s18, %s2281_s9 }
  0x77   : > { %1298 = vmatmul.bf16.gmra.mxu2 %v738_v35  ;;  %1356 = vmatmul.bf16.gmra.mxu0 %v1773_v9  ;;  %v517_v42 = vrot.slane %v515_v28, 1  ;;  %v536_v19 = vshll.u32 %v483_v43, 16  ;;  %v534_v33 = vshrl.u32 %v483_v43, 16  ;;  %v541_v20 = vunpack.c.h.b16 %v330_v18 }
  0x78   : > { %v565_v22 = vunpack.c.l.b16 %v2863_v10  ;;  %v529_v44 = vshll.u32 %v482_v37, 16  ;;  %v527_v52 = vshrl.u32 %v482_v37, 16  ;;  %v543_v62 = vunpack.c.l.b16 %v330_v18  ;;  %p2283_p12 = pnand %p2282_p11, %p2440_p5  ;;  %p2288_p2 = por %p2287_p1, %p2286_p0 }
  0x79   : > { %1375 = vmatmul.bf16.vlgmr.msrb.gmra.mxu1 %v723_v7  ;;  %1433 = vmatmul.bf16.vlgmr.msrb.gmra.mxu3 %v725_v49  ;;  %v522_v7 = vshll.u32 %v481_v0, 16  ;;  %v518_v31 = vor.u32 %v517_v42, %v513_v29  ;;  %v538_v47 = vrot.slane %v536_v19, 1  ;;  %v752_v53 = vpack.c.b16 %v541_v20, %v3090_v55 }
  0x7a   : > { %v747_v35 = vpack.c.b16 %v567_v58, %v565_v22  ;;  %v531_v32 = vrot.slane %v529_v44, 1  ;;  %v544_v0 = vunpack.c.l.b16 %v331_v8  ;;  %v742_v24 = vpack.c.b16 %v2628_v1, %v2536_v25  ;;  %p2284_p13 = pneg %p2283_p12 }
  0x7b   : > { %v524_v9 = vrot.slane %v522_v7, 1  ;;  %v562_v40 = vunpack.c.l.b16 %v518_v31  ;;  %v539_v48 = vor.u32 %v538_v47, %v534_v33  ;;  %v744_v56 = vpack.c.b16 %v565_v22, %v563_v61 }
  0x7c   : > { %v532_v5 = vor.u32 %v531_v32, %v527_v52  ;;  %v545_v27 = vpack.c.b16 %v544_v0, %v543_v62  ;;  %v751_v39 = vpack.c.b16 %v543_v62, %v2631_v2  ;;  %p2289_p3 = pnand %p2288_p2, %p2284_p13 }
  0x7d   : > { %v525_v34 = vor.u32 %v524_v9, %v520_v16  ;;  %v568_v54 = vunpack.c.l.b16 %v539_v48 }
  0x7e   : > { %v566_v45 = vunpack.c.l.b16 %v532_v5  ;;  %v549_v14 = vshll.u32 %v545_v27, 16  ;;  %v547_v3 = vshrl.u32 %v545_v27, 16 }
  0x7f   : > { %v564_v49 = vunpack.c.l.b16 %v525_v34 }
  0x80   : > { %v750_v60 = vpack.c.b16 %v568_v54, %v566_v45  ;;  %v551_v21 = vrot.slane %v549_v14, 1 }
  0x81   : > { %v741_v50 = vpack.c.b16 %v564_v49, %v562_v40 }
  0x87   : > { %1303 = vmatmul.bf16.gmra.mxu2 %v747_v35  ;;  %1361 = vmatmul.bf16.gmra.mxu0 %v1777_v13  ;;  %v552_v35 = vor.u32 %v551_v21, %v547_v3 }
  0x89   : > { %1380 = vmatmul.bf16.gmra.mxu1 %v732_v12  ;;  %1438 = vmatmul.bf16.gmra.mxu3 %v734_v17  ;;  %v569_v28 = vunpack.c.l.b16 %v552_v35 }
  0x8b   : > { %v753_v10 = vpack.c.b16 %v569_v28, %v567_v58 }
  0x97   : > { %1404 = vmatmul.bf16.vlgmr.msra.gmra.mxu2 %v724_v59  ;;  %1462 = vmatmul.bf16.vlgmr.msra.gmra.mxu0 %v726_v4 }
  0x99   : > { %1385 = vmatmul.bf16.gmra.mxu1 %v741_v50  ;;  %1443 = vmatmul.bf16.gmra.mxu3 %v743_v30 }
  0xa7   : > { %1409 = vmatmul.bf16.gmra.mxu2 %v733_v41  ;;  %1467 = vmatmul.bf16.gmra.mxu0 %v735_v11 }
  0xa9   : > { %1390 = vmatmul.bf16.gmra.mxu1 %v750_v60  ;;  %1448 = vmatmul.bf16.gmra.mxu3 %v752_v53 }
  0xb4   : > { %v1231_v38 = vpop.f32.mrf.mxu0 }
  0xb5   : > { %v1232_v51 = vadd.f32 %v2914_v57, %v1231_v38 }
  0xb6   : > { %v1260_v6 = vpop.f32.mrf.mxu1 }
  0xb7   : > { %1414 = vmatmul.bf16.gmra.mxu2 %v742_v24  ;;  %1472 = vmatmul.bf16.gmra.mxu0 %v744_v56  ;;  %v1261_v25 = vadd.f32 %v1260_v6, %v1232_v51  ;;  %v2184_v51 = vld [vmem:[%s3080_s3 + $0x38] sm:$0xff] }
  0xb8   : > { %1595 = vmatpush.bf16.msra.mxu1 %v2184_v51 }
  0xba   : > { %v1241_v1 = vpop.f32.mrf.mxu2 }
  0xbb   : > { %v1242_v2 = vadd.f32 %v2914_v57, %v1241_v1 }
  0xbc   : > { %v1233_v12 = vpop.f32.mrf.mxu0  ;;  %v1318_v7 = vpop.f32.mrf.mxu3 }
  0xbd   : > { %v1234_v56 = vadd.f32 %v2914_v57, %v1233_v12  ;;  %v2183_v12 = vld [vmem:[%s3080_s3 + $0x30] sm:$0xff] }
  0xbe   : > { %v1262_v63 = vpop.f32.mrf.mxu1  ;;  %1596 = vmatpush.bf16.msra.mxu1 %v2183_v12 }
  0xbf   : > { %v1263_v3 = vadd.f32 %v1262_v63, %v1234_v56 }
  0xc2   : > { %v2921_v13 = vpop.f32.mrf.mxu2 }
  0xc4   : > { %v1236_v22 = vpop.f32.mrf.mxu0  ;;  %v1320_v42 = vpop.f32.mrf.mxu3 }
  0xc5   : > { %v1237_v29 = vadd.f32 %v2914_v57, %v1236_v22 }
  0xc6   : > { %v1265_v61 = vpop.f32.mrf.mxu1 }
  0xc7   : > { %1419 = vmatmul.bf16.gmra.mxu2 %v751_v39  ;;  %1477 = vmatmul.bf16.gmra.mxu0 %v753_v10  ;;  %v1266_v16 = vadd.f32 %v1265_v61, %v1237_v29 }
  0xca   : > { %v2927_v9 = vpop.f32.mrf.mxu2 }
  0xcc   : > { %v1238_v36 = vpop.f32.mrf.mxu0  ;;  %v1323_v23 = vpop.f32.mrf.mxu3 }
  0xcd   : > { %v1239_v29 = vadd.f32 %v2914_v57, %v1238_v36 }
  0xce   : > { %v2929_v15 = vpop.f32.mrf.mxu1 }
  0xd2   : > { %v2931_v17 = vpop.f32.mrf.mxu2 }
  0xd4   : > { %v1347_v58 = vpop.f32.mrf.mxu0  ;;  %v2934_v37 = vpop.f32.mrf.mxu3 }
  0xd6   : > { %v1270_v26 = vpop.f32.mrf.mxu1 }
  0xd7   : > { %v1271_v46 = vadd.f32 %v1270_v26, %v1242_v2 }
  0xda   : > { %v1289_v31 = vpop.f32.mrf.mxu2 }
  0xdb   : > { %v1290_v34 = vadd.f32 %v1289_v31, %v1261_v25 }
  0xdc   : > { %v1349_v40 = vpop.f32.mrf.mxu0  ;;  %v1328_v44 = vpop.f32.mrf.mxu3 }
  0xdd   : > { %v1319_v43 = vadd.f32 %v1318_v7, %v1290_v34 }
  0xde   : > { %v2936_v19 = vpop.f32.mrf.mxu1 }
  0xdf   : > { %v1348_v49 = vadd.f32 %v1347_v58, %v1319_v43 }
  0xe2   : > { %v1291_v50 = vpop.f32.mrf.mxu2 }
  0xe3   : > { %v1292_v25 = vadd.f32 %v1291_v50, %v1263_v3 }
  0xe4   : > { %v1352_v59 = vpop.f32.mrf.mxu0  ;;  %v2940_v30 = vpop.f32.mrf.mxu3 }
  0xe5   : > { %v1321_v28 = vadd.f32 %v1320_v42, %v1292_v25  ;;  %v2182_v42 = vld [vmem:[%s3080_s3 + $0x28] sm:$0xff] }
  0xe6   : > { %v2942_v48 = vpop.f32.mrf.mxu1  ;;  %1597 = vmatpush.bf16.msra.mxu1 %v2182_v42 }
  0xe7   : > { %v1350_v22 = vadd.f32 %v1349_v40, %v1321_v28 }
  0xea   : > { %v1294_v4 = vpop.f32.mrf.mxu2 }
  0xeb   : > { %v1295_v52 = vadd.f32 %v1294_v4, %v1266_v16 }
  0xec   : > { %v2938_v33 = vpop.f32.mrf.mxu0  ;;  %v2944_v60 = vpop.f32.mrf.mxu3 }
  0xed   : > { %v1324_v32 = vadd.f32 %v1323_v23, %v1295_v52 }
  0xee   : > { %v2948_v20 = vpop.f32.mrf.mxu1 }
  0xef   : > { %v1353_v47 = vadd.f32 %v1352_v59, %v1324_v32 }
  0xf2   : > { %v1296_v5 = vpop.f32.mrf.mxu2 }
  0xf4   : > { %v1357_v45 = vpop.f32.mrf.mxu0  ;;  %v2954_v8 = vpop.f32.mrf.mxu3 }
  0xf6   : > { %v1376_v0 = vpop.f32.mrf.mxu1 }
  0xf7   : > { %v1377_v7 = vadd.f32 %v1376_v0, %v1348_v49 }
  0xfa   : > { %v1299_v54 = vpop.f32.mrf.mxu2 }
  0xfb   : > { %v1300_v41 = vadd.f32 %v1299_v54, %v1271_v46  ;;  %v1268_v46 = vadd.f32 %v2929_v15, %v1239_v29 }
  0xfc   : > { %v2946_v18 = vpop.f32.mrf.mxu0  ;;  %v1434_v6 = vpop.f32.mrf.mxu3 }
  0xfd   : > { %v1329_v11 = vadd.f32 %v1328_v44, %v1300_v41  ;;  %v1297_v40 = vadd.f32 %v1296_v5, %v1268_v46 }
  0xfe   : > { %v1378_v14 = vpop.f32.mrf.mxu1 }
  0xff   : > { %v2950_v55 = vadd.f32 %v1357_v45, %v1329_v11  ;;  %v1379_v63 = vadd.f32 %v1378_v14, %v1350_v22  ;;  %v1326_v15 = vadd.f32 %v2934_v37, %v1297_v40  ;;  %v1244_v37 = vadd.f32 %v2914_v57, %v2921_v13 }
 0x100   : > { %v1247_v13 = vadd.f32 %v2914_v57, %v2927_v9  ;;  %v2179_v9 = vld [vmem:[%s3080_s3 + $0x10] sm:$0xff] }
 0x101   : > { %v1355_v41 = vadd.f32 %v2938_v33, %v1326_v15  ;;  %v1273_v25 = vadd.f32 %v2936_v19, %v1244_v37 }
 0x102   : > { %v2952_v53 = vpop.f32.mrf.mxu2 }
 0x104   : > { %v2956_v62 = vpop.f32.mrf.mxu0  ;;  %v1436_v1 = vpop.f32.mrf.mxu3 }
 0x106   : > { %v1381_v39 = vpop.f32.mrf.mxu1 }
 0x107   : > { %v1382_v36 = vadd.f32 %v1381_v39, %v1353_v47  ;;  %v2181_v47 = vld [vmem:[%s3080_s3 + $0x20] sm:$0xff] }
 0x108   : > { %1598 = vmatpush.bf16.msra.mxu1 %v2181_v47  ;;  %v2361_v47 = vmov 64.0  }
 0x109   : > { %2263 = vrcp.f32 %v2361_v47 }
 0x10a   : > { %v2958_v27 = vpop.f32.mrf.mxu2 }
 0x10c   : > { %v2960_v24 = vpop.f32.mrf.mxu0  ;;  %v1439_v2 = vpop.f32.mrf.mxu3 }
 0x10e   : > { %v1383_v43 = vpop.f32.mrf.mxu1 }
 0x112   : > { %v2963_v38 = vpop.f32.mrf.mxu2 }
 0x114   : > { %v1463_v21 = vpop.f32.mrf.mxu0  ;;  %v1441_v45 = vpop.f32.mrf.mxu3 }
 0x116   : > { %v1386_v0 = vpop.f32.mrf.mxu1 }
 0x117   : > { %v1387_v39 = vadd.f32 %v1386_v0, %v2950_v55 }
 0x11a   : > { %v1405_v35 = vpop.f32.mrf.mxu2 }
 0x11b   : > { %v1406_v61 = vadd.f32 %v1405_v35, %v1377_v7  ;;  %v1302_v35 = vadd.f32 %v2952_v53, %v1273_v25 }
 0x11c   : > { %v1465_v10 = vpop.f32.mrf.mxu0  ;;  %v1444_v33 = vpop.f32.mrf.mxu3 }
 0x11d   : > { %v1435_v16 = vadd.f32 %v1434_v6, %v1406_v61  ;;  %v1384_v6 = vadd.f32 %v1383_v43, %v1355_v41  ;;  %v1331_v22 = vadd.f32 %v2940_v30, %v1302_v35 }
 0x11f   : > { %v1464_v58 = vadd.f32 %v1463_v21, %v1435_v16  ;;  %v2180_v21 = vld [vmem:[%s3080_s3 + $0x18] sm:$0xff]  ;;  %v1276_v16 = vadd.f32 %v2942_v48, %v1247_v13  ;;  %v1249_v48 = vadd.f32 %v2914_v57, %v2931_v17 }
 0x120   : > { %1599 = vmatpush.bf16.msra.mxu1 %v2180_v21 }
 0x121   : > { %v1483_v50 = vmax.f32 %v1464_v58, 0.0  ;;  %v1305_v53 = vadd.f32 %v2958_v27, %v1276_v16  ;;  %v1278_v40 = vadd.f32 %v2948_v20, %v1249_v48 }
 0x122   : > { %v1407_v23 = vpop.f32.mrf.mxu2 }
 0x123   : > { %v1408_v26 = vadd.f32 %v1407_v23, %v1379_v63  ;;  %v1307_v57 = vadd.f32 %v2963_v38, %v1278_v40 }
 0x124   : > { %v1468_v34 = vpop.f32.mrf.mxu0  ;;  %1600 = vmatpush.bf16.msra.mxu1 %v2179_v9 }
 0x125   : > { %v1437_v31 = vadd.f32 %v1436_v1, %v1408_v26  ;;  %v1446_v26 = vpop.f32.mrf.mxu3 }
 0x127   : > { %v1466_v49 = vadd.f32 %v1465_v10, %v1437_v31  ;;  %v1388_v10 = vpop.f32.mrf.mxu1  ;;  %v1334_v31 = vadd.f32 %v2944_v60, %v1305_v53 }
 0x129   : > { %v1484_v59 = vmax.f32 %v1466_v49, 0.0  ;;  %v1363_v17 = vadd.f32 %v2956_v62, %v1334_v31 }
 0x12a   : > { %v1410_v44 = vpop.f32.mrf.mxu2 }
 0x12b   : > { %v2188_v4 = vpack.c.bf16 %v1484_v59, %v1483_v50  ;;  %v1507_v52 = vadd.f32 %v1484_v59, %v1483_v50  ;;  %v1411_v32 = vadd.f32 %v1410_v44, %v1382_v36  ;;  %v2177_v36 = vld [vmem:[%s3080_s3] sm:$0xff] }
 0x12c   : > { %v1470_v54 = vpop.f32.mrf.mxu0 }
 0x12d   : > { %2189 = vst [vmem:[%s2980_s8] sm:$0xff] %v2188_v4   ;;  %v1440_v5 = vadd.f32 %v1439_v2, %v1411_v32  ;;  %v1360_v2 = vadd.f32 %v2946_v18, %v1331_v22  ;;  %v2178_v18 = vld [vmem:[%s3080_s3 + $0x8] sm:$0xff]  ;;  %v1449_v44 = vpop.f32.mrf.mxu3  ;;  %v1336_v4 = vadd.f32 %v2954_v8, %v1307_v57 }
 0x12e   : > { %1601 = vmatpush.bf16.msra.mxu1 %v2178_v18 }
 0x12f   : > { %v1469_v11 = vadd.f32 %v1468_v34, %v1440_v5  ;;  %v1389_v42 = vadd.f32 %v1388_v10, %v1360_v2  ;;  %v1391_v43 = vpop.f32.mrf.mxu1  ;;  %v1365_v38 = vadd.f32 %v2960_v24, %v1336_v4 }
 0x130   : > { %v1392_v50 = vadd.f32 %v1391_v43, %v1363_v17 }
 0x131   : > { %v1485_v56 = vmax.f32 %v1469_v11, 0.0 }
 0x132   : > { %v1412_v14 = vpop.f32.mrf.mxu2  ;;  %1602 = vmatpush.bf16.msra.mxu1 %v2177_v36 }
 0x133   : > { %v1508_v51 = vadd.f32 %v1507_v52, %v1485_v56  ;;  %v1413_v3 = vadd.f32 %v1412_v14, %v1384_v6  ;;  %v2264_v6 = vpop.eup %2263 }
 0x134   : > { %v1473_v7 = vpop.f32.mrf.mxu0  ;;  %vm1525_vm0 = vweird.f32 %v2264_v6 }
 0x135   : > { %v1442_v1 = vadd.f32 %v1441_v45, %v1413_v3  ;;  %v1451_v8 = vpop.f32.mrf.mxu3  ;;  %v1521_v3 = vmul.f32 64.0, %v2264_v6 }
 0x137   : > { %v1471_v28 = vadd.f32 %v1470_v54, %v1442_v1  ;;  %v1393_v54 = vpop.f32.mrf.mxu1  ;;  %v1522_v1 = vsub.f32 1.0, %v1521_v3 }
 0x138   : > { %v1394_v41 = vadd.f32 %v1393_v54, %v1365_v38 }
 0x139   : > { %v1486_v61 = vmax.f32 %v1471_v28, 0.0  ;;  %v1523_v28 = vmul.f32 %v2264_v6, %v1522_v1 }
 0x13a   : > { %v1415_v12 = vpop.f32.mrf.mxu2 }
 0x13b   : > { %v2193_v29 = vpack.c.bf16 %v1486_v61, %v1485_v56  ;;  %v1509_v19 = vadd.f32 %v1508_v51, %v1486_v61  ;;  %v1416_v63 = vadd.f32 %v1415_v12, %v1387_v39  ;;  %v1524_v61 = vadd.f32 %v2264_v6, %v1523_v28 }
 0x13c   : > { %v1475_v30 = vpop.f32.mrf.mxu0 }
 0x13d   : > { %2205 = vst [vmem:[%s2980_s8 + $0x8] sm:$0xff] %v2193_v29   ;;  %v1445_v23 = vadd.f32 %v1444_v33, %v1416_v63  ;;  %v1526_v12 = vsel %vm1525_vm0, %v2264_v6, %v1524_v61 }
 0x13f   : > { %v1474_v55 = vadd.f32 %v1473_v7, %v1445_v23 }
 0x141   : > { %v1487_v46 = vmax.f32 %v1474_v55, 0.0 }
 0x142   : > { %v1417_v58 = vpop.f32.mrf.mxu2 }
 0x143   : > { %v1510_v34 = vadd.f32 %v1509_v19, %v1487_v46  ;;  %v1418_v27 = vadd.f32 %v1417_v58, %v1389_v42 }
 0x144   : > { %v1478_v45 = vpop.f32.mrf.mxu0 }
 0x145   : > { %v1447_v49 = vadd.f32 %v1446_v26, %v1418_v27 }
 0x147   : > { %v1476_v60 = vadd.f32 %v1475_v30, %v1447_v49 }
 0x149   : > { %v1488_v59 = vmax.f32 %v1476_v60, 0.0 }
 0x14a   : > { %v1420_v15 = vpop.f32.mrf.mxu2 }
 0x14b   : > { %v2198_v20 = vpack.c.bf16 %v1488_v59, %v1487_v46  ;;  %v1511_v52 = vadd.f32 %v1510_v34, %v1488_v59  ;;  %v1421_v32 = vadd.f32 %v1420_v15, %v1392_v50 }
 0x14c   : > { %v1480_v51 = vpop.f32.mrf.mxu0 }
 0x14d   : > { %2206 = vst [vmem:[%s2980_s8 + $0x10] sm:$0xff] %v2198_v20   ;;  %v1450_v5 = vadd.f32 %v1449_v44, %v1421_v32 }
 0x14f   : > { %v1479_v62 = vadd.f32 %v1478_v45, %v1450_v5 }
 0x151   : > { %v1489_v11 = vmax.f32 %v1479_v62, 0.0 }
 0x152   : > { %v1422_v0 = vpop.f32.mrf.mxu2 }
 0x153   : > { %v1512_v56 = vadd.f32 %v1511_v52, %v1489_v11  ;;  %v1423_v14 = vadd.f32 %v1422_v0, %v1394_v41 }
 0x155   : > { %v1452_v37 = vadd.f32 %v1451_v8, %v1423_v14 }
 0x157   : > { %v1481_v21 = vadd.f32 %v1480_v51, %v1452_v37 }
 0x159   : > { %v1490_v25 = vmax.f32 %v1481_v21, 0.0 }
 0x15b   : > { %v2203_v33 = vpack.c.bf16 %v1490_v25, %v1489_v11  ;;  %v1513_v35 = vadd.f32 %v1512_v56, %v1490_v25 }
 0x15d   : > { %2207 = vst [vmem:[%s2980_s8 + $0x18] sm:$0xff] %v2203_v33   ;;  %v1514_v24 = vrot.slane %v1513_v35, 4 }
 0x15f   : > { %v1515_v7 = vadd.f32 %v1514_v24, %v1513_v35 }
 0x161   : > { %v1516_v39 = vrot.slane %v1515_v7, 2 }
 0x163   : > { %v1517_v13 = vadd.f32 %v1516_v39, %v1515_v7 }
 0x165   : > { %v1518_v10 = vrot.slane %v1517_v13, 1 }
 0x167   : > { %v1519_v22 = vadd.f32 %v1518_v10, %v1517_v13 }
 0x169   : > { %v1527_v29 = vmul.f32 %v1526_v12, %v1519_v22 }
 0x16b   : > { %v1529_v19 = vpack.c.bf16 %v1527_v29, %v1527_v29  ;;  %1528 = vst [vmem:[%s281_s23] sm:$0x1] %v1527_v29 }
 0x16d   : > { %1603 = vmatmul.bf16.vlgmr.msra.gmra.mxu1 %v1529_v19 }
 0x16e   : > { %2292 = shalt.err (!%p2289_p3)
}
 0x16f   : > { %2217 = dma.vmem_to_hbm [thread:$0]  (%p2440_p5), %s1633_s13, 16, %s1635_s14, %s1615_s15   ;;  %v1546_v63 = vld [vmem:[%s3081_s4] sm:$0x1] }
 0x170   : > { %s1643_s8 = scalar_lea.hbm %s3084_s7, %s2423_s28  ;;  %s287_s0 = scalar_lea.vmem [#allocation4], %s3023_s21 }
 0x171   : > { %s1645_s22 = sshll.u32 %s287_s0, 4  ;;  %s1647_s9 = sshll.u32 %s1643_s8, 4  ;;  %s1646_s22 = int_to_ptr.vmem [resolvable:$true] %s1645_s22  ;;  %s1648_s9 = int_to_ptr.hbm [resolvable:$true] %s1647_s9 }
 0x172   : > { %s1619_s17 = scalar_lea.sflag [#allocation5], %s3023_s21  ;;  %s2307_s18 = sshra.s32 %s1648_s9, 4  ;;  %s2308_s18 = int_to_ptr.hbm [resolvable:$true] %s2307_s18 }
 0x173   : > { %s2309_s13 = scalar_lea.hbm %s2308_s18, 1  ;;  %s2313_s15 = scalar_lea.hbm %s3084_s7, 2 }
 0x174   : > { %p2310_p4 = scmp.ne.s32.totalorder %s2308_s18, %s2309_s13  ;;  %p2314_p9 = scmp.lt.s32.totalorder %s2308_s18, %s3084_s7 }
 0x175   : > { %p2315_p10 = scmp.lt.s32.totalorder %s2313_s15, %s2309_s13 }
 0x176   : > { %p2311_p7 = pnand %p2310_p4, %p2440_p5 }
 0x177   : > { %p2316_p11 = por %p2315_p10, %p2314_p9 }
 0x178   : > { %p2312_p8 = pneg %p2311_p7 }
 0x17a   : > { %p2317_p12 = pnand %p2316_p11, %p2312_p8 }
 0x1ea   : > { %v1604_v16 = vpop.f32.mrf.mxu1 }
 0x1eb   : > { %v1605_v23 = vadd.f32 %v1604_v16, %v1546_v63 }
 0x1ed   : > { %1608 = vst [vmem:[%s287_s0] sm:$0x1] %v1605_v23 }
 0x1ee   : > { %2320 = shalt.err (!%p2317_p12)
}
 0x1ef   : > { %2218 = dma.vmem_to_hbm [thread:$0]  (%p2440_p5), %s1646_s22, 16, %s1648_s9, %s1619_s17  }
 0x1f2   : > { %v1606_v53 = vpop.f32.mrf.mxu1 }
 0x1f3 PF: > { %p2228_p13 = scmp.ge.s32.totalorder %s2359_s27, 2  ;;  %s1667_s21 = sand.u32 1, %s2347_s24  }
 0x1f4   : > { %s1668_s29 = scalar_lea.sflag [#allocation3], %s1667_s21 }
 0x1f5   : > { %p2222_p0 = pnand %p2228_p13, %p2444_p6 }
 0x1f7   : > { %p2223_p1 = pneg %p2222_p0 }
 0x1f9   : > { %2338 = dma.done.wait (%p2223_p1), %s1668_s29, 16  }
 0x1fa   : > { %2340 = vsyncadd (%p2223_p1), %s1668_s29, 4294967280  ;;  %s1677_s8 = scalar_lea.sflag [#allocation5], %s1667_s21 }
 0x1fb   : > { %2342 = dma.done.wait (%p2223_p1), %s1677_s8, 16  }
 0x1fc   : > { %2344 = vsyncadd (%p2223_p1), %s1677_s8, 4294967280  ;;  %p21_p5 = scmp.ge.s32.totalorder %s2427_s30, 4   ;;  %s3091_s24 = smov %s2351_s25 }
 0x1fd   : > { %s3092_s25 = smov %s2355_s26  ;;  %s3093_s26 = smov %s2438_s10 }
 0x1fe   : > { %s3094_s27 = smov %s2427_s30  ;;  %23 = sbr.rel (!%p21_p5) target bundleno = 7 (0x7), region = 104 }
 0x203   :  { %1682 = vsyncpa [#allocation3], 1 }
 0x204   :  { %1684 = vsyncpa [#allocation3 + $0x1], 1 }
 0x205   :  { %1685 = vsyncpa [#allocation5], 1 }
 0x206   :  { %1687 = vsyncpa [#allocation5 + $0x1], 1 }

// kernel: stage1.5
= control target key start
LH: loop header
LB: loop body
LE: loop exit
PB: predicated region body
PF: predicated region fallthrough
CT: control target
= control target key end

     0   :  { %s5237_s30 = smov 0   ;;  %s6618_s0 = inlined_call_operand.vmem [shape: bf16[2,8,8,128], index: 0, kind: input, shape index: {}]   ;;  %s6619_s1 = inlined_call_operand.vmem [shape: bf16[1152,128], index: 1, kind: input, shape index: {}]   ;;  %s6620_s2 = inlined_call_operand.vmem [shape: f32[1,128], index: 2, kind: input, shape index: {}]   ;;  %s6621_s3 = inlined_call_operand.vmem [shape: bf16[1152,128], index: 3, kind: input, shape index: {}]   ;;  %s6622_s4 = inlined_call_operand.vmem [shape: f32[1,128], index: 4, kind: input, shape index: {}]   ;;  %s6623_s5 = inlined_call_operand.vmem [shape: bf16[1152,128], index: 5, kind: input, shape index: {}]   ;;  %s6624_s6 = inlined_call_operand.vmem [shape: f32[1,128], index: 6, kind: input, shape index: {}]   ;;  %s6625_s7 = inlined_call_operand.vmem [shape: f32[3,128], index: 7, kind: input, shape index: {}]   ;;  %s6626_s8 = inlined_call_operand.vmem [shape: f32[2,1,80], index: 8, kind: output, shape index: {0}]   ;;  %s6627_s9 = inlined_call_operand.vmem [shape: f32[2,1,4], index: 9, kind: output, shape index: {1}]  }
   0x1 LB: > { %s4053_s10 = sadd.s32 4294967295, %s5184_s30   ;;  %p4057_p0 = scmp.ge.s32.totalorder %s5184_s30, 1  ;;  %s5184_s30 = sphi %s5237_s30, %s20_s30  }
   0x2   : > { %p290_p1 = scmp.lt.s32.totalorder %s5184_s30, 3 }
   0x4   : > { %p291_p2 = pnand %p4057_p0, %p290_p1 }
   0x6   : > { %294 = sbr.rel (%p291_p2) target bundleno = 924 (0x39c), region = 52 }
   0xb   : > { %v4934_v0 = vld [vmem:[%s6619_s1 + $0x38] sm:$0xff]  ;;  %p327_p3 = scmp.lt.s32.totalorder %s4053_s10, 1  ;;  %v4933_v4 = vld [vmem:[%s6619_s1 + $0x30] sm:$0xff]  ;;  %v5186_v8 = vmov 0   ;;  %v4932_v9 = vld [vmem:[%s6619_s1 + $0x28] sm:$0xff]  ;;  %vm436_vm0 = vcmask 1040384  }
   0xc   : > { %v4950_v1 = vld [vmem:[%s6619_s1 + $0xb8] sm:$0xff]  ;;  %1200 = vmatpush.bf16.msra.mxu0 %v4934_v0  ;;  %v4949_v5 = vld [vmem:[%s6619_s1 + $0xb0] sm:$0xff]  ;;  %5171 = vset.pattern.permute.xlu2 %v5186_v8  ;;  %v4948_v10 = vld [vmem:[%s6619_s1 + $0xa8] sm:$0xff]  ;;  %vm437_vm1 = vsmask.f32 256  ;;  %v1628_v13 = vrot.slane %v5186_v8, 2 }
   0xd   : > { %v4942_v2 = vld [vmem:[%s6619_s1 + $0x78] sm:$0xff]  ;;  %1258 = vmatpush.bf16.msra.mxu2 %v4950_v1  ;;  %s6641_s10 = smov (!%p327_p3, %s4053_s10), 1  ;;  %v4941_v6 = vld [vmem:[%s6619_s1 + $0x70] sm:$0xff]  ;;  %5172 = vset.pattern.permute.xlu0 %v5186_v8  ;;  %v4940_v11 = vld [vmem:[%s6619_s1 + $0x68] sm:$0xff]  ;;  %v5294_v14 = vrot.slane %v5186_v8, 3  ;;  %v5297_v15 = vrot.slane %v5186_v8, 1 }
   0xe   : > { %v4958_v3 = vld [vmem:[%s6619_s1 + $0xf8] sm:$0xff]  ;;  %1229 = vmatpush.bf16.msra.mxu1 %v4942_v2  ;;  %v4957_v7 = vld [vmem:[%s6619_s1 + $0xf0] sm:$0xff]  ;;  %s4926_s27 = sshll.u32 %s6641_s10, 5  ;;  %5173 = vset.pattern.permute.xlu1 %v5186_v8  ;;  %v4956_v12 = vld [vmem:[%s6619_s1 + $0xe8] sm:$0xff]  ;;  %vm1657_vm2 = vcmask 1041408   ;;  %vm447_vm6 = vcmask 1044480   ;;  %s337_s24 = scalar_lea.vmem %s6627_s9, %s6641_s10 }
   0xf   : > { %1287 = vmatpush.bf16.msra.mxu3 %v4958_v3  ;;  %s5290_s19 = scalar_lea.vmem %s6618_s0, %s4926_s27  ;;  %v4931_v16 = vld [vmem:[%s6619_s1 + $0x20] sm:$0xff]  ;;  %vm1658_vm3 = vsmask.f32 1280  ;;  %vm5314_vm4 = vmand %vm436_vm0, %vm437_vm1  ;;  %v4930_v31 = vld [vmem:[%s6619_s1 + $0x18] sm:$0xff]  ;;  %vm448_vm7 = vsmask.f32 4352  ;;  %v5402_v3 = vunpack.c.l.b16 %v5186_v8  ;;  %s334_s27 = scalar_lea.vmem %s6626_s8, %s6641_s10 }
  0x10   : > { %1201 = vmatpush.bf16.msra.mxu0 %v4933_v4  ;;  %v4947_v17 = vld [vmem:[%s6619_s1 + $0xa0] sm:$0xff]  ;;  %v5321_v24 = vsel %vm5314_vm4, 0, %v5297_v15  ;;  %v5326_v25 = vsel %vm5314_vm4, %v5297_v15, %v1628_v13  ;;  %v5159_v26 = vld [vmem:[%s5290_s19 + $0x8] sm:$0xff]   ;;  %vm5333_vm5 = vmand %vm1657_vm2, %vm1658_vm3  ;;  %vm1975_vm9 = vcmask 1045508   ;;  %vm1979_vm10 = vcmask 1043456  }
  0x11   : > { %1259 = vmatpush.bf16.msra.mxu2 %v4949_v5  ;;  %v5144_v18 = vld [vmem:[%s5290_s19] sm:$0xff]   ;;  %6631 = vst [vmem:[#allocation2_spill] sm:$0xff] %v5326_v25  ;;  %v1643_v28 = vsel %vm436_vm0, %v5321_v24, %v5297_v15  ;;  %v5339_v30 = vsel %vm436_vm0, %v5326_v25, %v1628_v13  ;;  %v4946_v32 = vld [vmem:[%s6619_s1 + $0x98] sm:$0xff]  ;;  %v5149_v42 = vunpack.c.l.b16 %v5159_v26  ;;  %v5362_v43 = vld [vmem:[%s5290_s19 + $0x10] sm:$0xff]   ;;  %v5150_v45 = vunpack.c.h.b16 %v5159_v26 }
  0x12   : > { %1230 = vmatpush.bf16.msra.mxu1 %v4941_v6  ;;  %v4939_v19 = vld [vmem:[%s6619_s1 + $0x60] sm:$0xff]  ;;  %v5145_v21 = vunpack.c.l.b16 %v5144_v18  ;;  %v5146_v23 = vunpack.c.h.b16 %v5144_v18  ;;  %v5349_v33 = vsel %vm5333_vm5, %v1643_v28, %v1628_v13  ;;  %v4938_v36 = vld [vmem:[%s6619_s1 + $0x58] sm:$0xff]  ;;  %v4929_v46 = vld [vmem:[%s6619_s1 + $0x10] sm:$0xff]  ;;  %v5153_v54 = vunpack.c.l.b16 %v5362_v43 }
  0x13   : > { %1288 = vmatpush.bf16.msra.mxu3 %v4957_v7  ;;  %v4955_v20 = vld [vmem:[%s6619_s1 + $0xe0] sm:$0xff]  ;;  %v4954_v37 = vld [vmem:[%s6619_s1 + $0xd8] sm:$0xff]  ;;  %v4945_v47 = vld [vmem:[%s6619_s1 + $0x90] sm:$0xff]  ;;  %v366_v49 = vpack.c.b16 %v5149_v42, %v5149_v42  ;;  %v367_v58 = vpack.c.b16 %v5150_v45, %v5150_v45  ;;  %v5409_v13 = vunpack.c.l.b16 %v5297_v15  ;;  %vm2795_vm11 = vcmask 1043458  }
  0x14   : > { %1202 = vmatpush.bf16.msra.mxu0 %v4932_v9  ;;  %v364_v27 = vpack.c.b16 %v5145_v21, %v5145_v21  ;;  %v365_v35 = vpack.c.b16 %v5146_v23, %v5146_v23  ;;  %v4937_v50 = vld [vmem:[%s6619_s1 + $0x50] sm:$0xff]  ;;  %vm5378_vm8 = vmand %vm447_vm6, %vm448_vm7  ;;  %v4928_v60 = vld [vmem:[%s6619_s1 + $0x8] sm:$0xff]  ;;  %vm2848_vm12 = vcmask 1042432   ;;  %vm2849_vm13 = vsmask.f32 2304 }
  0x15   : > { %1260 = vmatpush.bf16.msra.mxu2 %v4948_v10  ;;  %v4953_v51 = vld [vmem:[%s6619_s1 + $0xd0] sm:$0xff]  ;;  %v387_v56 = vshrl.u32 %v366_v49, 16  ;;  %v390_v57 = vshll.u32 %v366_v49, 16  ;;  %v4944_v61 = vld [vmem:[%s6619_s1 + $0x88] sm:$0xff]  ;;  %v394_v10 = vshrl.u32 %v367_v58, 16  ;;  %v4927_v8 = vld [vmem:[%s6619_s1] sm:$0xff] }
  0x16   : > { %1231 = vmatpush.bf16.msra.mxu1 %v4940_v11  ;;  %v373_v38 = vshrl.u32 %v364_v27, 16  ;;  %v376_v39 = vshll.u32 %v364_v27, 16  ;;  %v380_v40 = vshrl.u32 %v365_v35, 16  ;;  %v383_v41 = vshll.u32 %v365_v35, 16  ;;  %v4936_v1 = vld [vmem:[%s6619_s1 + $0x48] sm:$0xff]  ;;  %v4943_v18 = vld [vmem:[%s6619_s1 + $0x80] sm:$0xff]  ;;  %vm6335_vm14 = vmand %vm2848_vm12, %vm2849_vm13 }
  0x17   : > { %1289 = vmatpush.bf16.msra.mxu3 %v4956_v12  ;;  %v389_v0 = vrot.slane %v387_v56, 7  ;;  %v4952_v2 = vld [vmem:[%s6619_s1 + $0xc8] sm:$0xff]  ;;  %v368_v11 = vpack.c.b16 %v5153_v54, %v5153_v54  ;;  %v4935_v15 = vld [vmem:[%s6619_s1 + $0x40] sm:$0xff]  ;;  %v4966_v27 = vld [vmem:[%s6619_s1 + $0x138] sm:$0xff]  ;;  %v396_v28 = vrot.slane %v394_v10, 7  ;;  %vm2948_vm15 = vcmask 1042434  }
  0x18   : > { %1203 = vmatpush.bf16.msra.mxu0 %v4931_v16  ;;  %v375_v44 = vrot.slane %v373_v38, 7  ;;  %v382_v48 = vrot.slane %v380_v40, 7  ;;  %v4951_v21 = vld [vmem:[%s6619_s1 + $0xc0] sm:$0xff]  ;;  %v4965_v42 = vld [vmem:[%s6619_s1 + $0x130] sm:$0xff]  ;;  %v4974_v54 = vld [vmem:[%s6619_s1 + $0x178] sm:$0xff]  ;;  %vm2953_vm1 = vcmask 1044484  }
  0x19   : > { %1261 = vmatpush.bf16.msra.mxu2 %v4947_v17  ;;  %v392_v9 = vor.u32 %v390_v57, %v389_v0  ;;  %v5464_v56 = vld [vmem:[%s5290_s19 + $0x18] sm:$0xff]   ;;  %v4964_v57 = vld [vmem:[%s6619_s1 + $0x128] sm:$0xff]  ;;  %v4989_v0 = vld [vmem:[%s6619_s1 + $0x1f0] sm:$0xff]  ;;  %vm2957_vm3 = vcmask 1046534   ;;  %vm3898_vm6 = vcmask 326912   ;;  %vm3902_vm7 = vcmask 392512  }
  0x1a   : > { %1232 = vmatpush.bf16.msra.mxu1 %v4939_v19  ;;  %v378_v52 = vor.u32 %v376_v39, %v375_v44  ;;  %v385_v55 = vor.u32 %v383_v41, %v382_v48  ;;  %v5154_v48 = vunpack.c.h.b16 %v5362_v43  ;;  %v4981_v43 = vld [vmem:[%s6619_s1 + $0x1b0] sm:$0xff]  ;;  %v5062_v53 = vld [vmem:[%s6621_s3 + $0x1f8] sm:$0xff]  ;;  %v5059_v29 = vld [vmem:[%s6621_s3 + $0x1e0] sm:$0xff]  ;;  %vm3974_vm12 = vcmask 647168  }
  0x1b   : > { %1290 = vmatpush.bf16.msra.mxu3 %v4955_v20  ;;  %v441_v20 = vsel %vm5314_vm4, 0, %v392_v9  ;;  %v4963_v9 = vld [vmem:[%s6619_s1 + $0x120] sm:$0xff]  ;;  %v5129_v22 = vld [vmem:[%s6623_s5 + $0x1d0] sm:$0xff] }
  0x1c   : > { %1204 = vmatpush.bf16.msra.mxu0 %v4930_v31  ;;  %v439_v59 = vsel %vm5314_vm4, 0, %v378_v52  ;;  %v440_v63 = vsel %vm5314_vm4, 0, %v385_v55  ;;  %v5432_v26 = vsel %vm5378_vm8, %v441_v20, 0  ;;  %v397_v31 = vshll.u32 %v367_v58, 16  ;;  %v4990_v55 = vld [vmem:[%s6619_s1 + $0x1f8] sm:$0xff] }
  0x1d   : > { %1262 = vmatpush.bf16.msra.mxu2 %v4946_v32  ;;  %v450_v62 = vsel %vm5378_vm8, %v439_v59, 0  ;;  %v5406_v7 = vsel %vm5378_vm8, %v440_v63, 0  ;;  %v401_v32 = vshrl.u32 %v368_v11, 16  ;;  %v482_v40 = vshll.u32 %v5432_v26, 16 }
  0x1e   : > { %1233 = vmatpush.bf16.msra.mxu1 %v4938_v36  ;;  %v523_v4 = vrot.slane %v450_v62, 1  ;;  %v466_v5 = vshrl.u32 %v450_v62, 16  ;;  %v468_v6 = vshll.u32 %v450_v62, 16  ;;  %v542_v12 = vunpack.c.l.b16 %v450_v62 }
  0x1f   : > { %1291 = vmatpush.bf16.msra.mxu3 %v4954_v37  ;;  %v545_v19 = vunpack.c.l.b16 %v5406_v7  ;;  %v475_v39 = vshll.u32 %v5406_v7, 16  ;;  %v399_v44 = vor.u32 %v397_v31, %v396_v28  ;;  %v403_v45 = vrot.slane %v401_v32, 7  ;;  %v4962_v32 = vld [vmem:[%s6619_s1 + $0x118] sm:$0xff] }
  0x20   : > { %1205 = vmatpush.bf16.msra.mxu0 %v4929_v46  ;;  %v5411_v16 = vunpack.c.l.b16 %v523_v4  ;;  %v470_v17 = vrot.slane %v468_v6, 1  ;;  %v714_v35 = vpack.c.b16 %v542_v12, %v5402_v3  ;;  %v404_v46 = vshll.u32 %v368_v11, 16  ;;  %v4980_v6 = vld [vmem:[%s6619_s1 + $0x1a8] sm:$0xff] }
  0x21   : > { %1263 = vmatpush.bf16.msra.mxu2 %v4945_v47  ;;  %v717_v38 = vpack.c.b16 %v545_v19, %v542_v12  ;;  %v4982_v47 = vld [vmem:[%s6619_s1 + $0x1b8] sm:$0xff]  ;;  %v473_v49 = vshrl.u32 %v5406_v7, 16  ;;  %v484_v52 = vrot.slane %v482_v40, 1  ;;  %v442_v58 = vsel %vm5314_vm4, 0, %v399_v44  ;;  %v4972_v12 = vld [vmem:[%s6619_s1 + $0x168] sm:$0xff] }
  0x22   : > { %1234 = vmatpush.bf16.msra.mxu1 %v4937_v50  ;;  %v5428_v23 = vor.u32 %v470_v17, %v466_v5  ;;  %v716_v36 = vpack.c.b16 %v5411_v16, %v5409_v13  ;;  %v477_v50 = vrot.slane %v475_v39, 1  ;;  %v406_v59 = vor.u32 %v404_v46, %v403_v45 }
  0x23   : > { %1292 = vmatpush.bf16.msra.mxu3 %v4953_v51  ;;  %v480_v51 = vshrl.u32 %v5432_v26, 16  ;;  %v524_v62 = vrot.slane %v5406_v7, 1  ;;  %v525_v63 = vrot.slane %v5432_v26, 1  ;;  %v5489_v5 = vsel %vm5378_vm8, %v442_v58, 0  ;;  %v4977_v58 = vld [vmem:[%s6619_s1 + $0x190] sm:$0xff] }
  0x24   : > { %1206 = vmatpush.bf16.msra.mxu0 %v4928_v60  ;;  %v543_v37 = vunpack.c.l.b16 %v5428_v23  ;;  %v369_v60 = vpack.c.b16 %v5154_v48, %v5154_v48  ;;  %v443_v10 = vsel %vm5314_vm4, 0, %v406_v59  ;;  %v551_v28 = vunpack.c.l.b16 %v5489_v5  ;;  %v4993_v23 = vld [vmem:[%s6619_s1 + $0x210] sm:$0xff] }
  0x25   : > { %1264 = vmatpush.bf16.msra.mxu2 %v4944_v61  ;;  %v4973_v61 = vld [vmem:[%s6619_s1 + $0x170] sm:$0xff]  ;;  %v5485_v4 = vor.u32 %v484_v52, %v480_v51  ;;  %v5505_v20 = vunpack.c.l.b16 %v525_v63  ;;  %v5515_v31 = vsel %vm5378_vm8, %v443_v10, 0  ;;  %v489_v45 = vshll.u32 %v5489_v5, 16 }
  0x26   : > { %1235 = vmatpush.bf16.msra.mxu1 %v4936_v1  ;;  %v715_v41 = vpack.c.b16 %v543_v37, %v5409_v13  ;;  %v5157_v1 = vunpack.c.l.b16 %v5464_v56  ;;  %v408_v11 = vshrl.u32 %v369_v60, 16  ;;  %v496_v7 = vshll.u32 %v5515_v31, 16  ;;  %v4969_v63 = vld [vmem:[%s6619_s1 + $0x150] sm:$0xff] }
  0x27   : > { %1293 = vmatpush.bf16.msra.mxu3 %v4952_v2  ;;  %v5483_v2 = vor.u32 %v477_v50, %v473_v49  ;;  %v4978_v50 = vld [vmem:[%s6619_s1 + $0x198] sm:$0xff]  ;;  %v5158_v51 = vunpack.c.h.b16 %v5464_v56  ;;  %v487_v52 = vshrl.u32 %v5489_v5, 16 }
  0x28   : > { %1207 = vmatpush.bf16.msra.mxu0 %v4927_v8  ;;  %v370_v17 = vpack.c.b16 %v5157_v1, %v5157_v1  ;;  %v548_v8 = vunpack.c.l.b16 %v5432_v26  ;;  %v4979_v26 = vld [vmem:[%s6619_s1 + $0x1a0] sm:$0xff]  ;;  %v4986_v56 = vld [vmem:[%s6619_s1 + $0x1d8] sm:$0xff]  ;;  %v527_v1 = vrot.slane %v5515_v31, 1 }
  0x29   : > { %1265 = vmatpush.bf16.msra.mxu2 %v4943_v18  ;;  %v5503_v18 = vunpack.c.l.b16 %v524_v62  ;;  %v371_v62 = vpack.c.b16 %v5158_v51, %v5158_v51 }
  0x2a   : > { %1236 = vmatpush.bf16.msra.mxu1 %v4935_v15  ;;  %v4988_v15 = vld [vmem:[%s6619_s1 + $0x1e8] sm:$0xff]  ;;  %v415_v39 = vshrl.u32 %v370_v17, 16  ;;  %v5528_v40 = vpack.c.b16 %v548_v8, %v545_v19  ;;  %v723_v44 = vpack.c.b16 %v551_v28, %v548_v8  ;;  %v4987_v19 = vld [vmem:[%s6619_s1 + $0x1e0] sm:$0xff]  ;;  %v418_v49 = vshll.u32 %v370_v17, 16 }
  0x2b   : > { %1294 = vmatpush.bf16.msra.mxu3 %v4951_v21  ;;  %1208 = vmatmul.bf16.vlgmr.msra.gmra.mxu0 %v714_v35  ;;  %v546_v21 = vunpack.c.l.b16 %v5483_v2  ;;  %v410_v35 = vrot.slane %v408_v11, 7  ;;  %v4985_v11 = vld [vmem:[%s6619_s1 + $0x1d0] sm:$0xff]  ;;  %v422_v8 = vshrl.u32 %v371_v62, 16  ;;  %v4992_v2 = vld [vmem:[%s6619_s1 + $0x208] sm:$0xff] }
  0x2c   : > { %1316 = vmatpush.bf16.msrb.mxu0 %v4966_v27  ;;  %1266 = vmatmul.bf16.vlgmr.msra.gmra.mxu2 %v716_v36  ;;  %v549_v27 = vunpack.c.l.b16 %v5485_v4  ;;  %v411_v36 = vshll.u32 %v369_v60, 16  ;;  %v417_v48 = vrot.slane %v415_v39, 7 }
  0x2d   : > { %1237 = vmatmul.bf16.vlgmr.msra.gmra.mxu1 %v715_v41  ;;  %1374 = vmatpush.bf16.msrb.mxu2 %v4982_v47  ;;  %v5532_v41 = vpack.c.b16 %v5505_v20, %v5503_v18  ;;  %v4961_v47 = vld [vmem:[%s6619_s1 + $0x110] sm:$0xff] }
  0x2e   : > { %1295 = vmatmul.bf16.vlgmr.msra.gmra.mxu3 %v717_v38  ;;  %1345 = vmatpush.bf16.msrb.mxu1 %v4974_v54  ;;  %v4971_v38 = vld [vmem:[%s6619_s1 + $0x160] sm:$0xff]  ;;  %v413_v46 = vor.u32 %v411_v36, %v410_v35  ;;  %v491_v54 = vrot.slane %v489_v45, 1  ;;  %v420_v60 = vor.u32 %v418_v49, %v417_v48  ;;  %v5603_v36 = vunpack.c.l.b16 %v527_v1 }
  0x2f   : > { %1403 = vmatpush.bf16.msrb.mxu3 %v4990_v55  ;;  %v494_v55 = vshrl.u32 %v5515_v31, 16 }
  0x30   : > { %1317 = vmatpush.bf16.msrb.mxu0 %v4965_v42  ;;  %v5538_v42 = vpack.c.b16 %v549_v27, %v546_v21  ;;  %v444_v59 = vsel %vm5314_vm4, 0, %v413_v46  ;;  %v445_v17 = vsel %vm5314_vm4, 0, %v420_v60  ;;  %v425_v46 = vshll.u32 %v371_v62, 16 }
  0x31   : > { %1375 = vmatpush.bf16.msrb.mxu2 %v4981_v43  ;;  %v498_v43 = vrot.slane %v496_v7, 1  ;;  %v5584_v10 = vsel %vm5378_vm8, %v444_v59, 0  ;;  %v456_v45 = vsel %vm5378_vm8, %v445_v17, 0  ;;  %v4984_v7 = vld [vmem:[%s6619_s1 + $0x1c8] sm:$0xff]  ;;  %v4997_v59 = vld [vmem:[%s6619_s1 + $0x230] sm:$0xff] }
  0x32   : > { %1346 = vmatpush.bf16.msrb.mxu1 %v4973_v61  ;;  %v4960_v61 = vld [vmem:[%s6619_s1 + $0x108] sm:$0xff]  ;;  %v529_v62 = vrot.slane %v456_v45, 1 }
  0x33   : > { %1404 = vmatpush.bf16.msrb.mxu3 %v4989_v0  ;;  %v526_v0 = vrot.slane %v5489_v5, 1  ;;  %v4983_v5 = vld [vmem:[%s6619_s1 + $0x1c0] sm:$0xff] }
  0x34   : > { %1318 = vmatpush.bf16.msrb.mxu0 %v4964_v57  ;;  %v4970_v57 = vld [vmem:[%s6619_s1 + $0x158] sm:$0xff]  ;;  %v562_v17 = vunpack.c.l.b16 %v529_v62 }
  0x35   : > { %1376 = vmatpush.bf16.msrb.mxu2 %v4980_v6  ;;  %v5578_v6 = vor.u32 %v491_v54, %v487_v52  ;;  %v5601_v35 = vunpack.c.l.b16 %v526_v0  ;;  %v503_v52 = vshll.u32 %v5584_v10, 16  ;;  %v510_v54 = vshll.u32 %v456_v45, 16 }
  0x36   : > { %1347 = vmatpush.bf16.msrb.mxu1 %v4972_v12  ;;  %v4976_v12 = vld [vmem:[%s6619_s1 + $0x188] sm:$0xff] }
  0x37   : > { %1405 = vmatpush.bf16.msrb.mxu3 %v4988_v15  ;;  %v4959_v15 = vld [vmem:[%s6619_s1 + $0x100] sm:$0xff]  ;;  %v5623_v49 = vpack.c.b16 %v5603_v36, %v5601_v35 }
  0x38   : > { %1319 = vmatpush.bf16.msrb.mxu0 %v4963_v9  ;;  %v5580_v9 = vor.u32 %v498_v43, %v494_v55  ;;  %v4998_v55 = vld [vmem:[%s6619_s1 + $0x238] sm:$0xff]  ;;  %v501_v43 = vshrl.u32 %v5584_v10, 16 }
  0x39   : > { %1377 = vmatpush.bf16.msrb.mxu2 %v4979_v26  ;;  %v4968_v26 = vld [vmem:[%s6619_s1 + $0x148] sm:$0xff] }
  0x3a   : > { %1348 = vmatpush.bf16.msrb.mxu1 %v4971_v38  ;;  %v552_v38 = vunpack.c.l.b16 %v5578_v6  ;;  %v555_v39 = vunpack.c.l.b16 %v5580_v9 }
  0x3b   : > { %1213 = vmatmul.bf16.gmra.mxu0 %v5528_v40  ;;  %1406 = vmatpush.bf16.msrb.mxu3 %v4987_v19  ;;  %v424_v19 = vrot.slane %v422_v8, 7 }
  0x3c   : > { %1320 = vmatpush.bf16.msrb.mxu0 %v4962_v32  ;;  %1271 = vmatmul.bf16.gmra.mxu2 %v5532_v41  ;;  %v554_v32 = vunpack.c.l.b16 %v5515_v31  ;;  %v4975_v31 = vld [vmem:[%s6619_s1 + $0x180] sm:$0xff] }
  0x3d   : > { %1242 = vmatmul.bf16.gmra.mxu1 %v5538_v42  ;;  %1378 = vmatpush.bf16.msrb.mxu2 %v4978_v50  ;;  %v727_v50 = vpack.c.b16 %v555_v39, %v552_v38 }
  0x3e   : > { %1300 = vmatmul.bf16.gmra.mxu3 %v723_v44  ;;  %1349 = vmatpush.bf16.msrb.mxu1 %v4970_v57  ;;  %v557_v44 = vunpack.c.l.b16 %v5584_v10  ;;  %v726_v48 = vpack.c.b16 %v554_v32, %v551_v28  ;;  %v427_v28 = vor.u32 %v425_v46, %v424_v19  ;;  %v505_v57 = vrot.slane %v503_v52, 1 }
  0x3f   : > { %1407 = vmatpush.bf16.msrb.mxu3 %v4986_v56  ;;  %v508_v56 = vshrl.u32 %v456_v45, 16  ;;  %v719_v46 = vpack.c.b16 %v5503_v18, %v5411_v16  ;;  %v724_v16 = vpack.c.b16 %v552_v38, %v549_v27  ;;  %v4991_v18 = vld [vmem:[%s6619_s1 + $0x200] sm:$0xff] }
  0x40   : > { %1321 = vmatpush.bf16.msrb.mxu0 %v4961_v47  ;;  %v4967_v47 = vld [vmem:[%s6619_s1 + $0x140] sm:$0xff]  ;;  %v729_v51 = vpack.c.b16 %v557_v44, %v554_v32  ;;  %v446_v60 = vsel %vm5314_vm4, 0, %v427_v28 }
  0x41   : > { %1379 = vmatpush.bf16.msrb.mxu2 %v4977_v58  ;;  %v512_v58 = vrot.slane %v510_v54, 1  ;;  %v457_v1 = vsel %vm5378_vm8, %v446_v60, 0 }
  0x42   : > { %1350 = vmatpush.bf16.msrb.mxu1 %v4969_v63  ;;  %v506_v63 = vor.u32 %v505_v57, %v501_v43  ;;  %v531_v27 = vshrl.u32 %v457_v1, 16  ;;  %v538_v6 = vrot.slane %v457_v1, 1 }
  0x43   : > { %1408 = vmatpush.bf16.msrb.mxu3 %v4985_v11  ;;  %v513_v0 = vor.u32 %v512_v58, %v508_v56  ;;  %v560_v11 = vunpack.c.l.b16 %v456_v45  ;;  %v4995_v45 = vld [vmem:[%s6619_s1 + $0x220] sm:$0xff] }
  0x44   : > { %1322 = vmatpush.bf16.msrb.mxu0 %v4960_v61  ;;  %v528_v61 = vrot.slane %v5584_v10, 1  ;;  %v558_v8 = vunpack.c.l.b16 %v506_v63  ;;  %v4996_v10 = vld [vmem:[%s6619_s1 + $0x228] sm:$0xff]  ;;  %v565_v38 = vunpack.c.l.b16 %v538_v6 }
  0x45   : > { %1380 = vmatpush.bf16.msrb.mxu2 %v4976_v12  ;;  %v732_v32 = vpack.c.b16 %v560_v11, %v557_v44  ;;  %v718_v44 = vpack.c.b16 %v546_v21, %v543_v37  ;;  %v725_v37 = vpack.c.b16 %v5601_v35, %v5505_v20  ;;  %v533_v21 = vshll.u32 %v457_v1, 16 }
  0x46   : > { %1351 = vmatpush.bf16.msrb.mxu1 %v4968_v26  ;;  %v559_v12 = vunpack.c.l.b16 %v528_v61  ;;  %v563_v26 = vunpack.c.l.b16 %v457_v1  ;;  %v730_v4 = vpack.c.b16 %v558_v8, %v555_v39 }
  0x47   : > { %1409 = vmatpush.bf16.msrb.mxu3 %v4984_v7 }
  0x48   : > { %1323 = vmatpush.bf16.msrb.mxu0 %v4959_v15  ;;  %v561_v15 = vunpack.c.l.b16 %v513_v0  ;;  %v5646_v7 = vpack.c.b16 %v562_v17, %v559_v12  ;;  %v735_v19 = vpack.c.b16 %v563_v26, %v560_v11  ;;  %v731_v20 = vpack.c.b16 %v559_v12, %v5603_v36 }
  0x49   : > { %1381 = vmatpush.bf16.msrb.mxu2 %v4975_v31 }
  0x4a   : > { %1352 = vmatpush.bf16.msrb.mxu1 %v4967_v47  ;;  %v733_v31 = vpack.c.b16 %v561_v15, %v558_v8  ;;  %v4994_v47 = vld [vmem:[%s6619_s1 + $0x218] sm:$0xff]  ;;  %v740_v8 = vpack.c.b16 %v5409_v13, %v565_v38 }
  0x4b   : > { %1218 = vmatmul.bf16.gmra.mxu0 %v726_v48  ;;  %1410 = vmatpush.bf16.msrb.mxu3 %v4983_v5 }
  0x4c   : > { %1276 = vmatmul.bf16.gmra.mxu2 %v5623_v49  ;;  %1432 = vmatpush.bf16.msra.mxu0 %v4998_v55 }
  0x4d   : > { %1247 = vmatmul.bf16.gmra.mxu1 %v727_v50 }
  0x4e   : > { %1305 = vmatmul.bf16.gmra.mxu3 %v729_v51  ;;  %v737_v51 = vpack.c.b16 %v565_v38, %v562_v17 }
  0x50   : > { %1433 = vmatpush.bf16.msra.mxu0 %v4997_v59 }
  0x54   : > { %1434 = vmatpush.bf16.msra.mxu0 %v4996_v10 }
  0x58   : > { %1435 = vmatpush.bf16.msra.mxu0 %v4995_v45 }
  0x5b   : > { %1223 = vmatmul.bf16.gmra.mxu0 %v732_v32 }
  0x5c   : > { %1281 = vmatmul.bf16.gmra.mxu2 %v5646_v7  ;;  %1436 = vmatpush.bf16.msra.mxu0 %v4994_v47 }
  0x5d   : > { %1252 = vmatmul.bf16.gmra.mxu1 %v733_v31 }
  0x5e   : > { %1310 = vmatmul.bf16.gmra.mxu3 %v735_v19 }
  0x60   : > { %1437 = vmatpush.bf16.msra.mxu0 %v4993_v23 }
  0x64   : > { %1438 = vmatpush.bf16.msra.mxu0 %v4992_v2 }
  0x68   : > { %1439 = vmatpush.bf16.msra.mxu0 %v4991_v18 }
  0x6b   : > { %1324 = vmatmul.bf16.vlgmr.msrb.gmra.mxu0 %v718_v44 }
  0x6c   : > { %1382 = vmatmul.bf16.vlgmr.msrb.gmra.mxu2 %v5528_v40  ;;  %v535_v40 = vrot.slane %v533_v21, 1 }
  0x6d   : > { %1353 = vmatmul.bf16.vlgmr.msrb.gmra.mxu1 %v719_v46 }
  0x6e   : > { %1411 = vmatmul.bf16.vlgmr.msrb.gmra.mxu3 %v5538_v42  ;;  %v536_v42 = vor.u32 %v535_v40, %v531_v27 }
  0x70   : > { %v564_v35 = vunpack.c.l.b16 %v536_v42 }
  0x72   : > { %v739_v9 = vpack.c.b16 %v5409_v13, %v564_v35 }
  0x7b   : > { %1329 = vmatmul.bf16.gmra.mxu0 %v724_v16 }
  0x7c   : > { %1387 = vmatmul.bf16.gmra.mxu2 %v726_v48  ;;  %v736_v48 = vpack.c.b16 %v564_v35, %v561_v15 }
  0x7d   : > { %1358 = vmatmul.bf16.gmra.mxu1 %v725_v37 }
  0x7e   : > { %1416 = vmatmul.bf16.gmra.mxu3 %v727_v50  ;;  %v738_v50 = vpack.c.b16 %v5402_v3, %v563_v26 }
  0x8b   : > { %1334 = vmatmul.bf16.gmra.mxu0 %v730_v4 }
  0x8c   : > { %1392 = vmatmul.bf16.gmra.mxu2 %v732_v32 }
  0x8d   : > { %1363 = vmatmul.bf16.gmra.mxu1 %v731_v20 }
  0x8e   : > { %1421 = vmatmul.bf16.gmra.mxu3 %v733_v31 }
  0x9b   : > { %1339 = vmatmul.bf16.gmra.mxu0 %v736_v48 }
  0x9c   : > { %1397 = vmatmul.bf16.gmra.mxu2 %v738_v50 }
  0x9d   : > { %1368 = vmatmul.bf16.gmra.mxu1 %v737_v51 }
  0x9e   : > { %1426 = vmatmul.bf16.gmra.mxu3 %v739_v9 }
  0xa8   : > { %v1209_v36 = vpop.f32.mrf.mxu0 }
  0xaa   : > { %v1238_v39 = vpop.f32.mrf.mxu1 }
  0xab   : > { %1440 = vmatmul.bf16.vlgmr.msra.gmra.mxu0 %v5532_v41 }
  0xaf   : > { %v1267_v52 = vpop.f32.mrf.mxu2 }
  0xb0   : > { %v1211_v5 = vpop.f32.mrf.mxu0 }
  0xb1   : > { %v1296_v54 = vpop.f32.mrf.mxu3 }
  0xb2   : > { %v1240_v28 = vpop.f32.mrf.mxu1 }
  0xb7   : > { %v1269_v55 = vpop.f32.mrf.mxu2 }
  0xb8   : > { %v1214_v57 = vpop.f32.mrf.mxu0 }
  0xb9   : > { %v1298_v43 = vpop.f32.mrf.mxu3 }
  0xba   : > { %v5687_v56 = vpop.f32.mrf.mxu1 }
  0xbb   : > { %1445 = vmatmul.bf16.gmra.mxu0 %v5623_v49 }
  0xbf   : > { %v5690_v3 = vpop.f32.mrf.mxu2 }
  0xc0   : > { %v1216_v59 = vpop.f32.mrf.mxu0 }
  0xc1   : > { %v5692_v58 = vpop.f32.mrf.mxu3 }
  0xc2   : > { %v5694_v60 = vpop.f32.mrf.mxu1 }
  0xc7   : > { %v5696_v61 = vpop.f32.mrf.mxu2 }
  0xc8   : > { %v1219_v62 = vpop.f32.mrf.mxu0 }
  0xc9   : > { %v5698_v41 = vpop.f32.mrf.mxu3 }
  0xca   : > { %v5700_v63 = vpop.f32.mrf.mxu1 }
  0xcb   : > { %1450 = vmatmul.bf16.gmra.mxu0 %v5646_v7  ;;  %v5725_v7 = vld [vmem:[%s6620_s2] ss:$0 sm:$0xff] }
  0xcc   : > { %v1210_v6 = vadd.f32 %v5725_v7, %v1209_v36  ;;  %v1212_v51 = vadd.f32 %v5725_v7, %v1211_v5 }
  0xce   : > { %v1239_v38 = vadd.f32 %v1238_v39, %v1210_v6 }
  0xcf   : > { %v5703_v0 = vpop.f32.mrf.mxu2 }
  0xd0   : > { %v5707_v49 = vpop.f32.mrf.mxu0  ;;  %v1268_v48 = vadd.f32 %v1267_v52, %v1239_v38 }
  0xd1   : > { %v5705_v1 = vpop.f32.mrf.mxu3 }
  0xd2   : > { %v5709_v11 = vpop.f32.mrf.mxu1 }
  0xd7   : > { %v5711_v12 = vpop.f32.mrf.mxu2 }
  0xd8   : > { %v5716_v15 = vpop.f32.mrf.mxu0 }
  0xd9   : > { %v5713_v17 = vpop.f32.mrf.mxu3 }
  0xda   : > { %v5718_v26 = vpop.f32.mrf.mxu1 }
  0xdb   : > { %1455 = vmatmul.bf16.gmra.mxu0 %v740_v8 }
  0xdf   : > { %v5720_v32 = vpop.f32.mrf.mxu2 }
  0xe0   : > { %v1226_v19 = vpop.f32.mrf.mxu0 }
  0xe1   : > { %v5727_v31 = vpop.f32.mrf.mxu3  ;;  %v1227_v10 = vadd.f32 %v5725_v7, %v1226_v19  ;;  %v1297_v19 = vadd.f32 %v1296_v54, %v1268_v48  ;;  %v1217_v54 = vadd.f32 %v5725_v7, %v1216_v59 }
  0xe2   : > { %v1255_v45 = vpop.f32.mrf.mxu1 }
  0xe3   : > { %v1256_v44 = vadd.f32 %v1255_v45, %v1227_v10  ;;  %v1241_v10 = vadd.f32 %v1240_v28, %v1212_v51  ;;  %v347_v28 = vld [vmem:[%s6625_s7] sm:$0x7] }
  0xe7   : > { %v1284_v13 = vpop.f32.mrf.mxu2 }
  0xe8   : > { %v1285_v46 = vadd.f32 %v1284_v13, %v1256_v44  ;;  %v1325_v23 = vpop.f32.mrf.mxu0  ;;  %v1270_v13 = vadd.f32 %v1269_v55, %v1241_v10 }
  0xe9   : > { %v1313_v47 = vpop.f32.mrf.mxu3  ;;  %v1326_v45 = vadd.f32 %v1325_v23, %v1297_v19  ;;  %v1222_v19 = vadd.f32 %v5725_v7, %v5707_v49 }
  0xea   : > { %v1314_v16 = vadd.f32 %v1313_v47, %v1285_v46  ;;  %v1354_v4 = vpop.f32.mrf.mxu1  ;;  %v1215_v47 = vadd.f32 %v5725_v7, %v1214_v57  ;;  %v1299_v36 = vadd.f32 %v1298_v43, %v1270_v13  ;;  %v1220_v43 = vadd.f32 %v5725_v7, %v1219_v62 }
  0xeb   : > { %v1355_v34 = vadd.f32 %v1354_v4, %v1326_v45  ;;  %v5762_v4 = vperm.slane %v347_v28, 0 }
  0xec   : > { %v1244_v5 = vadd.f32 %v5687_v56, %v1215_v47  ;;  %v5006_v56 = vld [vmem:[%s6621_s3 + $0x38] sm:$0xff]  ;;  %v1249_v51 = vadd.f32 %v5700_v63, %v1220_v43  ;;  %v1225_v47 = vadd.f32 %v5725_v7, %v5716_v15  ;;  %v1947_v43 = vrot.slane %v5349_v33, 6 }
  0xed   : > { %2651 = vmatpush.bf16.msra.mxu1 %v5006_v56 }
  0xee   : > { %v1273_v55 = vadd.f32 %v5690_v3, %v1244_v5  ;;  %v1246_v3 = vadd.f32 %v5694_v60, %v1217_v54 }
  0xef   : > { %v1383_v20 = vpop.f32.mrf.mxu2 }
  0xf0   : > { %v1327_v37 = vpop.f32.mrf.mxu0  ;;  %v1384_v39 = vadd.f32 %v1383_v20, %v1355_v34  ;;  %v5014_v34 = vld [vmem:[%s6621_s3 + $0x78] sm:$0xff]  ;;  %v1302_v20 = vadd.f32 %v5692_v58, %v1273_v55  ;;  %v1275_v62 = vadd.f32 %v5696_v61, %v1246_v3  ;;  %v5005_v61 = vld [vmem:[%s6621_s3 + $0x30] sm:$0xff]  ;;  %v1254_v55 = vadd.f32 %v5718_v26, %v1225_v47  ;;  %v5011_v26 = vld [vmem:[%s6621_s3 + $0x60] sm:$0xff] }
  0xf1   : > { %v1412_v27 = vpop.f32.mrf.mxu3  ;;  %v1328_v38 = vadd.f32 %v1327_v37, %v1299_v36  ;;  %2665 = vmatpush.bf16.msra.mxu2 %v5014_v34  ;;  %2652 = vmatpush.bf16.msra.mxu1 %v5005_v61 }
  0xf2   : > { %v1356_v40 = vpop.f32.mrf.mxu1  ;;  %v1413_v57 = vadd.f32 %v1412_v27, %v1384_v39 }
  0xf3   : > { %v1357_v59 = vadd.f32 %v1356_v40, %v1328_v38  ;;  %v5013_v40 = vld [vmem:[%s6621_s3 + $0x70] sm:$0xff] }
  0xf5   : > { %2666 = vmatpush.bf16.msra.mxu2 %v5013_v40  ;;  %v6636_v40 = vsel %vm5333_vm5, %v5339_v30, %v5294_v14 }
  0xf7   : > { %v1385_v35 = vpop.f32.mrf.mxu2 }
  0xf8   : > { %v1330_v2 = vpop.f32.mrf.mxu0  ;;  %v1386_v27 = vadd.f32 %v1385_v35, %v1357_v59  ;;  %v1278_v35 = vadd.f32 %v5703_v0, %v1249_v51 }
  0xf9   : > { %v1414_v9 = vpop.f32.mrf.mxu3  ;;  %v1331_v10 = vadd.f32 %v1330_v2, %v1302_v20  ;;  %v1251_v2 = vadd.f32 %v5709_v11, %v1222_v19  ;;  %v5012_v11 = vld [vmem:[%s6621_s3 + $0x68] sm:$0xff] }
  0xfa   : > { %v1359_v8 = vpop.f32.mrf.mxu1  ;;  %v1415_v63 = vadd.f32 %v1414_v9, %v1386_v27  ;;  %v1307_v38 = vadd.f32 %v5705_v1, %v1278_v35  ;;  %2667 = vmatpush.bf16.msra.mxu2 %v5012_v11  ;;  %v5021_v35 = vld [vmem:[%s6621_s3 + $0xb0] sm:$0xff] }
  0xfb   : > { %v1360_v39 = vadd.f32 %v1359_v8, %v1331_v10  ;;  %v1280_v54 = vadd.f32 %v5711_v12, %v1251_v2  ;;  %v1948_v10 = vrot.slane %v6636_v40, 4  ;;  %v5008_v40 = vld [vmem:[%s6621_s3 + $0x48] sm:$0xff] }
  0xfe   : > { %2668 = vmatpush.bf16.msra.mxu2 %v5011_v26 }
  0xff   : > { %v1388_v44 = vpop.f32.mrf.mxu2 }
 0x100   : > { %v5730_v18 = vpop.f32.mrf.mxu0  ;;  %v1389_v15 = vadd.f32 %v1388_v44, %v1360_v39  ;;  %v5003_v44 = vld [vmem:[%s6621_s3 + $0x20] sm:$0xff] }
 0x101   : > { %v5743_v52 = vpop.f32.mrf.mxu3 }
 0x102   : > { %v5745_v6 = vpop.f32.mrf.mxu1  ;;  %v1418_v59 = vadd.f32 %v5743_v52, %v1389_v15 }
 0x107   : > { %v5757_v23 = vpop.f32.mrf.mxu2 }
 0x108   : > { %v5732_v21 = vpop.f32.mrf.mxu0 }
 0x109   : > { %v5773_v45 = vpop.f32.mrf.mxu3  ;;  %v1336_v1 = vadd.f32 %v5732_v21, %v1307_v38  ;;  %v1283_v21 = vadd.f32 %v5720_v32, %v1254_v55 }
 0x10a   : > { %v1364_v60 = vpop.f32.mrf.mxu1 }
 0x10b   : > { %v1365_v51 = vadd.f32 %v1364_v60, %v1336_v1  ;;  %v5010_v60 = vld [vmem:[%s6621_s3 + $0x58] sm:$0xff]  ;;  %v1312_v14 = vadd.f32 %v5727_v31, %v1283_v21  ;;  %v5020_v21 = vld [vmem:[%s6621_s3 + $0xa8] sm:$0xff] }
 0x10c   : > { %2669 = vmatpush.bf16.msra.mxu2 %v5010_v60 }
 0x10f   : > { %v1393_v28 = vpop.f32.mrf.mxu2 }
 0x110   : > { %v5734_v42 = vpop.f32.mrf.mxu0  ;;  %v1394_v30 = vadd.f32 %v1393_v28, %v1365_v51 }
 0x112   : > { %v1366_v3 = vpop.f32.mrf.mxu1 }
 0x118   : > { %v5737_v50 = vpop.f32.mrf.mxu0 }
 0x11a   : > { %v1369_v1 = vpop.f32.mrf.mxu1 }
 0x120   : > { %v1342_v46 = vpop.f32.mrf.mxu0 }
 0x121   : > { %v5741_v25 = vadd.f32 %v1342_v46, %v1314_v16  ;;  %v1304_v46 = vadd.f32 %v5698_v41, %v1275_v62  ;;  %v5004_v41 = vld [vmem:[%s6621_s3 + $0x28] sm:$0xff] }
 0x122   : > { %2653 = vmatpush.bf16.msra.mxu1 %v5004_v41  ;;  %v1341_v41 = vadd.f32 %v5737_v50, %v1312_v14  ;;  %v5009_v50 = vld [vmem:[%s6621_s3 + $0x50] sm:$0xff] }
 0x123   : > { %v1333_v9 = vadd.f32 %v5730_v18, %v1304_v46  ;;  %2670 = vmatpush.bf16.msra.mxu2 %v5009_v50 }
 0x125   : > { %v1362_v56 = vadd.f32 %v5745_v6, %v1333_v9 }
 0x126   : > { %2654 = vmatpush.bf16.msra.mxu1 %v5003_v44 }
 0x127   : > { %v1391_v6 = vadd.f32 %v5757_v23, %v1362_v56  ;;  %v5002_v23 = vld [vmem:[%s6621_s3 + $0x18] sm:$0xff]  ;;  %2671 = vmatpush.bf16.msra.mxu2 %v5008_v40 }
 0x128   : > { %v1441_v16 = vpop.f32.mrf.mxu0 }
 0x129   : > { %v1442_v37 = vadd.f32 %v1441_v16, %v1413_v57  ;;  %v1309_v16 = vadd.f32 %v5713_v17, %v1280_v54  ;;  %v5022_v17 = vld [vmem:[%s6621_s3 + $0xb8] sm:$0xff]  ;;  %v1420_v61 = vadd.f32 %v5773_v45, %v1391_v6 }
 0x12a   : > { %2679 = vmatpush.bf16.msra.mxu3 %v5022_v17  ;;  %2655 = vmatpush.bf16.msra.mxu1 %v5002_v23 }
 0x12b   : > { %v1461_v48 = vmax.f32 %v1442_v37, 0.0  ;;  %v1422_v37 = vpop.f32.mrf.mxu3 }
 0x12c   : > { %v5840_v54 = vadd.f32 %v1422_v37, %v1394_v30 }
 0x12d   : > { %v1494_v13 = vpack.c.bf16 %v1461_v48, %v1461_v48  ;;  %v1470_v58 = vmul.f32 %v5762_v4, %v1461_v48  ;;  %v1338_v48 = vadd.f32 %v5734_v42, %v1309_v16 }
 0x12e   : > { %2680 = vmatpush.bf16.msra.mxu3 %v5021_v35 }
 0x12f   : > { %v1510_v49 = vunpack.c.l.b16 %v1494_v13  ;;  %1478 = vadd.xlane.f32.xlu0 %v1470_v58  ;;  %v1974_v13 = vsel %vm1657_vm2, %v5349_v33, %v1947_v43  ;;  %v5001_v43 = vld [vmem:[%s6621_s3 + $0x10] sm:$0xff] }
 0x130   : > { %v1443_v36 = vpop.f32.mrf.mxu0  ;;  %2656 = vmatpush.bf16.msra.mxu1 %v5001_v43 }
 0x131   : > { %v1518_v5 = vpack.c.b16 %v1510_v49, %v1510_v49  ;;  %v1444_v0 = vadd.f32 %v1443_v36, %v1415_v63  ;;  %v1367_v63 = vadd.f32 %v1366_v3, %v1338_v48  ;;  %v1395_v49 = vpop.f32.mrf.mxu2 }
 0x132   : > { %2681 = vmatpush.bf16.msra.mxu3 %v5020_v21 }
 0x133   : > { %v1527_v7 = vshrl.u32 %v1518_v5, 16  ;;  %v1462_v8 = vmax.f32 %v1444_v0, 0.0  ;;  %v1530_v18 = vshll.u32 %v1518_v5, 16  ;;  %v5842_v45 = vadd.f32 %v1395_v49, %v1367_v63  ;;  %v1424_v55 = vpop.f32.mrf.mxu3  ;;  %v5019_v63 = vld [vmem:[%s6621_s3 + $0xa0] sm:$0xff] }
 0x135   : > { %v1529_v12 = vrot.slane %v1527_v7, 7  ;;  %v1495_v57 = vpack.c.bf16 %v1462_v8, %v1462_v8  ;;  %v1471_v34 = vmul.f32 %v5762_v4, %v1462_v8 }
 0x136   : > { %2682 = vmatpush.bf16.msra.mxu3 %v5019_v63 }
 0x137   : > { %v1532_v20 = vor.u32 %v1530_v18, %v1529_v12  ;;  %v1511_v27 = vunpack.c.l.b16 %v1495_v57  ;;  %1480 = vadd.xlane.f32.xlu0 %v1471_v34 }
 0x138   : > { %v1446_v62 = vpop.f32.mrf.mxu0 }
 0x139   : > { %v1590_v32 = vsel %vm5314_vm4, 0, %v1532_v20  ;;  %v1519_v52 = vpack.c.b16 %v1511_v27, %v1511_v27  ;;  %v1447_v19 = vadd.f32 %v1446_v62, %v1418_v59  ;;  %v1370_v27 = vadd.f32 %v1369_v1, %v1341_v41  ;;  %v1398_v30 = vpop.f32.mrf.mxu2 }
 0x13a   : > { %v5821_v42 = vsel %vm5378_vm8, %v1590_v32, 0  ;;  %v1425_v41 = vadd.f32 %v1424_v55, %v5842_v45  ;;  %v4999_v45 = vld [vmem:[%s6621_s3] sm:$0xff] }
 0x13b   : > { %v1747_v58 = vshll.u32 %v5821_v42, 16  ;;  %v1534_v46 = vshrl.u32 %v1519_v52, 16  ;;  %v1463_v2 = vmax.f32 %v1447_v19, 0.0  ;;  %v1770_v33 = vrot.slane %v5821_v42, 1  ;;  %v5000_v19 = vld [vmem:[%s6621_s3 + $0x8] sm:$0xff] }
 0x13c   : > { %v1806_v31 = vshrl.u32 %v5821_v42, 16  ;;  %v1537_v5 = vshll.u32 %v1519_v52, 16  ;;  %v1826_v15 = vrot.slane %v5821_v42, 2  ;;  %2657 = vmatpush.bf16.msra.mxu1 %v5000_v19 }
 0x13d   : > { %v1749_v47 = vrot.slane %v1747_v58, 1  ;;  %v1774_v36 = vrot.slane %v1747_v58, 2  ;;  %v1536_v39 = vrot.slane %v1534_v46, 7  ;;  %v1496_v0 = vpack.c.bf16 %v1463_v2, %v1463_v2 }
 0x13e   : > { %v1472_v38 = vmul.f32 %v5762_v4, %v1463_v2  ;;  %v1822_v18 = vrot.slane %v1806_v31, 1  ;;  %v1834_v16 = vsel %vm5314_vm4, %v1806_v31, %v1770_v33  ;;  %v1858_v59 = vrot.slane %v1747_v58, 3 }
 0x13f   : > { %v1782_v9 = vsel %vm5314_vm4, %v5821_v42, %v1749_v47  ;;  %v1866_v28 = vsel %vm5314_vm4, %v1770_v33, %v1774_v36  ;;  %v1539_v7 = vor.u32 %v1537_v5, %v1536_v39  ;;  %v1512_v57 = vunpack.c.l.b16 %v1496_v0  ;;  %v5007_v42 = vld [vmem:[%s6621_s3 + $0x40] sm:$0xff] }
 0x140   : > { %v1788_v11 = vsel %vm436_vm0, %v1782_v9, %v1770_v33  ;;  %1482 = vadd.xlane.f32.xlu1 %v1472_v38  ;;  %v1448_v8 = vpop.f32.mrf.mxu0  ;;  %v1872_v56 = vsel %vm436_vm0, %v1866_v28, %v1826_v15  ;;  %v1399_v0 = vadd.f32 %v1398_v30, %v1370_v27  ;;  %2658 = vmatpush.bf16.msra.mxu1 %v4999_v45 }
 0x141   : > { %v1802_v12 = vsel %vm5333_vm5, %v1788_v11, %v1774_v36  ;;  %v1449_v34 = vadd.f32 %v1448_v8, %v1420_v61  ;;  %v1591_v26 = vsel %vm5314_vm4, 0, %v1539_v7  ;;  %v1520_v3 = vpack.c.b16 %v1512_v57, %v1512_v57  ;;  %v1427_v11 = vpop.f32.mrf.mxu3  ;;  %2672 = vmatpush.bf16.msra.mxu2 %v5007_v42 }
 0x142   : > { %v1949_v44 = vrot.slane %v1802_v12, 2  ;;  %v1599_v37 = vsel %vm5378_vm8, %v1591_v26, 0  ;;  %v1886_v62 = vsel %vm5333_vm5, %v1872_v56, %v1858_v59  ;;  %v1371_v12 = vpop.f32.mrf.mxu1  ;;  %v5030_v56 = vld [vmem:[%s6621_s3 + $0xf8] sm:$0xff]  ;;  %v5934_v26 = vadd.f32 %v1427_v11, %v1399_v0 }
 0x143   : > { %v1464_v20 = vmax.f32 %v1449_v34, 0.0  ;;  %v5873_v6 = vshll.u32 %v1599_v37, 16  ;;  %v1625_v48 = vrot.slane %v1599_v37, 1  ;;  %v1664_v32 = vshrl.u32 %v1599_v37, 16 }
 0x144   : > { %v1978_v17 = vsel %vm1975_vm9, %v1948_v10, %v1949_v44  ;;  %v1541_v52 = vshrl.u32 %v1520_v3, 16  ;;  %v1840_v10 = vsel %vm436_vm0, %v1834_v16, %v1822_v18  ;;  %v1544_v14 = vshll.u32 %v1520_v3, 16  ;;  %v5038_v44 = vld [vmem:[%s6621_s3 + $0x138] sm:$0xff]  ;;  %2693 = vmatpush.bf16.msrb.mxu1 %v5030_v56 }
 0x145   : > { %v1980_v51 = vsel %vm1979_vm10, %v1974_v13, %v1978_v17  ;;  %v1609_v23 = vrot.slane %v5873_v6, 1  ;;  %v1629_v60 = vrot.slane %v5873_v6, 2  ;;  %v1679_v13 = vrot.slane %v1664_v32, 1  ;;  %2707 = vmatpush.bf16.msrb.mxu2 %v5038_v44 }
 0x146   : > { %2178 = vst [vmem:[#allocation1] ss:$4 sm:$0xff] %v1980_v51  ;;  %v1691_v58 = vsel %vm5314_vm4, %v1664_v32, %v1625_v48  ;;  %v1543_v35 = vrot.slane %v1541_v52, 7  ;;  %v1497_v61 = vpack.c.bf16 %v1464_v20, %v1464_v20  ;;  %v1950_v49 = vrot.slane %v1886_v62, 6 }
 0x147   : > { %v1637_v46 = vsel %vm5314_vm4, %v1599_v37, %v1609_v23  ;;  %v1683_v2 = vrot.slane %v1599_v37, 2  ;;  %v1473_v47 = vmul.f32 %v5762_v4, %v1464_v20  ;;  %v1700_v31 = vsel %vm436_vm0, %v1691_v58, %v1679_v13  ;;  %v5029_v23 = vld [vmem:[%s6621_s3 + $0xf0] sm:$0xff] }
 0x148   : > { %v1451_v33 = vpop.f32.mrf.mxu0  ;;  %v1647_v36 = vsel %vm436_vm0, %v1637_v46, %v1625_v48  ;;  %v1723_v39 = vsel %vm5314_vm4, %v1625_v48, %v1629_v60  ;;  %v1546_v5 = vor.u32 %v1544_v14, %v1543_v35  ;;  %v1513_v28 = vunpack.c.l.b16 %v1497_v61  ;;  %v5054_v35 = vld [vmem:[%s6621_s3 + $0x1b8] sm:$0xff]  ;;  %2694 = vmatpush.bf16.msrb.mxu1 %v5029_v23 }
 0x149   : > { %v1661_v38 = vsel %vm5333_vm5, %v1647_v36, %v1629_v60  ;;  %v1711_v9 = vsel %vm5333_vm5, %v1700_v31, %v1683_v2  ;;  %1484 = vadd.xlane.f32.xlu1 %v1473_v47  ;;  %v1854_v7 = vsel %vm5333_vm5, %v1840_v10, %v1826_v15  ;;  %v1732_v18 = vsel %vm436_vm0, %v1723_v39, %v1683_v2  ;;  %v5017_v10 = vld [vmem:[%s6621_s3 + $0x90] sm:$0xff] }
 0x14a   : > { %v1951_v8 = vrot.slane %v1661_v38, 4  ;;  %v1952_v1 = vrot.slane %v1711_v9, 2  ;;  %v1592_v57 = vsel %vm5314_vm4, 0, %v1546_v5  ;;  %v1521_v34 = vpack.c.b16 %v1513_v28, %v1513_v28  ;;  %v5037_v60 = vld [vmem:[%s6621_s3 + $0x130] sm:$0xff]  ;;  %2735 = vmatpush.bf16.msrb.mxu0 %v5054_v35  ;;  %v5036_v28 = vld [vmem:[%s6621_s3 + $0x128] sm:$0xff]  ;;  %v5026_v35 = vld [vmem:[%s6621_s3 + $0xd8] sm:$0xff] }
 0x14b   : > { %v1452_v43 = vadd.f32 %v1451_v33, %v5840_v54  ;;  %v1983_v15 = vsel %vm1657_vm2, %v1854_v7, %v1950_v49  ;;  %v1715_v55 = vrot.slane %v5873_v6, 3  ;;  %v5923_v16 = vsel %vm5378_vm8, %v1592_v57, 0  ;;  %v5018_v54 = vld [vmem:[%s6621_s3 + $0x98] sm:$0xff]  ;;  %2708 = vmatpush.bf16.msrb.mxu2 %v5037_v60 }
 0x14c   : > { %v1986_v50 = vsel %vm1975_vm9, %v1951_v8, %v1952_v1  ;;  %v1953_v21 = vrot.slane %v1711_v9, 6  ;;  %v5938_v37 = vshll.u32 %v5923_v16, 16  ;;  %v5941_v3 = vadd.f32 %v1371_v12, %v5741_v25  ;;  %2683 = vmatpush.bf16.msra.mxu3 %v5018_v54  ;;  %v5028_v9 = vld [vmem:[%s6621_s3 + $0xe8] sm:$0xff]  ;;  %v5053_v1 = vld [vmem:[%s6621_s3 + $0x1b0] sm:$0xff] }
 0x14d   : > { %v1987_v59 = vsel %vm1979_vm10, %v1983_v15, %v1986_v50  ;;  %v5945_v20 = vsel %vm5333_vm5, %v1732_v18, %v1715_v55  ;;  %v1548_v27 = vshrl.u32 %v1521_v34, 16  ;;  %v1465_v17 = vmax.f32 %v1452_v43, 0.0  ;;  %2695 = vmatpush.bf16.msrb.mxu1 %v5028_v9 }
 0x14e   : > { %2186 = vst [vmem:[#allocation1 + $0x20] ss:$4 sm:$0xff] %v1987_v59  ;;  %v1753_v6 = vrot.slane %v5938_v37, 1  ;;  %v1771_v48 = vrot.slane %v5923_v16, 1  ;;  %v1775_v62 = vrot.slane %v5938_v37, 2  ;;  %v1808_v51 = vshrl.u32 %v5923_v16, 16  ;;  %2736 = vmatpush.bf16.msrb.mxu0 %v5053_v1 }
 0x14f   : > { %v1550_v25 = vrot.slane %v1548_v27, 7  ;;  %v1551_v52 = vshll.u32 %v1521_v34, 16  ;;  %v1498_v19 = vpack.c.bf16 %v1465_v17, %v1465_v17  ;;  %v1474_v40 = vmul.f32 %v5762_v4, %v1465_v17  ;;  %2709 = vmatpush.bf16.msrb.mxu2 %v5036_v28  ;;  %v5015_v17 = vld [vmem:[%s6621_s3 + $0x80] sm:$0xff] }
 0x150   : > { %v1453_v32 = vpop.f32.mrf.mxu0  ;;  %v1954_v14 = vrot.slane %v5945_v20, 4  ;;  %v1990_v30 = vsel %vm1657_vm2, %v1661_v38, %v1953_v21  ;;  %v1783_v13 = vsel %vm5314_vm4, %v5923_v16, %v1753_v6  ;;  %v1827_v63 = vrot.slane %v5923_v16, 2  ;;  %2684 = vmatpush.bf16.msra.mxu3 %v5017_v10  ;;  %v5016_v38 = vld [vmem:[%s6621_s3 + $0x88] sm:$0xff]  ;;  %v5027_v6 = vld [vmem:[%s6621_s3 + $0xe0] sm:$0xff] }
 0x151   : > { %v1454_v58 = vadd.f32 %v1453_v32, %v1425_v41  ;;  %v1792_v61 = vsel %vm436_vm0, %v1783_v13, %v1771_v48  ;;  %v1867_v49 = vsel %vm5314_vm4, %v1771_v48, %v1775_v62  ;;  %v1553_v46 = vor.u32 %v1551_v52, %v1550_v25  ;;  %1486 = vadd.xlane.f32.xlu2 %v1474_v40  ;;  %v5052_v40 = vld [vmem:[%s6621_s3 + $0x1a8] sm:$0xff] }
 0x152   : > { %v1803_v2 = vsel %vm5333_vm5, %v1792_v61, %v1775_v62  ;;  %v1823_v47 = vrot.slane %v1808_v51, 1  ;;  %v1514_v33 = vunpack.c.l.b16 %v1498_v19  ;;  %v1835_v31 = vsel %vm5314_vm4, %v1808_v51, %v1771_v48  ;;  %v5035_v48 = vld [vmem:[%s6621_s3 + $0x120] sm:$0xff]  ;;  %v1400_v62 = vpop.f32.mrf.mxu2  ;;  %v5046_v19 = vld [vmem:[%s6621_s3 + $0x178] sm:$0xff]  ;;  %2696 = vmatpush.bf16.msrb.mxu1 %v5027_v6  ;;  %2737 = vmatpush.bf16.msrb.mxu0 %v5052_v40  ;;  %v5024_v6 = vld [vmem:[%s6621_s3 + $0xc8] sm:$0xff] }
 0x153   : > { %v1466_v36 = vmax.f32 %v1454_v58, 0.0  ;;  %v1859_v39 = vrot.slane %v5938_v37, 3  ;;  %v1955_v5 = vrot.slane %v1803_v2, 2  ;;  %v1593_v0 = vsel %vm5314_vm4, 0, %v1553_v46  ;;  %2710 = vmatpush.bf16.msrb.mxu2 %v5035_v48 }
 0x154   : > { %v1876_v41 = vsel %vm436_vm0, %v1867_v49, %v1827_v63  ;;  %v1601_v11 = vsel %vm5378_vm8, %v1593_v0, 0  ;;  %v1522_v7 = vpack.c.b16 %v1514_v33, %v1514_v33  ;;  %v1844_v43 = vsel %vm436_vm0, %v1835_v31, %v1823_v47  ;;  %2685 = vmatpush.bf16.msra.mxu3 %v5016_v38  ;;  %v5034_v47 = vld [vmem:[%s6621_s3 + $0x118] sm:$0xff]  ;;  %v5045_v33 = vld [vmem:[%s6621_s3 + $0x170] sm:$0xff]  ;;  %v1429_v0 = vpop.f32.mrf.mxu3 }
 0x155   : > { %v1499_v8 = vpack.c.bf16 %v1466_v36, %v1466_v36  ;;  %v1993_v12 = vsel %vm1975_vm9, %v1954_v14, %v1955_v5  ;;  %v1611_v18 = vshll.u32 %v1601_v11, 16  ;;  %v1626_v57 = vrot.slane %v1601_v11, 1  ;;  %v5051_v5 = vld [vmem:[%s6621_s3 + $0x1a0] sm:$0xff] }
 0x156   : > { %v1475_v34 = vmul.f32 %v5762_v4, %v1466_v36  ;;  %v1994_v45 = vsel %vm1979_vm10, %v1990_v30, %v1993_v12  ;;  %v1666_v42 = vshrl.u32 %v1601_v11, 16  ;;  %v1555_v15 = vshrl.u32 %v1522_v7, 16  ;;  %2697 = vmatpush.bf16.msrb.mxu1 %v5026_v35  ;;  %2738 = vmatpush.bf16.msrb.mxu0 %v5051_v5 }
 0x157   : > { %v1887_v50 = vsel %vm5333_vm5, %v1876_v41, %v1859_v39  ;;  %2180 = vst [vmem:[#allocation1 + $0x1] ss:$4 sm:$0xff] %v1994_v45  ;;  %v1613_v54 = vrot.slane %v1611_v18, 1  ;;  %v1630_v56 = vrot.slane %v1611_v18, 2  ;;  %v1558_v44 = vshll.u32 %v1522_v7, 16  ;;  %2711 = vmatpush.bf16.msrb.mxu2 %v5034_v47 }
 0x158   : > { %v1456_v55 = vpop.f32.mrf.mxu0  ;;  %v1680_v21 = vrot.slane %v1666_v42, 1  ;;  %v1692_v59 = vsel %vm5314_vm4, %v1666_v42, %v1626_v57  ;;  %v1557_v37 = vrot.slane %v1555_v15, 7  ;;  %v1515_v27 = vunpack.c.l.b16 %v1499_v8  ;;  %2686 = vmatpush.bf16.msra.mxu3 %v5015_v17  ;;  %v5025_v8 = vld [vmem:[%s6621_s3 + $0xd0] sm:$0xff] }
 0x159   : > { %v1638_v51 = vsel %vm5314_vm4, %v1601_v11, %v1613_v54  ;;  %v1684_v32 = vrot.slane %v1601_v11, 2  ;;  %v1724_v25 = vsel %vm5314_vm4, %v1626_v57, %v1630_v56  ;;  %1488 = vadd.xlane.f32.xlu2 %v1475_v34  ;;  %v1457_v52 = vadd.f32 %v1456_v55, %v5934_v26  ;;  %v5033_v34 = vld [vmem:[%s6621_s3 + $0x110] sm:$0xff]  ;;  %v5050_v55 = vld [vmem:[%s6621_s3 + $0x198] sm:$0xff] }
 0x15a   : > { %v1956_v10 = vrot.slane %v1887_v50, 6  ;;  %v1651_v23 = vsel %vm436_vm0, %v1638_v51, %v1626_v57  ;;  %v1704_v60 = vsel %vm436_vm0, %v1692_v59, %v1680_v21  ;;  %v1560_v14 = vor.u32 %v1558_v44, %v1557_v37  ;;  %2698 = vmatpush.bf16.msrb.mxu1 %v5025_v8  ;;  %2739 = vmatpush.bf16.msrb.mxu0 %v5050_v55 }
 0x15b   : > { %v6029_v30 = vsel %vm5333_vm5, %v1651_v23, %v1630_v56  ;;  %v6033_v26 = vsel %vm5333_vm5, %v1704_v60, %v1684_v32  ;;  %v1736_v13 = vsel %vm436_vm0, %v1724_v25, %v1684_v32  ;;  %v1523_v58 = vpack.c.b16 %v1515_v27, %v1515_v27  ;;  %2712 = vmatpush.bf16.msrb.mxu2 %v5033_v34  ;;  %v5032_v25 = vld [vmem:[%s6621_s3 + $0x108] sm:$0xff]  ;;  %v5049_v60 = vld [vmem:[%s6621_s3 + $0x190] sm:$0xff] }
 0x15c   : > { %v1401_v61 = vadd.f32 %v1400_v62, %v5941_v3  ;;  %v1716_v49 = vrot.slane %v1611_v18, 3  ;;  %v1957_v46 = vrot.slane %v6029_v30, 4  ;;  %v1958_v2 = vrot.slane %v6033_v26, 2  ;;  %2721 = vmatpush.bf16.msrb.mxu3 %v5046_v19 }
 0x15d   : > { %v1855_v3 = vsel %vm5333_vm5, %v1844_v43, %v1827_v63  ;;  %v1594_v36 = vsel %vm5314_vm4, 0, %v1560_v14  ;;  %v1562_v31 = vshrl.u32 %v1523_v58, 16  ;;  %v1467_v39 = vmax.f32 %v1457_v52, 0.0  ;;  %v5044_v43 = vld [vmem:[%s6621_s3 + $0x168] sm:$0xff]  ;;  %v5043_v52 = vld [vmem:[%s6621_s3 + $0x160] sm:$0xff] }
 0x15e   : > { %v1997_v38 = vsel %vm1657_vm2, %v1855_v3, %v1956_v10  ;;  %v6060_v9 = vsel %vm5333_vm5, %v1736_v13, %v1716_v49  ;;  %v2000_v16 = vsel %vm1975_vm9, %v1957_v46, %v1958_v2  ;;  %v6065_v63 = vsel %vm5378_vm8, %v1594_v36, 0  ;;  %2699 = vmatpush.bf16.msrb.mxu1 %v5024_v6  ;;  %v5023_v2 = vld [vmem:[%s6621_s3 + $0xc0] sm:$0xff]  ;;  %2740 = vmatpush.bf16.msrb.mxu0 %v5049_v60 }
 0x15f   : > { %v2001_v28 = vsel %vm1979_vm10, %v1997_v38, %v2000_v16  ;;  %v1755_v41 = vshll.u32 %v6065_v63, 16  ;;  %v1810_v11 = vshrl.u32 %v6065_v63, 16  ;;  %v1565_v7 = vshll.u32 %v1523_v58, 16  ;;  %2713 = vmatpush.bf16.msrb.mxu2 %v5032_v25  ;;  %v5042_v38 = vld [vmem:[%s6621_s3 + $0x158] sm:$0xff]  ;;  %v5048_v16 = vld [vmem:[%s6621_s3 + $0x188] sm:$0xff]  ;;  %v5039_v60 = vld [vmem:[%s6621_s3 + $0x140] sm:$0xff] }
 0x160   : > { %2188 = vst [vmem:[#allocation1 + $0x21] ss:$4 sm:$0xff] %v2001_v28  ;;  %v1772_v1 = vrot.slane %v6065_v63, 1  ;;  %v1564_v12 = vrot.slane %v1562_v31, 7  ;;  %v1500_v18 = vpack.c.bf16 %v1467_v39, %v1467_v39  ;;  %v1476_v57 = vmul.f32 %v5762_v4, %v1467_v39  ;;  %2722 = vmatpush.bf16.msrb.mxu3 %v5045_v33  ;;  %v1458_v17 = vpop.f32.mrf.mxu0 }
 0x161   : > { %v1430_v45 = vadd.f32 %v1429_v0, %v1401_v61  ;;  %v1757_v42 = vrot.slane %v1755_v41, 1  ;;  %v1776_v15 = vrot.slane %v1755_v41, 2  ;;  %v1959_v50 = vrot.slane %v6033_v26, 6 }
 0x162   : > { %v1960_v54 = vrot.slane %v6060_v9, 4  ;;  %v1567_v56 = vor.u32 %v1565_v7, %v1564_v12  ;;  %v1516_v44 = vunpack.c.l.b16 %v1500_v18  ;;  %1490 = vadd.xlane.f32.xlu0 %v1476_v57  ;;  %v1824_v59 = vrot.slane %v1810_v11, 1  ;;  %2700 = vmatpush.bf16.msrb.mxu1 %v5023_v2 }
 0x163   : > { %v1784_v21 = vsel %vm5314_vm4, %v6065_v63, %v1757_v42  ;;  %v1828_v37 = vrot.slane %v6065_v63, 2  ;;  %v1868_v27 = vsel %vm5314_vm4, %v1772_v1, %v1776_v15  ;;  %v1836_v62 = vsel %vm5314_vm4, %v1810_v11, %v1772_v1  ;;  %2741 = vmatpush.bf16.msrb.mxu0 %v5048_v16  ;;  %v5041_v42 = vld [vmem:[%s6621_s3 + $0x150] sm:$0xff] }
 0x164   : > { %v1796_v48 = vsel %vm436_vm0, %v1784_v21, %v1772_v1  ;;  %v1860_v51 = vrot.slane %v1755_v41, 3  ;;  %v1595_v32 = vsel %vm5314_vm4, 0, %v1567_v56  ;;  %2723 = vmatpush.bf16.msrb.mxu3 %v5044_v43  ;;  %v1524_v23 = vpack.c.b16 %v1516_v44, %v1516_v44 }
 0x165   : > { %v1804_v19 = vsel %vm5333_vm5, %v1796_v48, %v1776_v15  ;;  %v1880_v40 = vsel %vm436_vm0, %v1868_v27, %v1828_v37  ;;  %v1603_v10 = vsel %vm5378_vm8, %v1595_v32, 0  ;;  %v1459_v58 = vadd.f32 %v1458_v17, %v1430_v45  ;;  %v5047_v15 = vld [vmem:[%s6621_s3 + $0x180] sm:$0xff] }
 0x166   : > { %v1961_v14 = vrot.slane %v1804_v19, 2  ;;  %v6114_v26 = vshll.u32 %v1603_v10, 16  ;;  %v1627_v13 = vrot.slane %v1603_v10, 1  ;;  %v2004_v35 = vsel %vm1657_vm2, %v6029_v30, %v1959_v50  ;;  %v5031_v30 = vld [vmem:[%s6621_s3 + $0x100] sm:$0xff] }
 0x167   : > { %v1848_v61 = vsel %vm436_vm0, %v1836_v62, %v1824_v59  ;;  %v1668_v49 = vshrl.u32 %v1603_v10, 16  ;;  %v1569_v46 = vshrl.u32 %v1524_v23, 16  ;;  %v1888_v47 = vsel %vm5333_vm5, %v1880_v40, %v1860_v51  ;;  %2714 = vmatpush.bf16.msrb.mxu2 %v5031_v30  ;;  %2742 = vmatpush.bf16.msrb.mxu0 %v5047_v15 }
 0x168   : > { %v2007_v33 = vsel %vm1975_vm9, %v1960_v54, %v1961_v14  ;;  %v1617_v3 = vrot.slane %v6114_v26, 1  ;;  %v1685_v36 = vrot.slane %v1603_v10, 2  ;;  %2724 = vmatpush.bf16.msrb.mxu3 %v5043_v52  ;;  %v1572_v0 = vshll.u32 %v1524_v23, 16 }
 0x169   : > { %v2008_v31 = vsel %vm1979_vm10, %v2004_v35, %v2007_v33  ;;  %v1681_v39 = vrot.slane %v1668_v49, 1  ;;  %v1693_v5 = vsel %vm5314_vm4, %v1668_v49, %v1627_v13  ;;  %v1631_v63 = vrot.slane %v6114_v26, 2 }
 0x16a   : > { %2182 = vst [vmem:[#allocation1 + $0x2] ss:$4 sm:$0xff] %v2008_v31  ;;  %v1639_v28 = vsel %vm5314_vm4, %v1603_v10, %v1617_v3  ;;  %v1571_v41 = vrot.slane %v1569_v46, 7  ;;  %v1468_v11 = vmax.f32 %v1459_v58, 0.0  ;;  %v1962_v7 = vrot.slane %v1888_v47, 6 }
 0x16b   : > { %v1655_v8 = vsel %vm436_vm0, %v1639_v28, %v1627_v13  ;;  %v1708_v1 = vsel %vm436_vm0, %v1693_v5, %v1681_v39  ;;  %v1856_v34 = vsel %vm5333_vm5, %v1848_v61, %v1828_v37  ;;  %v1725_v55 = vsel %vm5314_vm4, %v1627_v13, %v1631_v63 }
 0x16c   : > { %v1663_v12 = vsel %vm5333_vm5, %v1655_v8, %v1631_v63  ;;  %v1713_v18 = vsel %vm5333_vm5, %v1708_v1, %v1685_v36  ;;  %v1574_v57 = vor.u32 %v1572_v0, %v1571_v41  ;;  %2725 = vmatpush.bf16.msrb.mxu3 %v5042_v38  ;;  %v1501_v54 = vpack.c.bf16 %v1468_v11, %v1468_v11 }
 0x16d   : > { %v1963_v43 = vrot.slane %v1663_v12, 4  ;;  %v1964_v45 = vrot.slane %v1713_v18, 2  ;;  %v1477_v56 = vmul.f32 %v5762_v4, %v1468_v11  ;;  %v2011_v44 = vsel %vm1657_vm2, %v1856_v34, %v1962_v7  ;;  %v5040_v4 = vld [vmem:[%s6621_s3 + $0x148] sm:$0xff] }
 0x16e   : > { %v1596_v50 = vsel %vm5314_vm4, 0, %v1574_v57  ;;  %v1740_v17 = vsel %vm436_vm0, %v1725_v55, %v1685_v36  ;;  %v1517_v6 = vunpack.c.l.b16 %v1501_v54  ;;  %v1717_v48 = vrot.slane %v6114_v26, 3 }
 0x16f   : > { %v2014_v21 = vsel %vm1975_vm9, %v1963_v43, %v1964_v45  ;;  %v6164_v59 = vsel %vm5378_vm8, %v1596_v50, 0  ;;  %1492 = vadd.xlane.f32.xlu1 %v1477_v56  ;;  %v1965_v40 = vrot.slane %v1713_v18, 6  ;;  %v5070_v43 = vld [vmem:[%s6621_s3 + $0x238] sm:$0xff] }
 0x170   : > { %v2015_v37 = vsel %vm1979_vm10, %v2011_v44, %v2014_v21  ;;  %v1759_v27 = vshll.u32 %v6164_v59, 16  ;;  %2726 = vmatpush.bf16.msrb.mxu3 %v5041_v42  ;;  %v1773_v51 = vrot.slane %v6164_v59, 1  ;;  %v1525_v32 = vpack.c.b16 %v1517_v6, %v1517_v6 }
 0x171   : > { %2190 = vst [vmem:[#allocation1 + $0x22] ss:$4 sm:$0xff] %v2015_v37  ;;  %v6176_v25 = vsel %vm5333_vm5, %v1740_v17, %v1717_v48  ;;  %v2018_v49 = vsel %vm1657_vm2, %v1663_v12, %v1965_v40  ;;  %v1829_v46 = vrot.slane %v6164_v59, 2  ;;  %v1812_v33 = vshrl.u32 %v6164_v59, 16  ;;  %v5061_v17 = vld [vmem:[%s6621_s3 + $0x1f0] sm:$0xff]  ;;  %v5066_v40 = vld [vmem:[%s6621_s3 + $0x218] sm:$0xff] }
 0x172   : > { %v1761_v62 = vrot.slane %v1759_v27, 1  ;;  %v1777_v52 = vrot.slane %v1759_v27, 2  ;;  %v1576_v23 = vshrl.u32 %v1525_v32, 16  ;;  %v1966_v26 = vrot.slane %v6176_v25, 4 }
 0x173   : > { %v1579_v35 = vshll.u32 %v1525_v32, 16  ;;  %v1861_v31 = vrot.slane %v1759_v27, 3  ;;  %v1825_v16 = vrot.slane %v1812_v33, 1  ;;  %v1837_v63 = vsel %vm5314_vm4, %v1812_v33, %v1773_v51  ;;  %v5068_v32 = vld [vmem:[%s6621_s3 + $0x228] sm:$0xff] }
 0x174   : > { %v1785_v19 = vsel %vm5314_vm4, %v6164_v59, %v1761_v62  ;;  %2727 = vmatpush.bf16.msrb.mxu3 %v5040_v4  ;;  %v1578_v58 = vrot.slane %v1576_v23, 7  ;;  %v1869_v61 = vsel %vm5314_vm4, %v1773_v51, %v1777_v52  ;;  %v5069_v4 = vld [vmem:[%s6621_s3 + $0x230] sm:$0xff] }
 0x175   : > { %v1800_v10 = vsel %vm436_vm0, %v1785_v19, %v1773_v51  ;;  %v1884_v36 = vsel %vm436_vm0, %v1869_v61, %v1829_v46  ;;  %v1852_v45 = vsel %vm436_vm0, %v1837_v63, %v1825_v16  ;;  %v5058_v19 = vld [vmem:[%s6621_s3 + $0x1d8] sm:$0xff] }
 0x176   : > { %v1805_v14 = vsel %vm5333_vm5, %v1800_v10, %v1777_v52  ;;  %v1581_v47 = vor.u32 %v1579_v35, %v1578_v58  ;;  %v1889_v28 = vsel %vm5333_vm5, %v1884_v36, %v1861_v31  ;;  %v1857_v6 = vsel %vm5333_vm5, %v1852_v45, %v1829_v46  ;;  %v5055_v58 = vld [vmem:[%s6621_s3 + $0x1c0] sm:$0xff]  ;;  %v5077_v36 = vld [vmem:[%s6623_s5 + $0x30] sm:$0xff] }
 0x177   : > { %v1967_v13 = vrot.slane %v1805_v14, 2  ;;  %v1968_v12 = vrot.slane %v1889_v28, 6  ;;  %v5065_v14 = vld [vmem:[%s6621_s3 + $0x210] sm:$0xff]  ;;  %v5063_v35 = vld [vmem:[%s6621_s3 + $0x200] sm:$0xff] }
 0x178   : > { %2728 = vmatpush.bf16.msrb.mxu3 %v5039_v60  ;;  %v1597_v30 = vsel %vm5314_vm4, 0, %v1581_v47  ;;  %v5057_v60 = vld [vmem:[%s6621_s3 + $0x1d0] sm:$0xff] }
 0x179   : > { %v2021_v2 = vsel %vm1975_vm9, %v1966_v26, %v1967_v13  ;;  %v1605_v39 = vsel %vm5378_vm8, %v1597_v30, 0  ;;  %v5056_v26 = vld [vmem:[%s6621_s3 + $0x1c8] sm:$0xff]  ;;  %v5175_v30 = vld [vmem:[%s6622_s4] ss:$0 sm:$0xff]  ;;  %vm3906_vm8 = vcmask 458112  }
 0x17a   : > { %v2022_v3 = vsel %vm1979_vm10, %v2018_v49, %v2021_v2  ;;  %v1891_v5 = vshll.u32 %v1605_v39, 16  ;;  %v1896_v0 = vrot.slane %v1605_v39, 1  ;;  %v1905_v38 = vshrl.u32 %v1605_v39, 16  ;;  %v5064_v13 = vld [vmem:[%s6621_s3 + $0x208] sm:$0xff]  ;;  %v5078_v2 = vld [vmem:[%s6623_s5 + $0x38] sm:$0xff] }
 0x17b   : > { %2184 = vst [vmem:[#allocation1 + $0x3] ss:$4 sm:$0xff] %v2022_v3  ;;  %v1910_v1 = vrot.slane %v1605_v39, 2 }
 0x17c   : > { %v1893_v41 = vrot.slane %v1891_v5, 1  ;;  %v1897_v11 = vrot.slane %v1891_v5, 2  ;;  %v1909_v7 = vrot.slane %v1905_v38, 1  ;;  %v1912_v8 = vsel %vm5314_vm4, %v1905_v38, %v1896_v0 }
 0x17d   : > { %v1918_v59 = vrot.slane %v1891_v5, 3 }
 0x17e   : > { %v1899_v18 = vsel %vm5314_vm4, %v1605_v39, %v1893_v41  ;;  %v1915_v57 = vsel %vm436_vm0, %v1912_v8, %v1909_v7  ;;  %v1920_v34 = vsel %vm5314_vm4, %v1896_v0, %v1897_v11  ;;  %v5076_v39 = vld [vmem:[%s6623_s5 + $0x28] sm:$0xff] }
 0x17f   : > { %v1902_v55 = vsel %vm436_vm0, %v1899_v18, %v1896_v0  ;;  %v1917_v50 = vsel %vm5333_vm5, %v1915_v57, %v1910_v1  ;;  %v1923_v21 = vsel %vm436_vm0, %v1920_v34, %v1910_v1 }
 0x180   : > { %v1904_v44 = vsel %vm5333_vm5, %v1902_v55, %v1897_v11  ;;  %v1970_v27 = vrot.slane %v1917_v50, 2  ;;  %v1925_v48 = vsel %vm5333_vm5, %v1923_v21, %v1918_v59  ;;  %v6291_v21 = vld [vmem:[%s6625_s7] sm:$0x7]  ;;  %vm3894_vm5 = vcmask 261312  }
 0x181   : > { %v1969_v37 = vrot.slane %v1904_v44, 4  ;;  %v2779_v59 = vperm.slane %v6291_v21, 1 }
 0x182   : > { %v2193_v42 = vld.sshfl [vmem:[#allocation1] sm:$0xff pattern:$0x73625140]  ;;  %v2194_v15 = vld.sshfl [vmem:[#allocation1 + $0x8] sm:$0xff pattern:$0x73625140] }
 0x183   : > { %v2195_v54 = vld.sshfl [vmem:[#allocation1 + $0x10] sm:$0xff pattern:$0x73625140]  ;;  %v2196_v56 = vld.sshfl [vmem:[#allocation1 + $0x18] sm:$0xff pattern:$0x73625140]  ;;  %2659 = vmatmul.bf16.vlgmr.msra.gmra.mxu1 %v2193_v42  ;;  %2673 = vmatmul.bf16.vlgmr.msra.gmra.mxu2 %v2194_v15  ;;  %v2028_v62 = vsel %vm1975_vm9, %v1969_v37, %v1970_v27 }
 0x184   : > { %2202 = vst [vmem:[#allocation1] ss:$4 sm:$0xff] %v5945_v20  ;;  %2687 = vmatmul.bf16.vlgmr.msra.gmra.mxu3 %v2195_v54  ;;  %2749 = vmatpush.bf16.msra.mxu1 %v5062_v53  ;;  %v2025_v20 = vsel %vm1657_vm2, %v1857_v6, %v1968_v12 }
 0x185   : > { %2204 = vst [vmem:[#allocation1 + $0x1] ss:$4 sm:$0xff] %v6060_v9  ;;  %2763 = vmatpush.bf16.msra.mxu2 %v5070_v43  ;;  %v2029_v51 = vsel %vm1979_vm10, %v2025_v20, %v2028_v62  ;;  %v5060_v9 = vld [vmem:[%s6621_s3 + $0x1e8] sm:$0xff]  ;;  %3583 = vmatpush.bf16.msra.mxu3 %v5078_v2 }
 0x186   : > { %2206 = vst [vmem:[#allocation1 + $0x2] ss:$4 sm:$0xff] %v6176_v25  ;;  %v5067_v25 = vld [vmem:[%s6621_s3 + $0x220] sm:$0xff] }
 0x187   : > { %2208 = vst [vmem:[#allocation1 + $0x3] ss:$4 sm:$0xff] %v1925_v48 }
 0x188   : > { %2192 = vst [vmem:[#allocation1 + $0x23] ss:$4 sm:$0xff] %v2029_v51  ;;  %2750 = vmatpush.bf16.msra.mxu1 %v5061_v17 }
 0x189   : > { %2764 = vmatpush.bf16.msra.mxu2 %v5069_v4  ;;  %3584 = vmatpush.bf16.msra.mxu3 %v5077_v36  ;;  %v5073_v36 = vld [vmem:[%s6623_s5 + $0x10] sm:$0xff] }
 0x18c   : > { %2751 = vmatpush.bf16.msra.mxu1 %v5060_v9 }
 0x18d   : > { %2765 = vmatpush.bf16.msra.mxu2 %v5068_v32  ;;  %3585 = vmatpush.bf16.msra.mxu3 %v5076_v39 }
 0x18e   : > { %v2209_v49 = vld.sshfl [vmem:[#allocation1] sm:$0xff pattern:$0x73625140] }
 0x18f   : > { %v2199_v52 = vld.sshfl [vmem:[#allocation1 + $0x30] sm:$0xff pattern:$0x73625140]  ;;  %v2197_v10 = vld.sshfl [vmem:[#allocation1 + $0x20] sm:$0xff pattern:$0x73625140] }
 0x190   : > { %2752 = vmatpush.bf16.msra.mxu1 %v5059_v29  ;;  %2743 = vmatmul.bf16.vlgmr.msrb.gmra.mxu0 %v2199_v52  ;;  %v2198_v23 = vld.sshfl [vmem:[#allocation1 + $0x28] sm:$0xff pattern:$0x73625140]  ;;  %v2200_v61 = vld.sshfl [vmem:[#allocation1 + $0x38] sm:$0xff pattern:$0x73625140] }
 0x191   : > { %2766 = vmatpush.bf16.msra.mxu2 %v5067_v25 }
 0x193   : > { %2701 = vmatmul.bf16.vlgmr.msrb.gmra.mxu1 %v2196_v56  ;;  %2715 = vmatmul.bf16.vlgmr.msrb.gmra.mxu2 %v2197_v10  ;;  %v5094_v10 = vld [vmem:[%s6623_s5 + $0xb8] sm:$0xff] }
 0x194   : > { %2729 = vmatmul.bf16.vlgmr.msrb.gmra.mxu3 %v2198_v23  ;;  %2753 = vmatpush.bf16.msra.mxu1 %v5058_v19  ;;  %v5075_v19 = vld [vmem:[%s6623_s5 + $0x20] sm:$0xff]  ;;  %v5102_v23 = vld [vmem:[%s6623_s5 + $0xf8] sm:$0xff] }
 0x195   : > { %2767 = vmatpush.bf16.msra.mxu2 %v5066_v40  ;;  %v5086_v40 = vld [vmem:[%s6623_s5 + $0x78] sm:$0xff]  ;;  %3586 = vmatpush.bf16.msra.mxu3 %v5075_v19 }
 0x196   : > { %3596 = vmatpush.bf16.msra.mxu0 %v5086_v40 }
 0x198   : > { %2754 = vmatpush.bf16.msra.mxu1 %v5057_v60 }
 0x199   : > { %2768 = vmatpush.bf16.msra.mxu2 %v5065_v14 }
 0x19c   : > { %2755 = vmatpush.bf16.msra.mxu1 %v5056_v26  ;;  %v5074_v26 = vld [vmem:[%s6623_s5 + $0x18] sm:$0xff] }
 0x19d   : > { %2769 = vmatpush.bf16.msra.mxu2 %v5064_v13  ;;  %v5085_v13 = vld [vmem:[%s6623_s5 + $0x70] sm:$0xff]  ;;  %3587 = vmatpush.bf16.msra.mxu3 %v5074_v26 }
 0x19e   : > { %3597 = vmatpush.bf16.msra.mxu0 %v5085_v13 }
 0x1a0   : > { %2756 = vmatpush.bf16.msra.mxu1 %v5055_v58  ;;  %v5093_v58 = vld [vmem:[%s6623_s5 + $0xb0] sm:$0xff] }
 0x1a1   : > { %2770 = vmatpush.bf16.msra.mxu2 %v5063_v35  ;;  %v5101_v35 = vld [vmem:[%s6623_s5 + $0xf0] sm:$0xff]  ;;  %3588 = vmatpush.bf16.msra.mxu3 %v5073_v36 }
 0x1a3   : > { %2757 = vmatmul.bf16.vlgmr.msra.gmra.mxu1 %v2200_v61 }
 0x1a4   : > { %2771 = vmatmul.bf16.vlgmr.msra.gmra.mxu2 %v2209_v49  ;;  %3609 = vmatpush.bf16.msrb.mxu1 %v5094_v10 }
 0x1a5   : > { %3622 = vmatpush.bf16.msrb.mxu2 %v5102_v23 }
 0x1a8   : > { %3610 = vmatpush.bf16.msrb.mxu1 %v5093_v58  ;;  %v5089_v58 = vld [vmem:[%s6623_s5 + $0x90] sm:$0xff] }
 0x1a9   : > { %3623 = vmatpush.bf16.msrb.mxu2 %v5101_v35  ;;  %v5097_v35 = vld [vmem:[%s6623_s5 + $0xd0] sm:$0xff] }
 0x200   : > { %v2660_v46 = vpop.f32.mrf.mxu1 }
 0x201   : > { %v2661_v0 = vadd.f32 %v5175_v30, %v2660_v46 }
 0x206   : > { %v2674_v47 = vpop.f32.mrf.mxu2 }
 0x207   : > { %v2688_v3 = vpop.f32.mrf.mxu3  ;;  %v2675_v16 = vadd.f32 %v2674_v47, %v2661_v0  ;;  %v5092_v0 = vld [vmem:[%s6623_s5 + $0xa8] sm:$0xff] }
 0x208   : > { %v2662_v33 = vpop.f32.mrf.mxu1  ;;  %3611 = vmatpush.bf16.msrb.mxu1 %v5092_v0 }
 0x209   : > { %v2689_v28 = vadd.f32 %v2688_v3, %v2675_v16  ;;  %v2663_v11 = vadd.f32 %v5175_v30, %v2662_v33 }
 0x20d   : > { %v2744_v34 = vpop.f32.mrf.mxu0 }
 0x20e   : > { %v2676_v31 = vpop.f32.mrf.mxu2 }
 0x20f   : > { %v2690_v38 = vpop.f32.mrf.mxu3  ;;  %v2677_v8 = vadd.f32 %v2676_v31, %v2663_v11  ;;  %v5072_v11 = vld [vmem:[%s6623_s5 + $0x8] sm:$0xff] }
 0x210   : > { %v2702_v5 = vpop.f32.mrf.mxu1  ;;  %3589 = vmatpush.bf16.msra.mxu3 %v5072_v11 }
 0x211   : > { %v2703_v7 = vadd.f32 %v2702_v5, %v2689_v28  ;;  %v2691_v18 = vadd.f32 %v2690_v38, %v2677_v8  ;;  %v5084_v5 = vld [vmem:[%s6623_s5 + $0x68] sm:$0xff] }
 0x212   : > { %v5100_v38 = vld [vmem:[%s6623_s5 + $0xe8] sm:$0xff]  ;;  %3598 = vmatpush.bf16.msra.mxu0 %v5084_v5 }
 0x213   : > { %3624 = vmatpush.bf16.msrb.mxu2 %v5100_v38 }
 0x215   : > { %v2746_v27 = vpop.f32.mrf.mxu0 }
 0x216   : > { %v2716_v63 = vpop.f32.mrf.mxu2 }
 0x217   : > { %v2717_v1 = vadd.f32 %v2716_v63, %v2703_v7  ;;  %v2730_v53 = vpop.f32.mrf.mxu3 }
 0x218   : > { %v2704_v41 = vpop.f32.mrf.mxu1 }
 0x219   : > { %v2731_v57 = vadd.f32 %v2730_v53, %v2717_v1  ;;  %v2705_v45 = vadd.f32 %v2704_v41, %v2691_v18  ;;  %v5083_v1 = vld [vmem:[%s6623_s5 + $0x60] sm:$0xff] }
 0x21a   : > { %v5091_v53 = vld [vmem:[%s6623_s5 + $0xa0] sm:$0xff]  ;;  %3599 = vmatpush.bf16.msra.mxu0 %v5083_v1  ;;  %v5108_v1 = vld [vmem:[%s6623_s5 + $0x128] sm:$0xff] }
 0x21b   : > { %v2745_v15 = vadd.f32 %v2744_v34, %v2731_v57  ;;  %3612 = vmatpush.bf16.msrb.mxu1 %v5091_v53 }
 0x21e   : > { %v2718_v12 = vpop.f32.mrf.mxu2 }
 0x21f   : > { %v2719_v42 = vadd.f32 %v2718_v12, %v2705_v45  ;;  %v2732_v50 = vpop.f32.mrf.mxu3  ;;  %v5099_v12 = vld [vmem:[%s6623_s5 + $0xe0] sm:$0xff] }
 0x220   : > { %v2758_v43 = vpop.f32.mrf.mxu1  ;;  %3625 = vmatpush.bf16.msrb.mxu2 %v5099_v12 }
 0x221   : > { %v2759_v55 = vadd.f32 %v2758_v43, %v2745_v15  ;;  %v2733_v56 = vadd.f32 %v2732_v50, %v2719_v42  ;;  %v2932_v15 = vrot.slane %v5321_v24, 7 }
 0x223   : > { %v2747_v4 = vadd.f32 %v2746_v27, %v2733_v56  ;;  %v5071_v27 = vld [vmem:[%s6623_s5] sm:$0xff]  ;;  %v2947_v40 = vsel %vm436_vm0, %v5321_v24, %v2932_v15  ;;  %v5081_v24 = vld [vmem:[%s6623_s5 + $0x50] sm:$0xff] }
 0x224   : > { %3590 = vmatpush.bf16.msra.mxu3 %v5071_v27  ;;  %v5087_v15 = vld [vmem:[%s6623_s5 + $0x80] sm:$0xff] }
 0x227   : > { %v2772_v54 = vpop.f32.mrf.mxu2 }
 0x228   : > { %v2773_v44 = vadd.f32 %v2772_v54, %v2759_v55  ;;  %v2760_v17 = vpop.f32.mrf.mxu1 }
 0x229   : > { %v2761_v62 = vadd.f32 %v2760_v17, %v2747_v4  ;;  %v5082_v17 = vld [vmem:[%s6623_s5 + $0x58] sm:$0xff] }
 0x22a   : > { %v2777_v37 = vmax.f32 %v2773_v44, 0.0  ;;  %3600 = vmatpush.bf16.msra.mxu0 %v5082_v17 }
 0x22c   : > { %v2786_v6 = vpack.c.bf16 %v2777_v37, %v2777_v37  ;;  %v2780_v20 = vmul.f32 %v2779_v59, %v2777_v37 }
 0x22e   : > { %v2790_v48 = vrot.slane %v2786_v6, 2  ;;  %2782 = vadd.xlane.f32.xlu2 %v2780_v20  ;;  %3601 = vmatpush.bf16.msra.mxu0 %v5081_v24 }
 0x22f   : > { %v2774_v51 = vpop.f32.mrf.mxu2 }
 0x230   : > { %v2794_v9 = vsel %vm1657_vm2, %v2786_v6, %v2790_v48  ;;  %v2796_v32 = vsel %vm2795_vm11, %v2786_v6, %v2790_v48  ;;  %v2775_v29 = vadd.f32 %v2774_v51, %v2761_v62  ;;  %v6639_v6 = vld [vmem:[#allocation2_spill] sm:$0xff]  ;;  %v5090_v51 = vld [vmem:[%s6623_s5 + $0x98] sm:$0xff] }
 0x231   : > { %v2798_v25 = vrot.slane %v2796_v32, 2  ;;  %2805 = vst [vmem:[#allocation1] ss:$4 sm:$0xff] %v2794_v9  ;;  %v2933_v4 = vrot.slane %v6639_v6, 6  ;;  %v5098_v9 = vld [vmem:[%s6623_s5 + $0xd8] sm:$0xff]  ;;  %3613 = vmatpush.bf16.msrb.mxu1 %v5090_v51 }
 0x232   : > { %v2778_v52 = vmax.f32 %v2775_v29, 0.0  ;;  %v5110_v32 = vld [vmem:[%s6623_s5 + $0x138] sm:$0xff]  ;;  %3626 = vmatpush.bf16.msrb.mxu2 %v5098_v9 }
 0x233   : > { %2809 = vst [vmem:[#allocation1 + $0x20] ss:$4 sm:$0xff] %v2798_v25  ;;  %3635 = vmatpush.bf16.msrb.mxu3 %v5110_v32  ;;  %v5134_v6 = vld [vmem:[%s6623_s5 + $0x1f8] sm:$0xff] }
 0x234   : > { %v2787_v60 = vpack.c.bf16 %v2778_v52, %v2778_v52  ;;  %v2781_v2 = vmul.f32 %v2779_v59, %v2778_v52  ;;  %v5106_v32 = vld [vmem:[%s6623_s5 + $0x118] sm:$0xff] }
 0x235   : > { %3614 = vmatpush.bf16.msrb.mxu1 %v5089_v58  ;;  %v5105_v58 = vld [vmem:[%s6623_s5 + $0x110] sm:$0xff] }
 0x236   : > { %v2791_v14 = vrot.slane %v2787_v60, 2  ;;  %2784 = vadd.xlane.f32.xlu0 %v2781_v2  ;;  %3627 = vmatpush.bf16.msrb.mxu2 %v5097_v35 }
 0x238   : > { %v2806_v61 = vld.sshfl [vmem:[#allocation1] sm:$0xff pattern:$0x73625140]  ;;  %v2801_v49 = vsel %vm1657_vm2, %v2787_v60, %v2791_v14  ;;  %v2802_v46 = vsel %vm2795_vm11, %v2787_v60, %v2791_v14 }
 0x239   : > { %v2816_v47 = vshrl.u32 %v2806_v61, 16  ;;  %v2804_v33 = vrot.slane %v2802_v46, 2  ;;  %2811 = vst [vmem:[#allocation1] ss:$4 sm:$0xff] %v2801_v49  ;;  %v2819_v30 = vshll.u32 %v2806_v61, 16 }
 0x23a   : > { %v2810_v3 = vld.sshfl [vmem:[#allocation1 + $0x20] sm:$0xff pattern:$0x73625140] }
 0x23b   : > { %v2822_v31 = vshrl.u32 %v2810_v3, 16  ;;  %v2818_v39 = vrot.slane %v2816_v47, 7  ;;  %2814 = vst [vmem:[#allocation1 + $0x20] ss:$4 sm:$0xff] %v2804_v33  ;;  %v2825_v63 = vshll.u32 %v2810_v3, 16  ;;  %v5109_v47 = vld [vmem:[%s6623_s5 + $0x130] sm:$0xff] }
 0x23c   : > { %3636 = vmatpush.bf16.msrb.mxu3 %v5109_v47  ;;  %v5104_v47 = vld [vmem:[%s6623_s5 + $0x108] sm:$0xff] }
 0x23d   : > { %v2821_v28 = vor.u32 %v2819_v30, %v2818_v39  ;;  %v2824_v41 = vrot.slane %v2822_v31, 7 }
 0x23f   : > { %v2827_v7 = vor.u32 %v2825_v63, %v2824_v41  ;;  %v2844_v8 = vsel %vm5314_vm4, 0, %v2821_v28  ;;  %v5080_v63 = vld [vmem:[%s6623_s5 + $0x48] sm:$0xff] }
 0x240   : > { %v2851_v18 = vsel %vm6335_vm14, %v2844_v8, 0  ;;  %v2812_v57 = vld.sshfl [vmem:[#allocation1] sm:$0xff pattern:$0x73625140]  ;;  %v5088_v28 = vld [vmem:[%s6623_s5 + $0x88] sm:$0xff]  ;;  %3602 = vmatpush.bf16.msra.mxu0 %v5080_v63  ;;  %3637 = vmatpush.bf16.msrb.mxu3 %v5108_v1 }
 0x241   : > { %v2845_v34 = vsel %vm5314_vm4, 0, %v2827_v7  ;;  %v2872_v43 = vshll.u32 %v2851_v18, 16  ;;  %v2883_v45 = vshrl.u32 %v2851_v18, 16  ;;  %v2891_v42 = vrot.slane %v2851_v18, 1  ;;  %v5096_v41 = vld [vmem:[%s6623_s5 + $0xc8] sm:$0xff]  ;;  %3615 = vmatpush.bf16.msrb.mxu1 %v5088_v28 }
 0x242   : > { %v6360_v55 = vsel %vm6335_vm14, %v2845_v34, 0  ;;  %v2815_v50 = vld.sshfl [vmem:[#allocation1 + $0x20] sm:$0xff pattern:$0x73625140]  ;;  %v2828_v54 = vshrl.u32 %v2812_v57, 16  ;;  %v2831_v60 = vshll.u32 %v2812_v57, 16  ;;  %3628 = vmatpush.bf16.msrb.mxu2 %v5096_v41 }
 0x243   : > { %v2856_v56 = vshll.u32 %v6360_v55, 16  ;;  %v2861_v44 = vshrl.u32 %v6360_v55, 16  ;;  %v2865_v59 = vrot.slane %v6360_v55, 1  ;;  %v2874_v37 = vrot.slane %v2872_v43, 1 }
 0x244   : > { %v2895_v20 = vsel %vm5314_vm4, %v2883_v45, %v2891_v42  ;;  %v2897_v48 = vrot.slane %v2872_v43, 2  ;;  %v2830_v62 = vrot.slane %v2828_v54, 7  ;;  %v2834_v19 = vshrl.u32 %v2815_v50, 16 }
 0x245   : > { %v2858_v29 = vrot.slane %v2856_v56, 1  ;;  %v6387_v25 = vsel %vm5314_vm4, %v2861_v44, %v2865_v59  ;;  %v2881_v52 = vsel %vm5314_vm4, %v2851_v18, %v2874_v37  ;;  %v2935_v26 = vrot.slane %v2895_v20, 4  ;;  %v5107_v44 = vld [vmem:[%s6623_s5 + $0x120] sm:$0xff]  ;;  %v5126_v37 = vld [vmem:[%s6623_s5 + $0x1b8] sm:$0xff]  ;;  %3616 = vmatpush.bf16.msrb.mxu1 %v5087_v15  ;;  %v5128_v15 = vld [vmem:[%s6623_s5 + $0x1c8] sm:$0xff] }
 0x246   : > { %v2901_v10 = vsel %vm5314_vm4, %v2891_v42, %v2897_v48  ;;  %v2934_v23 = vrot.slane %v2881_v52, 5  ;;  %v2938_v49 = vrot.slane %v6387_v25, 1  ;;  %v2833_v2 = vor.u32 %v2831_v60, %v2830_v62  ;;  %v5079_v42 = vld [vmem:[%s6623_s5 + $0x40] sm:$0xff]  ;;  %3638 = vmatpush.bf16.msrb.mxu3 %v5107_v44  ;;  %v5125_v52 = vld [vmem:[%s6623_s5 + $0x1b0] sm:$0xff] }
 0x247   : > { %v6398_v14 = vsel %vm5314_vm4, %v6360_v55, %v2858_v29  ;;  %v2936_v13 = vrot.slane %v2901_v10, 3  ;;  %v2836_v3 = vrot.slane %v2834_v19, 7  ;;  %v2837_v31 = vshll.u32 %v2815_v50, 16  ;;  %v5095_v55 = vld [vmem:[%s6623_s5 + $0xc0] sm:$0xff]  ;;  %3603 = vmatpush.bf16.msra.mxu0 %v5079_v42  ;;  %v5133_v19 = vld [vmem:[%s6623_s5 + $0x1f0] sm:$0xff]  ;;  %v5120_v42 = vld [vmem:[%s6623_s5 + $0x188] sm:$0xff] }
 0x248   : > { %v2937_v61 = vrot.slane %v6398_v14, 2  ;;  %v2951_v46 = vsel %vm2948_vm15, %v2933_v4, %v2934_v23  ;;  %v2846_v39 = vsel %vm5314_vm4, 0, %v2833_v2  ;;  %v2868_v5 = vrot.slane %v2856_v56, 2  ;;  %3629 = vmatpush.bf16.msrb.mxu2 %v5095_v55  ;;  %v5140_v55 = vld [vmem:[%s6623_s5 + $0x228] sm:$0xff] }
 0x249   : > { %v2952_v33 = vsel %vm1657_vm2, %v2947_v40, %v2951_v46  ;;  %v2956_v36 = vsel %vm2953_vm1, %v2935_v26, %v2936_v13  ;;  %v2853_v38 = vsel %vm6335_vm14, %v2846_v39, 0  ;;  %v2839_v7 = vor.u32 %v2837_v31, %v2836_v3  ;;  %3661 = vmatpush.bf16.msra.mxu1 %v5126_v37  ;;  %v5132_v46 = vld [vmem:[%s6623_s5 + $0x1e8] sm:$0xff]  ;;  %v5123_v3 = vld [vmem:[%s6623_s5 + $0x1a0] sm:$0xff]  ;;  %v5114_v39 = vld [vmem:[%s6623_s5 + $0x158] sm:$0xff] }
 0x24a   : > { %v2960_v30 = vsel %vm2957_vm3, %v2937_v61, %v2938_v49  ;;  %v2876_v8 = vshll.u32 %v2853_v38, 16  ;;  %v2885_v53 = vshrl.u32 %v2853_v38, 16  ;;  %v2892_v57 = vrot.slane %v2853_v38, 1  ;;  %3639 = vmatpush.bf16.msrb.mxu3 %v5106_v32  ;;  %v5124_v49 = vld [vmem:[%s6623_s5 + $0x1a8] sm:$0xff]  ;;  %v5127_v37 = vld [vmem:[%s6623_s5 + $0x1c0] sm:$0xff] }
 0x24b   : > { %v2961_v0 = vsel %vm1975_vm9, %v2956_v36, %v2960_v30  ;;  %v2847_v12 = vsel %vm5314_vm4, 0, %v2839_v7  ;;  %v6442_v43 = vsel %vm5314_vm4, %v2865_v59, %v2868_v5  ;;  %v5118_v59 = vld [vmem:[%s6623_s5 + $0x178] sm:$0xff]  ;;  %v2939_v48 = vrot.slane %v6387_v25, 7  ;;  %v5117_v25 = vld [vmem:[%s6623_s5 + $0x170] sm:$0xff]  ;;  %v5131_v36 = vld [vmem:[%s6623_s5 + $0x1e0] sm:$0xff] }
 0x24c   : > { %v2962_v11 = vsel %vm1979_vm10, %v2952_v33, %v2961_v0  ;;  %v2878_v18 = vrot.slane %v2876_v8, 1  ;;  %v2898_v34 = vrot.slane %v2876_v8, 2  ;;  %v6446_v45 = vsel %vm6335_vm14, %v2847_v12, 0  ;;  %3648 = vmatpush.bf16.msrb.mxu0 %v5118_v59  ;;  %3674 = vmatpush.bf16.msra.mxu2 %v5134_v6  ;;  %v5115_v33 = vld [vmem:[%s6623_s5 + $0x160] sm:$0xff]  ;;  %v5122_v5 = vld [vmem:[%s6623_s5 + $0x198] sm:$0xff] }
 0x24d   : > { %3126 = vst [vmem:[#allocation1] ss:$9 sm:$0xff] %v2962_v11  ;;  %v2904_v54 = vshll.u32 %v6446_v45, 16  ;;  %v2909_v56 = vshrl.u32 %v6446_v45, 16  ;;  %v2913_v27 = vrot.slane %v6446_v45, 1  ;;  %v2896_v4 = vsel %vm5314_vm4, %v2885_v53, %v2892_v57  ;;  %3662 = vmatpush.bf16.msra.mxu1 %v5125_v52  ;;  %v5103_v30 = vld [vmem:[%s6623_s5 + $0x100] sm:$0xff] }
 0x24e   : > { %v2882_v50 = vsel %vm5314_vm4, %v2853_v38, %v2878_v18  ;;  %v2902_v16 = vsel %vm5314_vm4, %v2892_v57, %v2898_v34  ;;  %v2940_v62 = vrot.slane %v6442_v43, 6  ;;  %v2942_v40 = vrot.slane %v2896_v4, 4  ;;  %3640 = vmatpush.bf16.msrb.mxu3 %v5105_v58  ;;  %v5130_v0 = vld [vmem:[%s6623_s5 + $0x1d8] sm:$0xff]  ;;  %v5113_v18 = vld [vmem:[%s6623_s5 + $0x150] sm:$0xff]  ;;  %v5119_v59 = vld [vmem:[%s6623_s5 + $0x180] sm:$0xff] }
 0x24f   : > { %v2941_v17 = vrot.slane %v2882_v50, 5  ;;  %v2906_v20 = vrot.slane %v2904_v54, 1  ;;  %v2915_v51 = vsel %vm5314_vm4, %v2909_v56, %v2913_v27  ;;  %v2943_v9 = vrot.slane %v2902_v16, 3  ;;  %v5142_v53 = vld [vmem:[%s6623_s5 + $0x238] sm:$0xff]  ;;  %v5121_v57 = vld [vmem:[%s6623_s5 + $0x190] sm:$0xff]  ;;  %v5111_v56 = vld [vmem:[%s6623_s5 + $0x140] sm:$0xff] }
 0x250   : > { %v2945_v23 = vrot.slane %v2915_v51, 1  ;;  %v2965_v26 = vsel %vm436_vm0, %v6398_v14, %v2939_v48  ;;  %3649 = vmatpush.bf16.msrb.mxu0 %v5117_v25  ;;  %3675 = vmatpush.bf16.msra.mxu2 %v5133_v19  ;;  %v5116_v14 = vld [vmem:[%s6623_s5 + $0x168] sm:$0xff]  ;;  %v2916_v31 = vrot.slane %v2904_v54, 2  ;;  %v5141_v34 = vld [vmem:[%s6623_s5 + $0x230] sm:$0xff]  ;;  %vm3979_vm0 = vcmask 24576  }
 0x251   : > { %v2908_v29 = vsel %vm5314_vm4, %v6446_v45, %v2906_v20  ;;  %v2968_v60 = vsel %vm2948_vm15, %v2940_v62, %v2941_v17  ;;  %v2972_v13 = vsel %vm2953_vm1, %v2942_v40, %v2943_v9  ;;  %3663 = vmatpush.bf16.msra.mxu1 %v5124_v49  ;;  %v5112_v45 = vld [vmem:[%s6623_s5 + $0x148] sm:$0xff]  ;;  %v5139_v17 = vld [vmem:[%s6623_s5 + $0x220] sm:$0xff]  ;;  %v5138_v62 = vld [vmem:[%s6623_s5 + $0x218] sm:$0xff] }
 0x252   : > { %v2944_v10 = vrot.slane %v2908_v29, 2  ;;  %v2969_v35 = vsel %vm1657_vm2, %v2965_v26, %v2968_v60  ;;  %3641 = vmatpush.bf16.msrb.mxu3 %v5104_v47  ;;  %v2918_v12 = vsel %vm5314_vm4, %v2913_v27, %v2916_v31  ;;  %v5137_v51 = vld [vmem:[%s6623_s5 + $0x210] sm:$0xff]  ;;  %v5136_v29 = vld [vmem:[%s6623_s5 + $0x208] sm:$0xff]  ;;  %vm3886_vm2 = vcmask 130112  }
 0x253   : > { %vm3890_vm4 = vcmask 195712  }
 0x254   : > { %v2975_v24 = vsel %vm2957_vm3, %v2944_v10, %v2945_v23  ;;  %3650 = vmatpush.bf16.msrb.mxu0 %v5116_v14  ;;  %3676 = vmatpush.bf16.msra.mxu2 %v5132_v46  ;;  %v5135_v23 = vld [vmem:[%s6623_s5 + $0x200] sm:$0xff] }
 0x255   : > { %v2976_v61 = vsel %vm1975_vm9, %v2972_v13, %v2975_v24  ;;  %3664 = vmatpush.bf16.msra.mxu1 %v5123_v3  ;;  %v1483_v24 = vpop.xlane.xlu1 %1482  ;;  %vm3966_vm9 = vcmask 654912  }
 0x256   : > { %v2977_v2 = vsel %vm1979_vm10, %v2969_v35, %v2976_v61  ;;  %3642 = vmatpush.bf16.msrb.mxu3 %v5103_v30  ;;  %v3730_v58 = vperm.slane %v1483_v24, 0  ;;  %v3731_v35 = vperm.slane %v1483_v24, 1  ;;  %v3732_v14 = vperm.slane %v1483_v24, 2 }
 0x257   : > { %3128 = vst [vmem:[#allocation1 + $0x1] ss:$9 sm:$0xff] %v2977_v2  ;;  %v3733_v49 = vperm.slane %v1483_v24, 3  ;;  %v3734_v46 = vperm.slane %v1483_v24, 4  ;;  %v3735_v2 = vperm.slane %v1483_v24, 5  ;;  %v3736_v47 = vperm.slane %v1483_v24, 6 }
 0x258   : > { %3651 = vmatpush.bf16.msrb.mxu0 %v5115_v33  ;;  %3677 = vmatpush.bf16.msra.mxu2 %v5131_v36  ;;  %v3737_v33 = vperm.slane %v1483_v24, 7 }
 0x259   : > { %3665 = vmatpush.bf16.msra.mxu1 %v5122_v5 }
 0x25c   : > { %3652 = vmatpush.bf16.msrb.mxu0 %v5114_v39  ;;  %3678 = vmatpush.bf16.msra.mxu2 %v5130_v0 }
 0x25d   : > { %3666 = vmatpush.bf16.msra.mxu1 %v5121_v57  ;;  %v1485_v3 = vpop.xlane.xlu1 %1484 }
 0x25e   : > { %v3129_v38 = vld [vmem:[#allocation1] sm:$0xff]  ;;  %v3130_v63 = vld [vmem:[#allocation1 + $0x9] sm:$0xff]  ;;  %v3131_v28 = vld [vmem:[#allocation1 + $0x12] sm:$0xff]  ;;  %v3742_v36 = vperm.slane %v1485_v3, 4  ;;  %v3738_v30 = vperm.slane %v1485_v3, 0  ;;  %v3739_v39 = vperm.slane %v1485_v3, 1 }
 0x25f   : > { %v3132_v41 = vld [vmem:[#allocation1 + $0x1b] sm:$0xff]  ;;  %v3133_v11 = vld [vmem:[#allocation1 + $0x24] sm:$0xff]  ;;  %v3134_v7 = vld [vmem:[#allocation1 + $0x2d] sm:$0xff]  ;;  %3591 = vmatmul.bf16.vlgmr.msra.gmra.mxu3 %v3129_v38  ;;  %3604 = vmatmul.bf16.vlgmr.msra.gmra.mxu0 %v3130_v63  ;;  %v3740_v5 = vperm.slane %v1485_v3, 2  ;;  %v3741_v0 = vperm.slane %v1485_v3, 3  ;;  %v3743_v38 = vperm.slane %v1485_v3, 5 }
 0x260   : > { %v3135_v8 = vld [vmem:[#allocation1 + $0x36] sm:$0xff]  ;;  %v3136_v1 = vld [vmem:[#allocation1 + $0x3f] sm:$0xff]  ;;  %3617 = vmatmul.bf16.vlgmr.msrb.gmra.mxu1 %v3131_v28  ;;  %3630 = vmatmul.bf16.vlgmr.msrb.gmra.mxu2 %v3132_v41  ;;  %v3744_v63 = vperm.slane %v1485_v3, 6  ;;  %v3745_v28 = vperm.slane %v1485_v3, 7  ;;  %v1487_v41 = vpop.xlane.xlu2 %1486 }
 0x261   : > { %3138 = vst [vmem:[#allocation1] ss:$9 sm:$0xff] %v6442_v43  ;;  %3687 = vmatpush.bf16.msra.mxu3 %v5142_v53  ;;  %v1479_v43 = vpop.xlane.xlu0 %1478  ;;  %3653 = vmatpush.bf16.msrb.mxu0 %v5113_v18  ;;  %v3749_v53 = vperm.slane %v1487_v41, 3  ;;  %v3751_v18 = vperm.slane %v1487_v41, 5  ;;  %v3752_v57 = vperm.slane %v1487_v41, 6 }
 0x262   : > { %3140 = vst [vmem:[#allocation1 + $0x1] ss:$9 sm:$0xff] %v2918_v12  ;;  %3679 = vmatpush.bf16.msra.mxu2 %v5129_v22  ;;  %v3714_v50 = vperm.slane %v1479_v43, 0  ;;  %v3715_v16 = vperm.slane %v1479_v43, 1  ;;  %v3716_v44 = vperm.slane %v1479_v43, 2  ;;  %3667 = vmatpush.bf16.msra.mxu1 %v5120_v42  ;;  %v3717_v27 = vperm.slane %v1479_v43, 3 }
 0x263   : > { %v3718_v6 = vperm.slane %v1479_v43, 4  ;;  %v3719_v4 = vperm.slane %v1479_v43, 5  ;;  %v3720_v20 = vperm.slane %v1479_v43, 6  ;;  %v3721_v48 = vperm.slane %v1479_v43, 7 }
 0x264   : > { %v3750_v12 = vperm.slane %v1487_v41, 4  ;;  %v3753_v22 = vperm.slane %v1487_v41, 7 }
 0x265   : > { %3688 = vmatpush.bf16.msra.mxu3 %v5141_v34  ;;  %3654 = vmatpush.bf16.msrb.mxu0 %v5112_v45 }
 0x266   : > { %3680 = vmatpush.bf16.msra.mxu2 %v5128_v15  ;;  %3668 = vmatpush.bf16.msra.mxu1 %v5119_v59 }
 0x268   : > { %v1489_v34 = vpop.xlane.xlu2 %1488 }
 0x269   : > { %v3141_v54 = vld [vmem:[#allocation1] sm:$0xff]  ;;  %3689 = vmatpush.bf16.msra.mxu3 %v5140_v55  ;;  %3655 = vmatpush.bf16.msrb.mxu0 %v5111_v56  ;;  %v1481_v9 = vpop.xlane.xlu0 %1480  ;;  %v3754_v43 = vperm.slane %v1489_v34, 0  ;;  %v3755_v45 = vperm.slane %v1489_v34, 1  ;;  %v3756_v15 = vperm.slane %v1489_v34, 2  ;;  %v3757_v55 = vperm.slane %v1489_v34, 3 }
 0x26a   : > { %3778 = vst [vmem:[#allocation1] ss:$9 sm:$0xff] %v3714_v50  ;;  %3681 = vmatpush.bf16.msra.mxu2 %v5127_v37  ;;  %v3722_v32 = vperm.slane %v1481_v9, 0  ;;  %v3723_v25 = vperm.slane %v1481_v9, 1  ;;  %v3724_v19 = vperm.slane %v1481_v9, 2  ;;  %v3725_v40 = vperm.slane %v1481_v9, 3 }
 0x26b   : > { %3780 = vst [vmem:[#allocation1 + $0x1] ss:$9 sm:$0xff] %v3715_v16  ;;  %v3726_v10 = vperm.slane %v1481_v9, 4  ;;  %v3727_v60 = vperm.slane %v1481_v9, 5  ;;  %v3728_v26 = vperm.slane %v1481_v9, 6  ;;  %v3729_v13 = vperm.slane %v1481_v9, 7 }
 0x26c   : > { %3782 = vst [vmem:[#allocation1 + $0x2] ss:$9 sm:$0xff] %v3716_v44  ;;  %v3758_v50 = vperm.slane %v1489_v34, 4  ;;  %v3759_v16 = vperm.slane %v1489_v34, 5  ;;  %v3761_v56 = vperm.slane %v1489_v34, 7 }
 0x26d   : > { %3784 = vst [vmem:[#allocation1 + $0x3] ss:$9 sm:$0xff] %v3717_v27  ;;  %3690 = vmatpush.bf16.msra.mxu3 %v5139_v17 }
 0x26e   : > { %3786 = vst [vmem:[#allocation1 + $0x4] ss:$9 sm:$0xff] %v3718_v6 }
 0x26f   : > { %3788 = vst [vmem:[#allocation1 + $0x5] ss:$9 sm:$0xff] %v3719_v4  ;;  %3643 = vmatmul.bf16.vlgmr.msrb.gmra.mxu3 %v3133_v11  ;;  %3656 = vmatmul.bf16.vlgmr.msrb.gmra.mxu0 %v3134_v7  ;;  %v3746_v11 = vperm.slane %v1487_v41, 0  ;;  %v3747_v7 = vperm.slane %v1487_v41, 1 }
 0x270   : > { %3790 = vst [vmem:[#allocation1 + $0x6] ss:$9 sm:$0xff] %v3720_v20  ;;  %3669 = vmatmul.bf16.vlgmr.msra.gmra.mxu1 %v3135_v8  ;;  %3682 = vmatmul.bf16.vlgmr.msra.gmra.mxu2 %v3136_v1  ;;  %v3748_v1 = vperm.slane %v1487_v41, 2 }
 0x271   : > { %3792 = vst [vmem:[#allocation1 + $0x7] ss:$9 sm:$0xff] %v3721_v48  ;;  %3691 = vmatpush.bf16.msra.mxu3 %v5138_v62  ;;  %v1491_v44 = vpop.xlane.xlu0 %1490 }
 0x272   : > { %v3762_v59 = vperm.slane %v1491_v44, 0  ;;  %v3763_v37 = vperm.slane %v1491_v44, 1  ;;  %v3764_v17 = vperm.slane %v1491_v44, 2  ;;  %v3765_v6 = vperm.slane %v1491_v44, 3 }
 0x273   : > { %v3766_v4 = vperm.slane %v1491_v44, 4  ;;  %v3767_v20 = vperm.slane %v1491_v44, 5  ;;  %v3768_v48 = vperm.slane %v1491_v44, 6  ;;  %v3769_v62 = vperm.slane %v1491_v44, 7 }
 0x275   : > { %3692 = vmatpush.bf16.msra.mxu3 %v5137_v51  ;;  %v1493_v51 = vpop.xlane.xlu1 %1492 }
 0x276   : > { %v3770_v9 = vperm.slane %v1493_v51, 0 }
 0x278   : > { %v3793_v52 = vld [vmem:[#allocation1] sm:$0xff] }
 0x279   : > { %3794 = vst [vmem:[#allocation1] ss:$9 sm:$0xff] %v3722_v32  ;;  %3858 = vperm.xlu2 %5171, %v3793_v52   ;;  %3693 = vmatpush.bf16.msra.mxu3 %v5136_v29  ;;  %v3771_v32 = vperm.slane %v1493_v51, 1  ;;  %v3773_v52 = vperm.slane %v1493_v51, 3 }
 0x27a   : > { %3795 = vst [vmem:[#allocation1 + $0x1] ss:$9 sm:$0xff] %v3723_v25  ;;  %v3772_v25 = vperm.slane %v1493_v51, 2 }
 0x27b   : > { %3796 = vst [vmem:[#allocation1 + $0x2] ss:$9 sm:$0xff] %v3724_v19  ;;  %v3774_v19 = vperm.slane %v1493_v51, 4 }
 0x27c   : > { %3797 = vst [vmem:[#allocation1 + $0x3] ss:$9 sm:$0xff] %v3725_v40  ;;  %v3775_v40 = vperm.slane %v1493_v51, 5 }
 0x27d   : > { %3798 = vst [vmem:[#allocation1 + $0x4] ss:$9 sm:$0xff] %v3726_v10  ;;  %3694 = vmatpush.bf16.msra.mxu3 %v5135_v23  ;;  %v3776_v10 = vperm.slane %v1493_v51, 6  ;;  %v3777_v23 = vperm.slane %v1493_v51, 7 }
 0x27e   : > { %3799 = vst [vmem:[#allocation1 + $0x5] ss:$9 sm:$0xff] %v3727_v60 }
 0x27f   : > { %3800 = vst [vmem:[#allocation1 + $0x6] ss:$9 sm:$0xff] %v3728_v26 }
 0x280   : > { %3801 = vst [vmem:[#allocation1 + $0x7] ss:$9 sm:$0xff] %v3729_v13  ;;  %3695 = vmatmul.bf16.vlgmr.msra.gmra.mxu3 %v3141_v54  ;;  %v3760_v54 = vperm.slane %v1489_v34, 6 }
 0x287   : > { %v3802_v61 = vld [vmem:[#allocation1] sm:$0xff] }
 0x288   : > { %3803 = vst [vmem:[#allocation1] ss:$9 sm:$0xff] %v3730_v58  ;;  %3861 = vperm.xlu0 %5172, %v3802_v61  }
 0x289   : > { %3804 = vst [vmem:[#allocation1 + $0x1] ss:$9 sm:$0xff] %v3731_v35 }
 0x28a   : > { %3805 = vst [vmem:[#allocation1 + $0x2] ss:$9 sm:$0xff] %v3732_v14 }
 0x28b   : > { %3806 = vst [vmem:[#allocation1 + $0x3] ss:$9 sm:$0xff] %v3733_v49 }
 0x28c   : > { %3807 = vst [vmem:[#allocation1 + $0x4] ss:$9 sm:$0xff] %v3734_v46 }
 0x28d   : > { %3808 = vst [vmem:[#allocation1 + $0x5] ss:$9 sm:$0xff] %v3735_v2 }
 0x28e   : > { %3809 = vst [vmem:[#allocation1 + $0x6] ss:$9 sm:$0xff] %v3736_v47 }
 0x28f   : > { %3810 = vst [vmem:[#allocation1 + $0x7] ss:$9 sm:$0xff] %v3737_v33 }
 0x296   : > { %v3811_v31 = vld [vmem:[#allocation1] sm:$0xff] }
 0x297   : > { %3816 = vst [vmem:[#allocation1 + $0x4] ss:$9 sm:$0xff] %v3742_v36  ;;  %3864 = vperm.xlu1 %5173, %v3811_v31  }
 0x298   : > { %3812 = vst [vmem:[#allocation1] ss:$9 sm:$0xff] %v3738_v30 }
 0x299   : > { %3813 = vst [vmem:[#allocation1 + $0x1] ss:$9 sm:$0xff] %v3739_v39 }
 0x29a   : > { %3814 = vst [vmem:[#allocation1 + $0x2] ss:$9 sm:$0xff] %v3740_v5 }
 0x29b   : > { %3815 = vst [vmem:[#allocation1 + $0x3] ss:$9 sm:$0xff] %v3741_v0 }
 0x29c   : > { %3817 = vst [vmem:[#allocation1 + $0x5] ss:$9 sm:$0xff] %v3743_v38 }
 0x29d   : > { %3818 = vst [vmem:[#allocation1 + $0x6] ss:$9 sm:$0xff] %v3744_v63 }
 0x29e   : > { %3819 = vst [vmem:[#allocation1 + $0x7] ss:$9 sm:$0xff] %v3745_v28 }
 0x2a1   : > { %v2783_v60 = vpop.xlane.xlu2 %2782 }
 0x2a2   : > { %v3915_v26 = vperm.slane %v2783_v60, 0  ;;  %v3916_v13 = vperm.slane %v2783_v60, 1  ;;  %v3917_v24 = vperm.slane %v2783_v60, 2  ;;  %v3918_v35 = vperm.slane %v2783_v60, 3 }
 0x2a3   : > { %v3919_v49 = vperm.slane %v2783_v60, 4  ;;  %v3920_v2 = vperm.slane %v2783_v60, 5  ;;  %v3921_v33 = vperm.slane %v2783_v60, 6  ;;  %v3922_v3 = vperm.slane %v2783_v60, 7 }
 0x2a5   : > { %v3820_v8 = vld [vmem:[#allocation1] sm:$0xff] }
 0x2a6   : > { %3867 = vperm.xlu2 %5171, %v3820_v8   ;;  %3821 = vst [vmem:[#allocation1] ss:$9 sm:$0xff] %v3746_v11 }
 0x2a7   : > { %3822 = vst [vmem:[#allocation1 + $0x1] ss:$9 sm:$0xff] %v3747_v7 }
 0x2a8   : > { %3823 = vst [vmem:[#allocation1 + $0x2] ss:$9 sm:$0xff] %v3748_v1 }
 0x2a9   : > { %3824 = vst [vmem:[#allocation1 + $0x3] ss:$9 sm:$0xff] %v3749_v53  ;;  %v2785_v31 = vpop.xlane.xlu0 %2784 }
 0x2aa   : > { %3825 = vst [vmem:[#allocation1 + $0x4] ss:$9 sm:$0xff] %v3750_v12  ;;  %v3923_v0 = vperm.slane %v2785_v31, 0  ;;  %v3924_v38 = vperm.slane %v2785_v31, 1  ;;  %v3925_v63 = vperm.slane %v2785_v31, 2  ;;  %v3926_v28 = vperm.slane %v2785_v31, 3 }
 0x2ab   : > { %3826 = vst [vmem:[#allocation1 + $0x5] ss:$9 sm:$0xff] %v3751_v18  ;;  %v3927_v7 = vperm.slane %v2785_v31, 4  ;;  %v3928_v1 = vperm.slane %v2785_v31, 5  ;;  %v3929_v53 = vperm.slane %v2785_v31, 6 }
 0x2ac   : > { %3827 = vst [vmem:[#allocation1 + $0x6] ss:$9 sm:$0xff] %v3752_v57  ;;  %v5176_v12 = vld [vmem:[%s6624_s6] ss:$0 sm:$0xff]  ;;  %v3930_v57 = vperm.slane %v2785_v31, 7 }
 0x2ad   : > { %3828 = vst [vmem:[#allocation1 + $0x7] ss:$9 sm:$0xff] %v3753_v22 }
 0x2b4   : > { %v3829_v42 = vld [vmem:[#allocation1] sm:$0xff] }
 0x2b5   : > { %3870 = vperm.xlu2 %5171, %v3829_v42   ;;  %3830 = vst [vmem:[#allocation1] ss:$9 sm:$0xff] %v3754_v43 }
 0x2b6   : > { %3831 = vst [vmem:[#allocation1 + $0x1] ss:$9 sm:$0xff] %v3755_v45 }
 0x2b7   : > { %3832 = vst [vmem:[#allocation1 + $0x2] ss:$9 sm:$0xff] %v3756_v15 }
 0x2b8   : > { %3833 = vst [vmem:[#allocation1 + $0x3] ss:$9 sm:$0xff] %v3757_v55 }
 0x2b9   : > { %3834 = vst [vmem:[#allocation1 + $0x4] ss:$9 sm:$0xff] %v3758_v50 }
 0x2ba   : > { %3835 = vst [vmem:[#allocation1 + $0x5] ss:$9 sm:$0xff] %v3759_v16 }
 0x2bb   : > { %3836 = vst [vmem:[#allocation1 + $0x6] ss:$9 sm:$0xff] %v3760_v54 }
 0x2bc   : > { %3837 = vst [vmem:[#allocation1 + $0x7] ss:$9 sm:$0xff] %v3761_v56 }
 0x2c3   : > { %v3838_v27 = vld [vmem:[#allocation1] sm:$0xff] }
 0x2c4   : > { %3873 = vperm.xlu1 %5173, %v3838_v27   ;;  %3839 = vst [vmem:[#allocation1] ss:$9 sm:$0xff] %v3762_v59 }
 0x2c5   : > { %3840 = vst [vmem:[#allocation1 + $0x1] ss:$9 sm:$0xff] %v3763_v37 }
 0x2c6   : > { %3841 = vst [vmem:[#allocation1 + $0x2] ss:$9 sm:$0xff] %v3764_v17 }
 0x2c7   : > { %3842 = vst [vmem:[#allocation1 + $0x3] ss:$9 sm:$0xff] %v3765_v6 }
 0x2c8   : > { %3843 = vst [vmem:[#allocation1 + $0x4] ss:$9 sm:$0xff] %v3766_v4 }
 0x2c9   : > { %3844 = vst [vmem:[#allocation1 + $0x5] ss:$9 sm:$0xff] %v3767_v20  ;;  %v3701_v20 = vperm.slane %v6291_v21, 2 }
 0x2ca   : > { %3845 = vst [vmem:[#allocation1 + $0x6] ss:$9 sm:$0xff] %v3768_v48 }
 0x2cb   : > { %3846 = vst [vmem:[#allocation1 + $0x7] ss:$9 sm:$0xff] %v3769_v62 }
 0x2d2   : > { %v3847_v29 = vld [vmem:[#allocation1] sm:$0xff] }
 0x2d3   : > { %3876 = vperm.xlu2 %5171, %v3847_v29   ;;  %3848 = vst [vmem:[#allocation1] ss:$9 sm:$0xff] %v3770_v9  ;;  %v3859_v9 = vpop.permute.xlu2 %3858  ;;  %v3881_v29 = vlaneseq }
 0x2d4   : > { %3849 = vst [vmem:[#allocation1 + $0x1] ss:$9 sm:$0xff] %v3771_v32 }
 0x2d5   : > { %3850 = vst [vmem:[#allocation1 + $0x2] ss:$9 sm:$0xff] %v3772_v25  ;;  %vm3971_vm11 = vcmp.lt.s32.totalorder %v3881_v29, 64 }
 0x2d6   : > { %3851 = vst [vmem:[#allocation1 + $0x3] ss:$9 sm:$0xff] %v3773_v52  ;;  %v3882_v52 = vand.u32 127, %v3881_v29 }
 0x2d7   : > { %3852 = vst [vmem:[#allocation1 + $0x4] ss:$9 sm:$0xff] %v3774_v19 }
 0x2d8   : > { %3853 = vst [vmem:[#allocation1 + $0x5] ss:$9 sm:$0xff] %v3775_v40  ;;  %v3888_v60 = vadd.s32 4294967280, %v3882_v52 }
 0x2d9   : > { %3854 = vst [vmem:[#allocation1 + $0x6] ss:$9 sm:$0xff] %v3776_v10  ;;  %v3884_v10 = vadd.s32 4294967288, %v3882_v52 }
 0x2da   : > { %3855 = vst [vmem:[#allocation1 + $0x7] ss:$9 sm:$0xff] %v3777_v23 }
 0x2dc   : > { %v3605_v58 = vpop.f32.mrf.mxu0 }
 0x2dd   : > { %v3618_v14 = vpop.f32.mrf.mxu1 }
 0x2e1   : > { %v6599_v61 = vld [vmem:[#allocation1] sm:$0xff] }
 0x2e2   : > { %3931 = vst [vmem:[#allocation1] ss:$9 sm:$0xff] %v3915_v26  ;;  %v3592_v46 = vpop.f32.mrf.mxu3 }
 0x2e3   : > { %3933 = vst [vmem:[#allocation1 + $0x1] ss:$9 sm:$0xff] %v3916_v13  ;;  %v3631_v47 = vpop.f32.mrf.mxu2  ;;  %v3593_v34 = vadd.f32 %v5176_v12, %v3592_v46 }
 0x2e4   : > { %3935 = vst [vmem:[#allocation1 + $0x2] ss:$9 sm:$0xff] %v3917_v24  ;;  %v3607_v36 = vpop.f32.mrf.mxu0  ;;  %v3883_v24 = vperm.slane %v3859_v9, %v3882_v52 }
 0x2e5   : > { %3937 = vst [vmem:[#allocation1 + $0x3] ss:$9 sm:$0xff] %v3918_v35  ;;  %v3620_v30 = vpop.f32.mrf.mxu1  ;;  %v3606_v42 = vadd.f32 %v3605_v58, %v3593_v34  ;;  %v3892_v58 = vadd.s32 4294967272, %v3882_v52 }
 0x2e6   : > { %3939 = vst [vmem:[#allocation1 + $0x4] ss:$9 sm:$0xff] %v3919_v49  ;;  %v3896_v49 = vadd.s32 4294967264, %v3882_v52  ;;  %v3904_v30 = vadd.s32 4294967248, %v3882_v52 }
 0x2e7   : > { %3941 = vst [vmem:[#allocation1 + $0x5] ss:$9 sm:$0xff] %v3920_v2  ;;  %v3619_v16 = vadd.f32 %v3618_v14, %v3606_v42  ;;  %v3900_v14 = vadd.s32 4294967256, %v3882_v52 }
 0x2e8   : > { %3943 = vst [vmem:[#allocation1 + $0x6] ss:$9 sm:$0xff] %v3921_v33 }
 0x2e9   : > { %3945 = vst [vmem:[#allocation1 + $0x7] ss:$9 sm:$0xff] %v3922_v3  ;;  %v3632_v54 = vadd.f32 %v3631_v47, %v3619_v16  ;;  %v3962_v3 = vadd.s32 4294967232, %v3882_v52 }
 0x2ea   : > { %v3594_v39 = vpop.f32.mrf.mxu3 }
 0x2eb   : > { %v3633_v5 = vpop.f32.mrf.mxu2  ;;  %v3964_v39 = vadd.s32 4294967224, %v3882_v52 }
 0x2ec   : > { %v3657_v11 = vpop.f32.mrf.mxu0  ;;  %v3908_v5 = vadd.s32 4294967240, %v3882_v52 }
 0x2ed   : > { %v3670_v8 = vpop.f32.mrf.mxu1 }
 0x2f0   : > { %v3946_v41 = vld [vmem:[#allocation1] sm:$0xff] }
 0x2f1   : > { %3957 = vperm.xlu0 %5172, %v3946_v41   ;;  %3947 = vst [vmem:[#allocation1] ss:$9 sm:$0xff] %v3923_v0 }
 0x2f2   : > { %3948 = vst [vmem:[#allocation1 + $0x1] ss:$9 sm:$0xff] %v3924_v38  ;;  %v3644_v18 = vpop.f32.mrf.mxu3 }
 0x2f3   : > { %3949 = vst [vmem:[#allocation1 + $0x2] ss:$9 sm:$0xff] %v3925_v63  ;;  %v3683_v22 = vpop.f32.mrf.mxu2  ;;  %v3645_v56 = vadd.f32 %v3644_v18, %v3632_v54 }
 0x2f4   : > { %3950 = vst [vmem:[#allocation1 + $0x3] ss:$9 sm:$0xff] %v3926_v28  ;;  %v3659_v43 = vpop.f32.mrf.mxu0 }
 0x2f5   : > { %3951 = vst [vmem:[#allocation1 + $0x4] ss:$9 sm:$0xff] %v3927_v7  ;;  %v3672_v45 = vpop.f32.mrf.mxu1  ;;  %v3658_v44 = vadd.f32 %v3657_v11, %v3645_v56 }
 0x2f6   : > { %3952 = vst [vmem:[#allocation1 + $0x5] ss:$9 sm:$0xff] %v3928_v1 }
 0x2f7   : > { %3953 = vst [vmem:[#allocation1 + $0x6] ss:$9 sm:$0xff] %v3929_v53  ;;  %v3671_v59 = vadd.f32 %v3670_v8, %v3658_v44 }
 0x2f8   : > { %3954 = vst [vmem:[#allocation1 + $0x7] ss:$9 sm:$0xff] %v3930_v57 }
 0x2f9   : > { %v3684_v27 = vadd.f32 %v3683_v22, %v3671_v59 }
 0x2fa   : > { %v3646_v15 = vpop.f32.mrf.mxu3  ;;  %v3862_v23 = vpop.permute.xlu0 %3861 }
 0x2fb   : > { %v3685_v55 = vpop.f32.mrf.mxu2  ;;  %v3885_v26 = vperm.slane %v3862_v23, %v3884_v10 }
 0x2ff   : > { %v3955_v50 = vld [vmem:[#allocation1] sm:$0xff] }
 0x300   : > { %3960 = vperm.xlu2 %5171, %v3955_v50   ;;  %v3868_v25 = vpop.permute.xlu2 %3867 }
 0x301   : > { %v3893_v2 = vperm.slane %v3868_v25, %v3892_v58 }
 0x303   : > { %v3696_v37 = vpop.f32.mrf.mxu3 }
 0x304   : > { %v3697_v17 = vadd.f32 %v3696_v37, %v3684_v27 }
 0x306   : > { %v3700_v4 = vmax.f32 %v3697_v17, 0.0 }
 0x308   : > { %v3702_v48 = vmul.f32 %v3701_v20, %v3700_v4 }
 0x309   : > { %v3865_v51 = vpop.permute.xlu1 %3864 }
 0x30a   : > { %v3703_v62 = vsel %vm1979_vm10, %v3702_v48, 0.0  ;;  %v3889_v13 = vperm.slane %v3865_v51, %v3888_v60  ;;  %vm3910_vm10 = vcmask 523712  }
 0x30b   : > { %v3698_v6 = vpop.f32.mrf.mxu3  ;;  %3704 = vadd.xlane.f32.xlu1 %v3703_v62 }
 0x30f   : > { %v3871_v21 = vpop.permute.xlu2 %3870 }
 0x310   : > { %v3897_v36 = vperm.slane %v3871_v21, %v3896_v49 }
 0x324   : > { %3879 = vperm.xlu1 %5173, %v6599_v61   ;;  %v3887_v61 = vsel %vm3886_vm2, %v3885_v26, %v3883_v24 }
 0x325   : > { %v3891_v46 = vsel %vm3890_vm4, %v3889_v13, %v3887_v61 }
 0x326   : > { %v3895_v47 = vsel %vm3894_vm5, %v3893_v2, %v3891_v46 }
 0x327   : > { %v3899_v0 = vsel %vm3898_vm6, %v3897_v36, %v3895_v47 }
 0x32d   : > { %v3877_v35 = vpop.permute.xlu2 %3876 }
 0x32e   : > { %v3905_v41 = vperm.slane %v3877_v35, %v3904_v30 }
 0x336   : > { %v3874_v32 = vpop.permute.xlu1 %3873 }
 0x337   : > { %v3901_v33 = vperm.slane %v3874_v32, %v3900_v14 }
 0x339   : > { %v3903_v63 = vsel %vm3902_vm7, %v3901_v33, %v3899_v0 }
 0x33a   : > { %v3907_v1 = vsel %vm3906_vm8, %v3905_v41, %v3903_v63 }
 0x35a   : > { %v3961_v38 = vpop.permute.xlu2 %3960 }
 0x35b   : > { %v3965_v7 = vperm.slane %v3961_v38, %v3964_v39 }
 0x363   : > { %v3958_v31 = vpop.permute.xlu0 %3957 }
 0x364   : > { %v3963_v28 = vperm.slane %v3958_v31, %v3962_v3 }
 0x366   : > { %v3967_v53 = vsel %vm3966_vm9, %v3965_v7, %v3963_v28 }
 0x37e   : > { %v3705_v19 = vpop.xlane.xlu1 %3704 }
 0x37f   : > { %v3977_v40 = vperm.slane %v3705_v19, %v3882_v52 }
 0x381   : > { %3980 = vst.msk [vmem:[%s337_s24] sm:$0x1] %vm3979_vm0, %v3977_v40 }
 0x396   : > { %v3880_v11 = vpop.permute.xlu1 %3879 }
 0x397   : > { %v3909_v8 = vperm.slane %v3880_v11, %v3908_v5 }
 0x399   : > { %v3911_v12 = vsel %vm3910_vm10, %v3909_v8, %v3907_v1 }
 0x39a   : > { %v3973_v18 = vsel %vm3971_vm11, %v3911_v12, %v3967_v53 }
 0x39b   : > { %3975 = vst.msk [vmem:[%s334_s27] sm:$0x1] %vm3974_vm12, %v3973_v18 }
 0x39c PF: > { %s20_s30 = sadd.s32 1, %s5184_s30  }
 0x39d   : > { %p17_p4 = scmp.ge.s32.totalorder %s20_s30, 4  }
 0x39f   :  { %19 = sbr.rel (!%p17_p4) target bundleno = 1 (0x1), region = 117 }

</bundles_post_ra>
